<compile_context>
chip_gen: v7x
topology: tpu7x:2x2x1
jax: 0.10.0
libtpu: 0.0.40
codegen_flags: <defaults>
</compile_context>

<pallas_src>
import functools

import jax
import jax.numpy as jnp
from jax.experimental import pallas as pl
from jax.experimental.pallas import tpu as pltpu

GAUSSIAN_STEPS = {1: 1.596, 2: 0.996, 3: 0.586, 4: 0.336}


# ---------------------------------------------------------------------------
# Fused kernel: quantize+mix weights (step 0) -> pad+cast -> im2col -> matmul.
#   steps/inv_steps/thrs/sw : (nb,) f32 SMEM scalars
#   w_ref   : (nb, O, K)       f32  per-branch weights, K = KH*KW*C (kh,kw,c)
#   x_ref   : (Bn, C, H, W)    f32  batch group, NCHW, unpadded
#   o_ref   : (Bn, O, Ho*Wo)   f32  NCHW-shaped, lane-dense output block
#   w_mix_ref : (O, K)         bf16 VMEM scratch (mixed weight, persists)
#   xpad_ref  : (Bn, C, Hp, Wp) bf16 VMEM scratch (padded+cast images)
#   patch_ref : (K, Bn*Ho*Wo)  bf16 VMEM scratch (lane-dense im2col patches)
# ---------------------------------------------------------------------------
def mix_quant_conv_kernel(steps_ref, inv_steps_ref, thrs_ref, sw_ref,
                          w_ref, x_ref, o_ref,
                          w_mix_ref, xpad_ref, patch_ref, *, KH, KW, pad):
    g = pl.program_id(0)
    nb, O, K = w_ref.shape
    Bn, C, H, W = x_ref.shape
    Hp, Wp = H + 2 * pad, W + 2 * pad
    Ho, Wo = Hp - KH + 1, Wp - KW + 1
    HW = Ho * Wo

    # ---- step 0 only (grid is sequential / "arbitrary"): -------------------
    #   * quantize + softmax-mix all branches into the resident bf16 weight
    #   * zero the padded-image scratch once (halo ring stays zero forever,
    #     the interior is overwritten every step)
    @pl.when(g == 0)
    def _():
        acc = jnp.zeros((O, K), jnp.float32)
        for i in range(nb):                            # static, nb <= 4
            wi = w_ref[i]                              # (O, K) f32
            # (round(w/step + 0.5) - 0.5) * step, clamped to +/- (lvls-0.5)*step
            q = (jnp.round(wi * inv_steps_ref[i] + 0.5) - 0.5) * steps_ref[i]
            q = jnp.clip(q, -thrs_ref[i], thrs_ref[i])
            acc = acc + q * sw_ref[i]
        w_mix_ref[...] = acc.astype(w_mix_ref.dtype)
        if pad > 0:
            xpad_ref[...] = jnp.zeros(xpad_ref.shape, xpad_ref.dtype)

    # ---- pad + cast this batch group's images (interior only) --------------
    xpad_ref[:, :, pad:pad + H, pad:pad + W] = x_ref[...].astype(xpad_ref.dtype)

    # ---- im2col: (K, Bn*Ho*Wo), output pixels on the lane axis -------------
    for b in range(Bn):                                # static
        xb = xpad_ref[b]                               # (C, Hp, Wp) bf16
        for kh in range(KH):                           # static tap loops
            for kw in range(KW):
                tap = kh * KW + kw
                win = xb[:, kh:kh + Ho, kw:kw + Wo]    # (C, Ho, Wo)
                patch_ref[tap * C:(tap + 1) * C, b * HW:(b + 1) * HW] = (
                    win.reshape(C, HW))

    # ---- one fat MXU matmul, f32 accumulation -------------------------------
    acc = jnp.dot(w_mix_ref[...], patch_ref[...],
                  preferred_element_type=jnp.float32)  # (O, Bn*HW) f32

    # ---- lane-dense NCHW store (no O padding, no post-kernel transpose) -----
    for b in range(Bn):
        o_ref[b] = acc[:, b * HW:(b + 1) * HW]


def _pick_batch_block(n, per_image_bytes, budget_bytes=8 << 20, cap=8):
    """Largest divisor of n (<= cap) whose per-step VMEM footprint fits."""
    bn = 1
    for d in range(1, min(n, cap) + 1):
        if n % d == 0 and d * per_image_bytes <= budget_bytes:
            bn = d
    return bn


# ---------------------------------------------------------------------------
# Wrapper: reproduces MixQuantConv2d.forward
#   x       : (N, C, H, W)             float32 (PyTorch NCHW)
#   weights : (num_bits, O, C, KH, KW) float32 (one Conv2d weight per bit)
#   alpha   : (num_bits,)              float32
# ---------------------------------------------------------------------------
@functools.partial(jax.jit, static_argnames=("bits", "stride", "padding",
                                             "dilation", "groups"))
def mix_quant_conv2d(x, weights, alpha, *, bits, stride=1, padding=1,
                     dilation=1, groups=1):
    assert stride == 1 and dilation == 1 and groups == 1, (
        "only stride=1, dilation=1, groups=1 is implemented")
    nb, O, C, KH, KW = weights.shape
    assert nb == len(bits)
    K = KH * KW * C
    N, _, H, W = x.shape
    Hp, Wp = H + 2 * padding, W + 2 * padding
    Ho, Wo = Hp - KH + 1, Wp - KW + 1
    HW = Ho * Wo

    # ---- scalar glue (softmax over alpha, per-branch std -> step/thr) ------
    sw = jax.nn.softmax(alpha.astype(jnp.float32), axis=0)
    # torch.std() is unbiased (ddof=1); vectorized over branches (one pass).
    stds = jnp.std(weights.reshape(nb, -1).astype(jnp.float32), axis=1, ddof=1)
    base_steps = jnp.asarray([GAUSSIAN_STEPS[b] for b in bits], jnp.float32)
    steps = base_steps * stds
    inv_steps = 1.0 / steps
    lvls = jnp.asarray([2.0 ** b / 2.0 for b in bits], jnp.float32)
    thrs = (lvls - 0.5) * steps

    # ---- per-bit weights as (nb, O, K) with K ordered (kh, kw, c) -----------
    w_k = jnp.transpose(weights, (0, 1, 3, 4, 2)).reshape(nb, O, K)
    w_k = w_k.astype(jnp.float32)

    # ---- batch-group size (fits VMEM, divides N) ----------------------------
    per_img = (2 * C * H * W * 4          # x block (f32, double-buffered)
               + C * Hp * Wp * 2          # padded image scratch (bf16)
               + K * HW * 2               # patch scratch columns (bf16)
               + 2 * O * HW * 4)          # output block (f32, double-buffered)
    Bn = _pick_batch_block(N, per_img)
    n_groups = N // Bn

    out = pl.pallas_call(
        functools.partial(mix_quant_conv_kernel, KH=KH, KW=KW, pad=padding),
        grid=(n_groups,),
        out_shape=jax.ShapeDtypeStruct((N, O, HW), jnp.float32),
        in_specs=[
            pl.BlockSpec(memory_space=pltpu.MemorySpace.SMEM),     # steps
            pl.BlockSpec(memory_space=pltpu.MemorySpace.SMEM),     # inv_steps
            pl.BlockSpec(memory_space=pltpu.MemorySpace.SMEM),     # thrs
            pl.BlockSpec(memory_space=pltpu.MemorySpace.SMEM),     # sw
            pl.BlockSpec((nb, O, K), lambda g: (0, 0, 0)),         # weights
            pl.BlockSpec((Bn, C, H, W), lambda g: (g, 0, 0, 0)),   # x group
        ],
        out_specs=pl.BlockSpec((Bn, O, HW), lambda g: (g, 0, 0)),
        scratch_shapes=[
            pltpu.VMEM((O, K), jnp.bfloat16),              # mixed weight
            pltpu.VMEM((Bn, C, Hp, Wp), jnp.bfloat16),     # padded images
            pltpu.VMEM((K, Bn * HW), jnp.bfloat16),        # im2col patches
        ],
        # Must stay "arbitrary": step-0 initializes the resident mixed-weight
        # and halo-zero scratches (see TODO on v7x dual-TC parallel axis).
        compiler_params=pltpu.CompilerParams(
            dimension_semantics=("arbitrary",)),
    )(steps, inv_steps, thrs, sw, w_k, x.astype(jnp.float32))

    return out.reshape(N, O, Ho, Wo)                       # NCHW, free reshape


# ---------------------------------------------------------------------------
# Pure-JAX f32 reference (mirrors the PyTorch forward) for correctness check.
# ---------------------------------------------------------------------------
def mix_quant_conv2d_ref(x, weights, alpha, *, bits, padding=1):
    sw = jax.nn.softmax(alpha.astype(jnp.float32), axis=0)
    mixed = jnp.zeros(weights.shape[1:], jnp.float32)
    for i, bit in enumerate(bits):
        w = weights[i]
        step = GAUSSIAN_STEPS[bit] * jnp.std(w, ddof=1)
        lvls = 2.0 ** bit / 2.0
        q = (jnp.round(w / step + 0.5) - 0.5) * step
        q = jnp.clip(q, -(lvls - 0.5) * step, (lvls - 0.5) * step)
        mixed = mixed + q * sw[i]
    return jax.lax.conv_general_dilated(
        x, mixed, window_strides=(1, 1),
        padding=((padding, padding), (padding, padding)),
        dimension_numbers=("NCHW", "OIHW", "NCHW"))


if __name__ == "__main__":
    # Module config: MixQuantConv2d(inplane=4, outplane=8, bits=[2, 4],
    #                               kernel_size=3, stride=1, padding=1, bias=False)
    bits = (2, 4)
    N, C, H, W = 2, 4, 16, 16
    O, KH, KW = 8, 3, 3

    key = jax.random.PRNGKey(0)
    kx, kw = jax.random.split(key)

    x = jax.random.normal(kx, (N, C, H, W), jnp.float32)

    # Conv2d default init: uniform(-1/sqrt(fan_in), 1/sqrt(fan_in)), one per bit.
    fan_in = C * KH * KW
    bound = 1.0 / (fan_in ** 0.5)
    weights = jax.random.uniform(
        kw, (len(bits), O, C, KH, KW), jnp.float32, minval=-bound, maxval=bound)

    # alpha_weight.data.fill_(0.01)
    alpha = jnp.full((len(bits),), 0.01, jnp.float32)

    out = mix_quant_conv2d(x, weights, alpha, bits=bits, padding=1)
    out = jax.block_until_ready(out)

    ref = mix_quant_conv2d_ref(x, weights, alpha, bits=bits, padding=1)
    assert out.shape == (N, O, H, W), out.shape
    # bf16 MXU path (bf16 weights/activations, f32 accumulation) -> relaxed tol.
    assert jnp.allclose(out, ref, atol=3e-2, rtol=3e-2), "mismatch vs reference"

    print("KERNEL_OK")
</pallas_src>

<mosaic_0001>
module attributes {stable_mosaic.version = 11 : i64} {
  func.func @mix_quant_conv_kernel(%arg0: i32, %arg1: memref<2xf32, #tpu.memory_space<smem>>, %arg2: memref<2xf32, #tpu.memory_space<smem>>, %arg3: memref<2xf32, #tpu.memory_space<smem>>, %arg4: memref<2xf32, #tpu.memory_space<smem>>, %arg5: memref<2x8x36xf32, #tpu.memory_space<vmem>>, %arg6: memref<2x4x16x16xf32, #tpu.memory_space<vmem>>, %arg7: memref<2x8x256xf32, #tpu.memory_space<vmem>>, %arg8: memref<8x36xbf16, #tpu.memory_space<vmem>>, %arg9: memref<2x4x18x18xbf16, #tpu.memory_space<vmem>>, %arg10: memref<36x512xbf16, #tpu.memory_space<vmem>>) attributes {dimension_semantics = [#tpu.dimension_semantics<arbitrary>], iteration_bounds = array<i64: 1>, scalar_prefetch = 0 : i64, scratch_operands = 3 : i64, tpu.core_type = #tpu.core_type<tc>, window_params = [{transform_indices = @transform_0, window_bounds = array<i64: 2>}, {transform_indices = @transform_1, window_bounds = array<i64: 2>}, {transform_indices = @transform_2, window_bounds = array<i64: 2>}, {transform_indices = @transform_3, window_bounds = array<i64: 2>}, {pipeline_mode = #tpu.pipeline_mode<synchronous>, transform_indices = @transform_4, window_bounds = array<i64: 2, 8, 36>}, {transform_indices = @transform_5, window_bounds = array<i64: 2, 4, 16, 16>}, {transform_indices = @transform_6, window_bounds = array<i64: 2, 8, 256>}]} {
    %c0_i32 = arith.constant 0 : i32
    %0 = arith.cmpi eq, %arg0, %c0_i32 : i32
    %1 = arith.extui %0 : i1 to i32
    %c0_i32_0 = arith.constant 0 : i32
    %2 = arith.cmpi ne, %1, %c0_i32_0 : i32
    scf.if %2 {
      %cst_52 = arith.constant 0.000000e+00 : f32
      %75 = vector.broadcast %cst_52 : f32 to vector<8x36xf32>
      %c0_53 = arith.constant 0 : index
      %c0_54 = arith.constant 0 : index
      %c0_55 = arith.constant 0 : index
      %76 = vector.load %arg5[%c0_53, %c0_54, %c0_55] : memref<2x8x36xf32, #tpu.memory_space<vmem>>, vector<1x8x36xf32>
      %77 = vector.shape_cast %76 : vector<1x8x36xf32> to vector<8x36xf32>
      %c0_56 = arith.constant 0 : index
      %78 = memref.load %arg2[%c0_56] : memref<2xf32, #tpu.memory_space<smem>>
      %79 = vector.broadcast %78 : f32 to vector<8x36xf32>
      %80 = arith.mulf %77, %79 : vector<8x36xf32>
      %cst_57 = arith.constant 5.000000e-01 : f32
      %81 = vector.broadcast %cst_57 : f32 to vector<8x36xf32>
      %82 = arith.addf %80, %81 : vector<8x36xf32>
      %83 = math.roundeven %82 : vector<8x36xf32>
      %cst_58 = arith.constant 5.000000e-01 : f32
      %84 = vector.broadcast %cst_58 : f32 to vector<8x36xf32>
      %85 = arith.subf %83, %84 : vector<8x36xf32>
      %c0_59 = arith.constant 0 : index
      %86 = memref.load %arg1[%c0_59] : memref<2xf32, #tpu.memory_space<smem>>
      %87 = vector.broadcast %86 : f32 to vector<8x36xf32>
      %88 = arith.mulf %85, %87 : vector<8x36xf32>
      %c0_60 = arith.constant 0 : index
      %89 = memref.load %arg3[%c0_60] : memref<2xf32, #tpu.memory_space<smem>>
      %cst_61 = arith.constant 0.000000e+00 : f32
      %90 = arith.subf %cst_61, %89 : f32
      %c0_62 = arith.constant 0 : index
      %91 = memref.load %arg3[%c0_62] : memref<2xf32, #tpu.memory_space<smem>>
      %92 = vector.broadcast %90 : f32 to vector<8x36xf32>
      %93 = arith.maximumf %92, %88 : vector<8x36xf32>
      %94 = vector.broadcast %91 : f32 to vector<8x36xf32>
      %95 = arith.minimumf %94, %93 : vector<8x36xf32>
      %c0_63 = arith.constant 0 : index
      %96 = memref.load %arg4[%c0_63] : memref<2xf32, #tpu.memory_space<smem>>
      %97 = vector.broadcast %96 : f32 to vector<8x36xf32>
      %98 = arith.mulf %95, %97 : vector<8x36xf32>
      %99 = arith.addf %75, %98 : vector<8x36xf32>
      %c1_64 = arith.constant 1 : index
      %c0_65 = arith.constant 0 : index
      %c0_66 = arith.constant 0 : index
      %100 = vector.load %arg5[%c1_64, %c0_65, %c0_66] : memref<2x8x36xf32, #tpu.memory_space<vmem>>, vector<1x8x36xf32>
      %101 = vector.shape_cast %100 : vector<1x8x36xf32> to vector<8x36xf32>
      %c1_67 = arith.constant 1 : index
      %102 = memref.load %arg2[%c1_67] : memref<2xf32, #tpu.memory_space<smem>>
      %103 = vector.broadcast %102 : f32 to vector<8x36xf32>
      %104 = arith.mulf %101, %103 : vector<8x36xf32>
      %cst_68 = arith.constant 5.000000e-01 : f32
      %105 = vector.broadcast %cst_68 : f32 to vector<8x36xf32>
      %106 = arith.addf %104, %105 : vector<8x36xf32>
      %107 = math.roundeven %106 : vector<8x36xf32>
      %cst_69 = arith.constant 5.000000e-01 : f32
      %108 = vector.broadcast %cst_69 : f32 to vector<8x36xf32>
      %109 = arith.subf %107, %108 : vector<8x36xf32>
      %c1_70 = arith.constant 1 : index
      %110 = memref.load %arg1[%c1_70] : memref<2xf32, #tpu.memory_space<smem>>
      %111 = vector.broadcast %110 : f32 to vector<8x36xf32>
      %112 = arith.mulf %109, %111 : vector<8x36xf32>
      %c1_71 = arith.constant 1 : index
      %113 = memref.load %arg3[%c1_71] : memref<2xf32, #tpu.memory_space<smem>>
      %cst_72 = arith.constant 0.000000e+00 : f32
      %114 = arith.subf %cst_72, %113 : f32
      %c1_73 = arith.constant 1 : index
      %115 = memref.load %arg3[%c1_73] : memref<2xf32, #tpu.memory_space<smem>>
      %116 = vector.broadcast %114 : f32 to vector<8x36xf32>
      %117 = arith.maximumf %116, %112 : vector<8x36xf32>
      %118 = vector.broadcast %115 : f32 to vector<8x36xf32>
      %119 = arith.minimumf %118, %117 : vector<8x36xf32>
      %c1_74 = arith.constant 1 : index
      %120 = memref.load %arg4[%c1_74] : memref<2xf32, #tpu.memory_space<smem>>
      %121 = vector.broadcast %120 : f32 to vector<8x36xf32>
      %122 = arith.mulf %119, %121 : vector<8x36xf32>
      %123 = arith.addf %99, %122 : vector<8x36xf32>
      %124 = arith.truncf %123 : vector<8x36xf32> to vector<8x36xbf16>
      %c0_75 = arith.constant 0 : index
      %c0_76 = arith.constant 0 : index
      %125 = vector.load %arg8[%c0_75, %c0_76] : memref<8x36xbf16, #tpu.memory_space<vmem>>, vector<8x36xbf16>
      tpu.vector_store %arg8[%c0_75, %c0_76], %124 {strides = array<i32>} : memref<8x36xbf16, #tpu.memory_space<vmem>>, vector<8x36xbf16>,
      %cst_77 = arith.constant 0.000000e+00 : bf16
      %126 = vector.broadcast %cst_77 : bf16 to vector<2x4x18x18xbf16>
      %c0_78 = arith.constant 0 : index
      %c0_79 = arith.constant 0 : index
      %c0_80 = arith.constant 0 : index
      %c0_81 = arith.constant 0 : index
      %127 = vector.load %arg9[%c0_78, %c0_79, %c0_80, %c0_81] : memref<2x4x18x18xbf16, #tpu.memory_space<vmem>>, vector<2x4x18x18xbf16>
      tpu.vector_store %arg9[%c0_78, %c0_79, %c0_80, %c0_81], %126 {strides = array<i32>} : memref<2x4x18x18xbf16, #tpu.memory_space<vmem>>, vector<2x4x18x18xbf16>,
    } else {
    }
    %c0 = arith.constant 0 : index
    %c0_1 = arith.constant 0 : index
    %c0_2 = arith.constant 0 : index
    %c0_3 = arith.constant 0 : index
    %3 = vector.load %arg6[%c0, %c0_1, %c0_2, %c0_3] : memref<2x4x16x16xf32, #tpu.memory_space<vmem>>, vector<2x4x16x16xf32>
    %4 = arith.truncf %3 : vector<2x4x16x16xf32> to vector<2x4x16x16xbf16>
    %c0_4 = arith.constant 0 : index
    %c0_5 = arith.constant 0 : index
    %c1 = arith.constant 1 : index
    %c1_6 = arith.constant 1 : index
    %5 = vector.load %arg9[%c0_4, %c0_5, %c1, %c1_6] : memref<2x4x18x18xbf16, #tpu.memory_space<vmem>>, vector<2x4x16x16xbf16>
    tpu.vector_store %arg9[%c0_4, %c0_5, %c1, %c1_6], %4 {strides = array<i32>} : memref<2x4x18x18xbf16, #tpu.memory_space<vmem>>, vector<2x4x16x16xbf16>,
    %c0_7 = arith.constant 0 : index
    %c0_8 = arith.constant 0 : index
    %c0_9 = arith.constant 0 : index
    %c0_10 = arith.constant 0 : index
    %6 = vector.load %arg9[%c0_7, %c0_8, %c0_9, %c0_10] : memref<2x4x18x18xbf16, #tpu.memory_space<vmem>>, vector<1x4x18x18xbf16>
    %7 = vector.shape_cast %6 : vector<1x4x18x18xbf16> to vector<4x18x18xbf16>
    %8 = vector.extract_strided_slice %7 {offsets = [0, 0, 0], sizes = [4, 16, 16], strides = [1, 1, 1]} : vector<4x18x18xbf16> to vector<4x16x16xbf16>
    %9 = vector.shape_cast %8 : vector<4x16x16xbf16> to vector<4x256xbf16>
    %c0_11 = arith.constant 0 : index
    %c0_12 = arith.constant 0 : index
    %10 = vector.load %arg10[%c0_11, %c0_12] : memref<36x512xbf16, #tpu.memory_space<vmem>>, vector<4x256xbf16>
    tpu.vector_store %arg10[%c0_11, %c0_12], %9 {strides = array<i32>} : memref<36x512xbf16, #tpu.memory_space<vmem>>, vector<4x256xbf16>,
    %11 = vector.extract_strided_slice %7 {offsets = [0, 0, 1], sizes = [4, 16, 16], strides = [1, 1, 1]} : vector<4x18x18xbf16> to vector<4x16x16xbf16>
    %12 = vector.shape_cast %11 : vector<4x16x16xbf16> to vector<4x256xbf16>
    %c4 = arith.constant 4 : index
    %c0_13 = arith.constant 0 : index
    %13 = vector.load %arg10[%c4, %c0_13] : memref<36x512xbf16, #tpu.memory_space<vmem>>, vector<4x256xbf16>
    tpu.vector_store %arg10[%c4, %c0_13], %12 {strides = array<i32>} : memref<36x512xbf16, #tpu.memory_space<vmem>>, vector<4x256xbf16>,
    %14 = vector.extract_strided_slice %7 {offsets = [0, 0, 2], sizes = [4, 16, 16], strides = [1, 1, 1]} : vector<4x18x18xbf16> to vector<4x16x16xbf16>
    %15 = vector.shape_cast %14 : vector<4x16x16xbf16> to vector<4x256xbf16>
    %c8 = arith.constant 8 : index
    %c0_14 = arith.constant 0 : index
    %16 = vector.load %arg10[%c8, %c0_14] : memref<36x512xbf16, #tpu.memory_space<vmem>>, vector<4x256xbf16>
    tpu.vector_store %arg10[%c8, %c0_14], %15 {strides = array<i32>} : memref<36x512xbf16, #tpu.memory_space<vmem>>, vector<4x256xbf16>,
    %17 = vector.extract_strided_slice %7 {offsets = [0, 1, 0], sizes = [4, 16, 16], strides = [1, 1, 1]} : vector<4x18x18xbf16> to vector<4x16x16xbf16>
    %18 = vector.shape_cast %17 : vector<4x16x16xbf16> to vector<4x256xbf16>
    %c12 = arith.constant 12 : index
    %c0_15 = arith.constant 0 : index
    %19 = vector.load %arg10[%c12, %c0_15] : memref<36x512xbf16, #tpu.memory_space<vmem>>, vector<4x256xbf16>
    tpu.vector_store %arg10[%c12, %c0_15], %18 {strides = array<i32>} : memref<36x512xbf16, #tpu.memory_space<vmem>>, vector<4x256xbf16>,
    %20 = vector.extract_strided_slice %7 {offsets = [0, 1, 1], sizes = [4, 16, 16], strides = [1, 1, 1]} : vector<4x18x18xbf16> to vector<4x16x16xbf16>
    %21 = vector.shape_cast %20 : vector<4x16x16xbf16> to vector<4x256xbf16>
    %c16 = arith.constant 16 : index
    %c0_16 = arith.constant 0 : index
    %22 = vector.load %arg10[%c16, %c0_16] : memref<36x512xbf16, #tpu.memory_space<vmem>>, vector<4x256xbf16>
    tpu.vector_store %arg10[%c16, %c0_16], %21 {strides = array<i32>} : memref<36x512xbf16, #tpu.memory_space<vmem>>, vector<4x256xbf16>,
    %23 = vector.extract_strided_slice %7 {offsets = [0, 1, 2], sizes = [4, 16, 16], strides = [1, 1, 1]} : vector<4x18x18xbf16> to vector<4x16x16xbf16>
    %24 = vector.shape_cast %23 : vector<4x16x16xbf16> to vector<4x256xbf16>
    %c20 = arith.constant 20 : index
    %c0_17 = arith.constant 0 : index
    %25 = vector.load %arg10[%c20, %c0_17] : memref<36x512xbf16, #tpu.memory_space<vmem>>, vector<4x256xbf16>
    tpu.vector_store %arg10[%c20, %c0_17], %24 {strides = array<i32>} : memref<36x512xbf16, #tpu.memory_space<vmem>>, vector<4x256xbf16>,
    %26 = vector.extract_strided_slice %7 {offsets = [0, 2, 0], sizes = [4, 16, 16], strides = [1, 1, 1]} : vector<4x18x18xbf16> to vector<4x16x16xbf16>
    %27 = vector.shape_cast %26 : vector<4x16x16xbf16> to vector<4x256xbf16>
    %c24 = arith.constant 24 : index
    %c0_18 = arith.constant 0 : index
    %28 = vector.load %arg10[%c24, %c0_18] : memref<36x512xbf16, #tpu.memory_space<vmem>>, vector<4x256xbf16>
    tpu.vector_store %arg10[%c24, %c0_18], %27 {strides = array<i32>} : memref<36x512xbf16, #tpu.memory_space<vmem>>, vector<4x256xbf16>,
    %29 = vector.extract_strided_slice %7 {offsets = [0, 2, 1], sizes = [4, 16, 16], strides = [1, 1, 1]} : vector<4x18x18xbf16> to vector<4x16x16xbf16>
    %30 = vector.shape_cast %29 : vector<4x16x16xbf16> to vector<4x256xbf16>
    %c28 = arith.constant 28 : index
    %c0_19 = arith.constant 0 : index
    %31 = vector.load %arg10[%c28, %c0_19] : memref<36x512xbf16, #tpu.memory_space<vmem>>, vector<4x256xbf16>
    tpu.vector_store %arg10[%c28, %c0_19], %30 {strides = array<i32>} : memref<36x512xbf16, #tpu.memory_space<vmem>>, vector<4x256xbf16>,
    %32 = vector.extract_strided_slice %7 {offsets = [0, 2, 2], sizes = [4, 16, 16], strides = [1, 1, 1]} : vector<4x18x18xbf16> to vector<4x16x16xbf16>
    %33 = vector.shape_cast %32 : vector<4x16x16xbf16> to vector<4x256xbf16>
    %c32 = arith.constant 32 : index
    %c0_20 = arith.constant 0 : index
    %34 = vector.load %arg10[%c32, %c0_20] : memref<36x512xbf16, #tpu.memory_space<vmem>>, vector<4x256xbf16>
    tpu.vector_store %arg10[%c32, %c0_20], %33 {strides = array<i32>} : memref<36x512xbf16, #tpu.memory_space<vmem>>, vector<4x256xbf16>,
    %c1_21 = arith.constant 1 : index
    %c0_22 = arith.constant 0 : index
    %c0_23 = arith.constant 0 : index
    %c0_24 = arith.constant 0 : index
    %35 = vector.load %arg9[%c1_21, %c0_22, %c0_23, %c0_24] : memref<2x4x18x18xbf16, #tpu.memory_space<vmem>>, vector<1x4x18x18xbf16>
    %36 = vector.shape_cast %35 : vector<1x4x18x18xbf16> to vector<4x18x18xbf16>
    %37 = vector.extract_strided_slice %36 {offsets = [0, 0, 0], sizes = [4, 16, 16], strides = [1, 1, 1]} : vector<4x18x18xbf16> to vector<4x16x16xbf16>
    %38 = vector.shape_cast %37 : vector<4x16x16xbf16> to vector<4x256xbf16>
    %c0_25 = arith.constant 0 : index
    %c256 = arith.constant 256 : index
    %39 = vector.load %arg10[%c0_25, %c256] : memref<36x512xbf16, #tpu.memory_space<vmem>>, vector<4x256xbf16>
    tpu.vector_store %arg10[%c0_25, %c256], %38 {strides = array<i32>} : memref<36x512xbf16, #tpu.memory_space<vmem>>, vector<4x256xbf16>,
    %40 = vector.extract_strided_slice %36 {offsets = [0, 0, 1], sizes = [4, 16, 16], strides = [1, 1, 1]} : vector<4x18x18xbf16> to vector<4x16x16xbf16>
    %41 = vector.shape_cast %40 : vector<4x16x16xbf16> to vector<4x256xbf16>
    %c4_26 = arith.constant 4 : index
    %c256_27 = arith.constant 256 : index
    %42 = vector.load %arg10[%c4_26, %c256_27] : memref<36x512xbf16, #tpu.memory_space<vmem>>, vector<4x256xbf16>
    tpu.vector_store %arg10[%c4_26, %c256_27], %41 {strides = array<i32>} : memref<36x512xbf16, #tpu.memory_space<vmem>>, vector<4x256xbf16>,
    %43 = vector.extract_strided_slice %36 {offsets = [0, 0, 2], sizes = [4, 16, 16], strides = [1, 1, 1]} : vector<4x18x18xbf16> to vector<4x16x16xbf16>
    %44 = vector.shape_cast %43 : vector<4x16x16xbf16> to vector<4x256xbf16>
    %c8_28 = arith.constant 8 : index
    %c256_29 = arith.constant 256 : index
    %45 = vector.load %arg10[%c8_28, %c256_29] : memref<36x512xbf16, #tpu.memory_space<vmem>>, vector<4x256xbf16>
    tpu.vector_store %arg10[%c8_28, %c256_29], %44 {strides = array<i32>} : memref<36x512xbf16, #tpu.memory_space<vmem>>, vector<4x256xbf16>,
    %46 = vector.extract_strided_slice %36 {offsets = [0, 1, 0], sizes = [4, 16, 16], strides = [1, 1, 1]} : vector<4x18x18xbf16> to vector<4x16x16xbf16>
    %47 = vector.shape_cast %46 : vector<4x16x16xbf16> to vector<4x256xbf16>
    %c12_30 = arith.constant 12 : index
    %c256_31 = arith.constant 256 : index
    %48 = vector.load %arg10[%c12_30, %c256_31] : memref<36x512xbf16, #tpu.memory_space<vmem>>, vector<4x256xbf16>
    tpu.vector_store %arg10[%c12_30, %c256_31], %47 {strides = array<i32>} : memref<36x512xbf16, #tpu.memory_space<vmem>>, vector<4x256xbf16>,
    %49 = vector.extract_strided_slice %36 {offsets = [0, 1, 1], sizes = [4, 16, 16], strides = [1, 1, 1]} : vector<4x18x18xbf16> to vector<4x16x16xbf16>
    %50 = vector.shape_cast %49 : vector<4x16x16xbf16> to vector<4x256xbf16>
    %c16_32 = arith.constant 16 : index
    %c256_33 = arith.constant 256 : index
    %51 = vector.load %arg10[%c16_32, %c256_33] : memref<36x512xbf16, #tpu.memory_space<vmem>>, vector<4x256xbf16>
    tpu.vector_store %arg10[%c16_32, %c256_33], %50 {strides = array<i32>} : memref<36x512xbf16, #tpu.memory_space<vmem>>, vector<4x256xbf16>,
    %52 = vector.extract_strided_slice %36 {offsets = [0, 1, 2], sizes = [4, 16, 16], strides = [1, 1, 1]} : vector<4x18x18xbf16> to vector<4x16x16xbf16>
    %53 = vector.shape_cast %52 : vector<4x16x16xbf16> to vector<4x256xbf16>
    %c20_34 = arith.constant 20 : index
    %c256_35 = arith.constant 256 : index
    %54 = vector.load %arg10[%c20_34, %c256_35] : memref<36x512xbf16, #tpu.memory_space<vmem>>, vector<4x256xbf16>
    tpu.vector_store %arg10[%c20_34, %c256_35], %53 {strides = array<i32>} : memref<36x512xbf16, #tpu.memory_space<vmem>>, vector<4x256xbf16>,
    %55 = vector.extract_strided_slice %36 {offsets = [0, 2, 0], sizes = [4, 16, 16], strides = [1, 1, 1]} : vector<4x18x18xbf16> to vector<4x16x16xbf16>
    %56 = vector.shape_cast %55 : vector<4x16x16xbf16> to vector<4x256xbf16>
    %c24_36 = arith.constant 24 : index
    %c256_37 = arith.constant 256 : index
    %57 = vector.load %arg10[%c24_36, %c256_37] : memref<36x512xbf16, #tpu.memory_space<vmem>>, vector<4x256xbf16>
    tpu.vector_store %arg10[%c24_36, %c256_37], %56 {strides = array<i32>} : memref<36x512xbf16, #tpu.memory_space<vmem>>, vector<4x256xbf16>,
    %58 = vector.extract_strided_slice %36 {offsets = [0, 2, 1], sizes = [4, 16, 16], strides = [1, 1, 1]} : vector<4x18x18xbf16> to vector<4x16x16xbf16>
    %59 = vector.shape_cast %58 : vector<4x16x16xbf16> to vector<4x256xbf16>
    %c28_38 = arith.constant 28 : index
    %c256_39 = arith.constant 256 : index
    %60 = vector.load %arg10[%c28_38, %c256_39] : memref<36x512xbf16, #tpu.memory_space<vmem>>, vector<4x256xbf16>
    tpu.vector_store %arg10[%c28_38, %c256_39], %59 {strides = array<i32>} : memref<36x512xbf16, #tpu.memory_space<vmem>>, vector<4x256xbf16>,
    %61 = vector.extract_strided_slice %36 {offsets = [0, 2, 2], sizes = [4, 16, 16], strides = [1, 1, 1]} : vector<4x18x18xbf16> to vector<4x16x16xbf16>
    %62 = vector.shape_cast %61 : vector<4x16x16xbf16> to vector<4x256xbf16>
    %c32_40 = arith.constant 32 : index
    %c256_41 = arith.constant 256 : index
    %63 = vector.load %arg10[%c32_40, %c256_41] : memref<36x512xbf16, #tpu.memory_space<vmem>>, vector<4x256xbf16>
    tpu.vector_store %arg10[%c32_40, %c256_41], %62 {strides = array<i32>} : memref<36x512xbf16, #tpu.memory_space<vmem>>, vector<4x256xbf16>,
    %c0_42 = arith.constant 0 : index
    %c0_43 = arith.constant 0 : index
    %64 = vector.load %arg8[%c0_42, %c0_43] : memref<8x36xbf16, #tpu.memory_space<vmem>>, vector<8x36xbf16>
    %c0_44 = arith.constant 0 : index
    %c0_45 = arith.constant 0 : index
    %65 = vector.load %arg10[%c0_44, %c0_45] : memref<36x512xbf16, #tpu.memory_space<vmem>>, vector<36x512xbf16>
    %cst = arith.constant dense<0.000000e+00> : vector<8x512xf32>
    %66 = tpu.matmul %64, %65, %cst {dimension_numbers = #tpu.dot_dimension_numbers<[1], [0], [0], [1], [0, 0, 1, 1], [], []>} : vector<8x36xbf16>, vector<36x512xbf16>, vector<8x512xf32> -> vector<8x512xf32>
    %67 = vector.extract_strided_slice %66 {offsets = [0, 0], sizes = [8, 256], strides = [1, 1]} : vector<8x512xf32> to vector<8x256xf32>
    %c0_46 = arith.constant 0 : index
    %c0_47 = arith.constant 0 : index
    %c0_48 = arith.constant 0 : index
    %68 = vector.load %arg7[%c0_46, %c0_47, %c0_48] : memref<2x8x256xf32, #tpu.memory_space<vmem>>, vector<1x8x256xf32>
    %69 = vector.shape_cast %68 : vector<1x8x256xf32> to vector<8x256xf32>
    %70 = vector.shape_cast %67 : vector<8x256xf32> to vector<1x8x256xf32>
    tpu.vector_store %arg7[%c0_46, %c0_47, %c0_48], %70 {strides = array<i32>} : memref<2x8x256xf32, #tpu.memory_space<vmem>>, vector<1x8x256xf32>,
    %71 = vector.extract_strided_slice %66 {offsets = [0, 256], sizes = [8, 256], strides = [1, 1]} : vector<8x512xf32> to vector<8x256xf32>
    %c1_49 = arith.constant 1 : index
    %c0_50 = arith.constant 0 : index
    %c0_51 = arith.constant 0 : index
    %72 = vector.load %arg7[%c1_49, %c0_50, %c0_51] : memref<2x8x256xf32, #tpu.memory_space<vmem>>, vector<1x8x256xf32>
    %73 = vector.shape_cast %72 : vector<1x8x256xf32> to vector<8x256xf32>
    %74 = vector.shape_cast %71 : vector<8x256xf32> to vector<1x8x256xf32>
    tpu.vector_store %arg7[%c1_49, %c0_50, %c0_51], %74 {strides = array<i32>} : memref<2x8x256xf32, #tpu.memory_space<vmem>>, vector<1x8x256xf32>,
    return
  }
  func.func @transform_0(%arg0: i32) -> i32 {
    %c0_i32 = arith.constant 0 : i32
    %c0_i32_0 = arith.constant 0 : i32
    return %c0_i32 : i32
  }
  func.func @transform_1(%arg0: i32) -> i32 {
    %c0_i32 = arith.constant 0 : i32
    %c0_i32_0 = arith.constant 0 : i32
    return %c0_i32 : i32
  }
  func.func @transform_2(%arg0: i32) -> i32 {
    %c0_i32 = arith.constant 0 : i32
    %c0_i32_0 = arith.constant 0 : i32
    return %c0_i32 : i32
  }
  func.func @transform_3(%arg0: i32) -> i32 {
    %c0_i32 = arith.constant 0 : i32
    %c0_i32_0 = arith.constant 0 : i32
    return %c0_i32 : i32
  }
  func.func @transform_4(%arg0: i32) -> (i32, i32, i32) {
    %c0_i32 = arith.constant 0 : i32
    %c0_i32_0 = arith.constant 0 : i32
    %c0_i32_1 = arith.constant 0 : i32
    %c0_i32_2 = arith.constant 0 : i32
    return %c0_i32, %c0_i32_0, %c0_i32_1 : i32, i32, i32
  }
  func.func @transform_5(%arg0: i32) -> (i32, i32, i32, i32) {
    %c0_i32 = arith.constant 0 : i32
    %c0_i32_0 = arith.constant 0 : i32
    %c0_i32_1 = arith.constant 0 : i32
    %c0_i32_2 = arith.constant 0 : i32
    return %arg0, %c0_i32, %c0_i32_0, %c0_i32_1 : i32, i32, i32, i32
  }
  func.func @transform_6(%arg0: i32) -> (i32, i32, i32) {
    %c0_i32 = arith.constant 0 : i32
    %c0_i32_0 = arith.constant 0 : i32
    %c0_i32_1 = arith.constant 0 : i32
    return %arg0, %c0_i32, %c0_i32_0 : i32, i32, i32
  }
}

</mosaic_0001>

<bundles_post_ra>
// kernel: mix_quant_conv2d.1
= control target key start
LH: loop header
LB: loop body
LE: loop exit
PB: predicated region body
PF: predicated region fallthrough
CT: control target
= control target key end

     0   :  { %11 = vsyncpa [#allocation6], 0  ;;  %s9647_s0 = inlined_call_operand.vmem [shape: f32[2], index: 0, kind: input, shape index: {}]   ;;  %s9648_s1 = inlined_call_operand.vmem [shape: f32[2], index: 1, kind: input, shape index: {}]   ;;  %s9649_s2 = inlined_call_operand.vmem [shape: f32[2], index: 2, kind: input, shape index: {}]   ;;  %s9650_s3 = inlined_call_operand.vmem [shape: f32[2], index: 3, kind: input, shape index: {}]   ;;  %s9651_s4 = inlined_call_operand.vmem [shape: f32[2,8,36], index: 4, kind: input, shape index: {}]   ;;  %s9652_s5 = inlined_call_operand.vmem [shape: f32[2,4,16,16], index: 5, kind: input, shape index: {}]   ;;  %s9653_s6 = inlined_call_operand.vmem [shape: f32[2,8,256], index: 6, kind: output, shape index: {}]  }
   0x1   :  { %12 = vsyncpa [#allocation8], 0  ;;  %s30_s23 = sshll.u32 %s9648_s1, 4  ;;  %s31_s23 = int_to_ptr.vmem [resolvable:$true] %s30_s23 }
   0x2   :  { %13 = vsyncpa [#allocation11], 0  ;;  %s20_s26 = sshll.u32 %s9647_s0, 4  ;;  %s6460_s27 = scalar_lea.vmem %s31_s23, 16  ;;  %s21_s26 = int_to_ptr.vmem [resolvable:$true] %s20_s26 }
   0x3   :  { %p6461_p0 = scmp.ne.s32.totalorder %s31_s23, %s6460_s27  ;;  %p6465_p1 = scmp.lt.s32.totalorder %s31_s23, %s31_s23 }
   0x4   :  { %p6466_p2 = scmp.lt.s32.totalorder %s6460_s27, %s6460_s27 }
   0x6   :  { %p6467_p3 = por %p6466_p2, %p6465_p1 }
   0x8   :  { %p6468_p4 = pnand %p6467_p3, %p6461_p0 }
   0xa   :  { %6471 = shalt.err (!%p6468_p4)
}
   0xb   :  { %s6514_s28 = smov [#allocation7]   ;;  %s6472_s29 = scalar_lea.vmem %s21_s26, 16 }
   0xc   :  { %33 = dma.vmem_to_smem %s31_s23, 16, %s6514_s28, [#allocation8]  }
   0xd   :  { %p6473_p5 = scmp.ne.s32.totalorder %s21_s26, %s6472_s29  ;;  %p6477_p6 = scmp.lt.s32.totalorder %s21_s26, %s21_s26 }
   0xe   :  { %p6478_p7 = scmp.lt.s32.totalorder %s6472_s29, %s6472_s29 }
  0x10   :  { %p6479_p8 = por %p6478_p7, %p6477_p6 }
  0x12   :  { %p6480_p9 = pnand %p6479_p8, %p6473_p5 }
  0x14   :  { %6483 = shalt.err (!%p6480_p9)
}
  0x15   :  { %s6515_s1 = smov [#allocation5]   ;;  %s40_s7 = sshll.u32 %s9649_s2, 4  ;;  %s41_s7 = int_to_ptr.vmem [resolvable:$true] %s40_s7 }
  0x16   :  { %23 = dma.vmem_to_smem %s21_s26, 16, %s6515_s1, [#allocation6]  }
  0x17   :  { %s50_s10 = sshll.u32 %s9650_s3, 4  ;;  %s6484_s11 = scalar_lea.vmem %s41_s7, 16  ;;  %s51_s10 = int_to_ptr.vmem [resolvable:$true] %s50_s10 }
  0x18   :  { %p6485_p10 = scmp.ne.s32.totalorder %s41_s7, %s6484_s11  ;;  %p6489_p11 = scmp.lt.s32.totalorder %s41_s7, %s41_s7 }
  0x19   :  { %p6490_p12 = scmp.lt.s32.totalorder %s6484_s11, %s6484_s11 }
  0x1b   :  { %p6491_p13 = por %p6490_p12, %p6489_p11 }
  0x1d   :  { %p6492_p0 = pnand %p6491_p13, %p6485_p10 }
  0x1f   :  { %6495 = shalt.err (!%p6492_p0)
}
  0x20   :  { %s6516_s12 = smov [#allocation9]   ;;  %s6496_s13 = scalar_lea.vmem %s51_s10, 16 }
  0x21   :  { %43 = dma.vmem_to_smem %s41_s7, 16, %s6516_s12, [#allocation8]  }
  0x22   :  { %p6497_p1 = scmp.ne.s32.totalorder %s51_s10, %s6496_s13  ;;  %p6501_p2 = scmp.lt.s32.totalorder %s51_s10, %s51_s10 }
  0x23   :  { %p6502_p3 = scmp.lt.s32.totalorder %s6496_s13, %s6496_s13 }
  0x25   :  { %p6503_p4 = por %p6502_p3, %p6501_p2 }
  0x27   :  { %p6504_p5 = pnand %p6503_p4, %p6497_p1 }
  0x29   :  { %6507 = shalt.err (!%p6504_p5)
}
  0x2a   :  { %s6517_s2 = smov [#allocation10]  }
  0x2b   :  { %53 = dma.vmem_to_smem %s51_s10, 16, %s6517_s2, [#allocation11]  }
  0x2c   :  { %6508 = dma.done.wait [#allocation6], 16  }
  0x2d   :  { %6509 = vsyncadd [#allocation6], 4294967280 }
  0x2e   :  { %6510 = dma.done.wait [#allocation8], 32  }
  0x2f   :  { %6511 = vsyncadd [#allocation8], 4294967264 }
  0x30   :  { %6512 = dma.done.wait [#allocation11], 16  }
  0x31   :  { %6513 = vsyncadd [#allocation11], 4294967280 }
  0x32   :  { %70 = sfence }
  0x33   :  { %v147_v0 = vld [vmem:[%s9652_s5 + $0x8] sm:$0xff]  ;;  %v146_v1 = vld [vmem:[%s9652_s5] sm:$0xff]  ;;  %v148_v2 = vld [vmem:[%s9652_s5 + $0x10] sm:$0xff]  ;;  %vm210_vm0 = vsmask.f32 256  ;;  %s6518_s29 = smov 1  }
  0x34   :  { %v6259_v3 = vpack.c.bf16 %v147_v0, %v147_v0  ;;  %v6258_v4 = vpack.c.bf16 %v146_v1, %v146_v1  ;;  %v6260_v5 = vpack.c.bf16 %v148_v2, %v148_v2  ;;  %v149_v6 = vld [vmem:[%s9652_s5 + $0x18] sm:$0xff]  ;;  %v150_v7 = vld [vmem:[%s9652_s5 + $0x20] sm:$0xff]  ;;  %v151_v8 = vld [vmem:[%s9652_s5 + $0x28] sm:$0xff]  ;;  %vm211_vm1 = vsmask.f32 4368  ;;  %s6521_s18 = smov 126  }
  0x35   :  { %v6261_v9 = vpack.c.bf16 %v149_v6, %v149_v6  ;;  %v6262_v10 = vpack.c.bf16 %v150_v7, %v150_v7  ;;  %v6263_v11 = vpack.c.bf16 %v151_v8, %v151_v8  ;;  %v152_v26 = vld [vmem:[%s9652_s5 + $0x30] sm:$0xff]  ;;  %vm6601_vm2 = vmor %vm210_vm0, %vm211_vm1  ;;  %v153_v32 = vld [vmem:[%s9652_s5 + $0x38] sm:$0xff]  ;;  %vm123_vm3 = vcmask 139264   ;;  %s6524_s19 = smov 32   ;;  %s6525_s20 = smov 64  }
  0x36   :  { %v222_v12 = vshrl.u32 %v6259_v3, 16  ;;  %v225_v13 = vshll.u32 %v6259_v3, 16  ;;  %v214_v14 = vshrl.u32 %v6258_v4, 16  ;;  %v217_v15 = vshll.u32 %v6258_v4, 16  ;;  %v154_v42 = vld [vmem:[%s9652_s5 + $0x40] sm:$0xff]  ;;  %v155_v43 = vld [vmem:[%s9652_s5 + $0x48] sm:$0xff] }
  0x37   :  { %v231_v16 = vshrl.u32 %v6260_v5, 16  ;;  %v239_v17 = vshrl.u32 %v6261_v9, 16  ;;  %v234_v20 = vshll.u32 %v6260_v5, 16  ;;  %v242_v21 = vshll.u32 %v6261_v9, 16  ;;  %v156_v61 = vld [vmem:[%s9652_s5 + $0x50] sm:$0xff]  ;;  %v157_v62 = vld [vmem:[%s9652_s5 + $0x58] sm:$0xff] }
  0x38   :  { %v224_v18 = vrot.slane %v222_v12, 7  ;;  %v216_v19 = vrot.slane %v214_v14, 7  ;;  %v248_v24 = vshrl.u32 %v6262_v10, 16  ;;  %v256_v25 = vshrl.u32 %v6263_v11, 16  ;;  %v158_v8 = vld [vmem:[%s9652_s5 + $0x60] sm:$0xff]  ;;  %v159_v9 = vld [vmem:[%s9652_s5 + $0x68] sm:$0xff] }
  0x39   :  { %v233_v22 = vrot.slane %v231_v16, 7  ;;  %v241_v23 = vrot.slane %v239_v17, 7  ;;  %v259_v33 = vshll.u32 %v6263_v11, 16  ;;  %v6264_v37 = vpack.c.bf16 %v152_v26, %v152_v26  ;;  %s6526_s21 = smov 96   ;;  %s6527_s22 = smov 16  }
  0x3a   :  { %v229_v27 = vrot.slane %v224_v18, 4  ;;  %v227_v28 = vor.u32 %v225_v13, %v224_v18  ;;  %v219_v29 = vor.u32 %v217_v15, %v216_v19  ;;  %v220_v30 = vrot.slane %v216_v19, 4  ;;  %s6528_s23 = smov 48   ;;  %s6529_s24 = smov 80  }
  0x3b   :  { %v236_v34 = vor.u32 %v234_v20, %v233_v22  ;;  %v237_v35 = vrot.slane %v233_v22, 4  ;;  %v244_v36 = vor.u32 %v242_v21, %v241_v23  ;;  %v250_v39 = vrot.slane %v248_v24, 7  ;;  %s6530_s25 = smov 112   ;;  %s77_s26 = sld [smem:[#allocation7]] }
  0x3c   :  { %353 = vrot.lane.b32.xlu1 %v229_v27, %s6518_s29  ;;  %349 = vrot.lane.b32.xlu0 %v219_v29, %s6518_s29  ;;  %v228_v38 = vsel %vm6601_vm2, %v220_v30, %v227_v28  ;;  %v258_v40 = vrot.slane %v256_v25, 7  ;;  %v6265_v41 = vpack.c.bf16 %v153_v32, %v153_v32  ;;  %v251_v44 = vshll.u32 %v6262_v10, 16  ;;  %v160_v28 = vld [vmem:[%s9652_s5 + $0x70] sm:$0xff]  ;;  %v161_v29 = vld [vmem:[%s9652_s5 + $0x78] sm:$0xff]  ;;  %s6520_s5 = smov 127   ;;  %s9513_s27 = sld [smem:[#allocation9]] }
  0x3d   :  { %v246_v45 = vrot.slane %v241_v23, 4  ;;  %v265_v46 = vshrl.u32 %v6264_v37, 16  ;;  %v6266_v47 = vpack.c.bf16 %v154_v42, %v154_v42  ;;  %v6267_v48 = vpack.c.bf16 %v155_v43, %v155_v43  ;;  %s5941_s28 = sld [smem:[#allocation7 + $0x1]]  ;;  %s83_s0 = sld [smem:[#allocation5]] }
  0x3e   :  { %v245_v49 = vsel %vm6601_vm2, %v237_v35, %v244_v36  ;;  %v254_v50 = vrot.slane %v250_v39, 4  ;;  %v261_v51 = vor.u32 %v259_v33, %v258_v40  ;;  %v273_v52 = vshrl.u32 %v6265_v41, 16  ;;  %s9523_s30 = sld [smem:[#allocation9 + $0x1]]  ;;  %s92_s11 = sld [smem:[#allocation10]] }
  0x3f   :  { %v253_v53 = vor.u32 %v251_v44, %v250_v39  ;;  %v267_v54 = vrot.slane %v265_v46, 7  ;;  %v268_v55 = vshll.u32 %v6264_v37, 16  ;;  %v282_v56 = vshrl.u32 %v6266_v47, 16  ;;  %s5943_s9 = sld [smem:[#allocation5 + $0x1]] }
  0x40   :  { %355 = vrot.lane.b32.xlu1 %v236_v34, %s6518_s29  ;;  %351 = vrot.lane.b32.xlu0 %v228_v38, %s6518_s29  ;;  %v290_v57 = vshrl.u32 %v6267_v48, 16  ;;  %v262_v58 = vsel %vm6601_vm2, %v254_v50, %v261_v51  ;;  %v275_v59 = vrot.slane %v273_v52, 7  ;;  %v276_v60 = vshll.u32 %v6265_v41, 16  ;;  %s5945_s12 = sld [smem:[#allocation10 + $0x1]] }
  0x41   :  { %v263_v63 = vrot.slane %v258_v40, 4  ;;  %v293_v0 = vshll.u32 %v6267_v48, 16  ;;  %v270_v1 = vor.u32 %v268_v55, %v267_v54  ;;  %v284_v2 = vrot.slane %v282_v56, 7 }
  0x42   :  { %v6634_v3 = vrot.slane %v290_v57, 7  ;;  %v6268_v4 = vpack.c.bf16 %v156_v61, %v156_v61  ;;  %v271_v5 = vrot.slane %v267_v54, 4  ;;  %v278_v6 = vor.u32 %v276_v60, %v275_v59  ;;  %s87_s10 = ssub.f32 0.0, %s9513_s27 }
  0x43   :  { %v6636_v7 = vpack.c.bf16 %v157_v62, %v157_v62  ;;  %v285_v10 = vshll.u32 %v6266_v47, 16  ;;  %v6519_v11 = vmov 0   ;;  %v280_v12 = vrot.slane %v275_v59, 4 }
  0x44   :  { %359 = vrot.lane.b32.xlu1 %v246_v45, %s6518_s29  ;;  %357 = vrot.lane.b32.xlu0 %v245_v49, %s6518_s29  ;;  %v288_v13 = vrot.slane %v284_v2, 4  ;;  %v295_v14 = vor.u32 %v293_v0, %v6634_v3  ;;  %v299_v15 = vshrl.u32 %v6268_v4, 16  ;;  %v279_v16 = vsel %vm6601_vm2, %v271_v5, %v278_v6  ;;  %124 = vst.msk [vmem:[#allocation3 + $0x8] sm:$0x1] %vm123_vm3, %v6519_v11 }
  0x45   :  { %5877 = vmatprep.mubr.bf16.mxu0 %v6519_v11  ;;  %5918 = vmatprep.mubr.bf16.mxu1 %v6519_v11  ;;  %v307_v17 = vshrl.u32 %v6636_v7, 16  ;;  %v6650_v18 = vpack.c.bf16 %v158_v8, %v158_v8  ;;  %v6271_v19 = vpack.c.bf16 %v159_v9, %v159_v9  ;;  %127 = vst.msk [vmem:[#allocation3 + $0x14] sm:$0x1] %vm123_vm3, %v6519_v11  ;;  %130 = vst.msk [vmem:[#allocation3 + $0x20] sm:$0x1] %vm123_vm3, %v6519_v11  ;;  %vm120_vm4 = vcmask 142336  }
  0x46   :  { %133 = vst.msk [vmem:[#allocation3 + $0x2c] sm:$0x1] %vm123_vm3, %v6519_v11  ;;  %136 = vst.msk [vmem:[#allocation3 + $0x38] sm:$0x1] %vm123_vm3, %v6519_v11  ;;  %v296_v20 = vsel %vm6601_vm2, %v288_v13, %v295_v14  ;;  %v287_v21 = vor.u32 %v285_v10, %v284_v2  ;;  %v301_v22 = vrot.slane %v299_v15, 7  ;;  %v302_v23 = vshll.u32 %v6268_v4, 16 }
  0x47   :  { %139 = vst.msk [vmem:[#allocation3 + $0x44] sm:$0x1] %vm123_vm3, %v6519_v11  ;;  %142 = vst.msk [vmem:[#allocation3 + $0x50] sm:$0x1] %vm123_vm3, %v6519_v11  ;;  %v309_v24 = vrot.slane %v307_v17, 7  ;;  %v310_v25 = vshll.u32 %v6636_v7, 16  ;;  %v6272_v34 = vpack.c.bf16 %v160_v28, %v160_v28  ;;  %v6273_v35 = vpack.c.bf16 %v161_v29, %v161_v29 }
  0x48   :  { %363 = vrot.lane.b32.xlu1 %v262_v58, %s6518_s29  ;;  %361 = vrot.lane.b32.xlu0 %v253_v53, %s6518_s29  ;;  %145 = vst.msk [vmem:[#allocation3 + $0x5c] sm:$0x1] %vm123_vm3, %v6519_v11  ;;  %v316_v26 = vshrl.u32 %v6650_v18, 16  ;;  %v324_v27 = vshrl.u32 %v6271_v19, 16  ;;  %v297_v30 = vrot.slane %v6634_v3, 4  ;;  %v304_v32 = vor.u32 %v302_v23, %v301_v22 }
  0x49   :  { %121 = vst.msk [vmem:[#allocation3] sm:$0xf] %vm120_vm4, %v6519_v11  ;;  %122 = vst.msk [vmem:[#allocation3 + $0x4] sm:$0xf] %vm120_vm4, %v6519_v11  ;;  %v305_v33 = vrot.slane %v301_v22, 4  ;;  %v312_v36 = vor.u32 %v310_v25, %v309_v24  ;;  %v327_v39 = vshll.u32 %v6271_v19, 16 }
  0x4a   :  { %125 = vst.msk [vmem:[#allocation3 + $0xc] sm:$0xf] %vm120_vm4, %v6519_v11  ;;  %126 = vst.msk [vmem:[#allocation3 + $0x10] sm:$0xf] %vm120_vm4, %v6519_v11  ;;  %v318_v37 = vrot.slane %v316_v26, 7  ;;  %v326_v38 = vrot.slane %v324_v27, 7 }
  0x4b   :  { %128 = vst.msk [vmem:[#allocation3 + $0x18] sm:$0xf] %vm120_vm4, %v6519_v11  ;;  %129 = vst.msk [vmem:[#allocation3 + $0x1c] sm:$0xf] %vm120_vm4, %v6519_v11  ;;  %v314_v40 = vrot.slane %v309_v24, 4  ;;  %v319_v41 = vshll.u32 %v6650_v18, 16  ;;  %v313_v43 = vsel %vm6601_vm2, %v305_v33, %v312_v36 }
  0x4c   :  { %367 = vrot.lane.b32.xlu1 %v270_v1, %s6518_s29  ;;  %365 = vrot.lane.b32.xlu0 %v263_v63, %s6518_s29  ;;  %131 = vst.msk [vmem:[#allocation3 + $0x24] sm:$0xf] %vm120_vm4, %v6519_v11  ;;  %132 = vst.msk [vmem:[#allocation3 + $0x28] sm:$0xf] %vm120_vm4, %v6519_v11  ;;  %v333_v42 = vshrl.u32 %v6272_v34, 16  ;;  %v322_v44 = vrot.slane %v318_v37, 4  ;;  %v329_v45 = vor.u32 %v327_v39, %v326_v38 }
  0x4d   :  { %134 = vst.msk [vmem:[#allocation3 + $0x30] sm:$0xf] %vm120_vm4, %v6519_v11  ;;  %135 = vst.msk [vmem:[#allocation3 + $0x34] sm:$0xf] %vm120_vm4, %v6519_v11  ;;  %v341_v46 = vshrl.u32 %v6273_v35, 16  ;;  %v321_v47 = vor.u32 %v319_v41, %v318_v37  ;;  %v336_v49 = vshll.u32 %v6272_v34, 16 }
  0x4e   :  { %137 = vst.msk [vmem:[#allocation3 + $0x3c] sm:$0xf] %vm120_vm4, %v6519_v11  ;;  %138 = vst.msk [vmem:[#allocation3 + $0x40] sm:$0xf] %vm120_vm4, %v6519_v11  ;;  %v335_v48 = vrot.slane %v333_v42, 7  ;;  %v330_v50 = vsel %vm6601_vm2, %v322_v44, %v329_v45  ;;  %v344_v52 = vshll.u32 %v6273_v35, 16 }
  0x4f   :  { %140 = vst.msk [vmem:[#allocation3 + $0x48] sm:$0xf] %vm120_vm4, %v6519_v11  ;;  %141 = vst.msk [vmem:[#allocation3 + $0x4c] sm:$0xf] %vm120_vm4, %v6519_v11  ;;  %v343_v51 = vrot.slane %v341_v46, 7  ;;  %v331_v54 = vrot.slane %v326_v38, 4 }
  0x50   :  { %369 = vrot.lane.b32.xlu0 %v279_v16, %s6518_s29  ;;  %371 = vrot.lane.b32.xlu1 %v280_v12, %s6518_s29  ;;  %143 = vst.msk [vmem:[#allocation3 + $0x54] sm:$0xf] %vm120_vm4, %v6519_v11  ;;  %144 = vst.msk [vmem:[#allocation3 + $0x58] sm:$0xf] %vm120_vm4, %v6519_v11  ;;  %v338_v53 = vor.u32 %v336_v49, %v335_v48  ;;  %v339_v55 = vrot.slane %v335_v48, 4  ;;  %vm429_vm5 = vcmask 131080  }
  0x51   :  { %v346_v56 = vor.u32 %v344_v52, %v343_v51  ;;  %v348_v57 = vrot.slane %v343_v51, 4  ;;  %vm421_vm6 = vcmask 134152   ;;  %vm422_vm7 = vsmask.f32 7938  ;;  %vm6701_vm8 = vmand %vm429_vm5, %vm210_vm0  ;;  %v431_v60 = vld [vmem:[#allocation3 + $0x8] sm:$0x1] }
  0x52   :  { %vm6706_vm9 = vmand %vm421_vm6, %vm422_vm7  ;;  %v424_v31 = vld [vmem:[#allocation3] sm:$0xf]  ;;  %v434_v2 = vld [vmem:[#allocation3 + $0xc] sm:$0xf]  ;;  %vm2266_vm10 = vcmask 1042432   ;;  %vm2267_vm11 = vcmask 1046532  }
  0x53   :  { %v347_v58 = vsel %vm6601_vm2, %v339_v55, %v346_v56  ;;  %v438_v6 = vld [vmem:[#allocation3 + $0x14] sm:$0x1]  ;;  %v441_v11 = vld [vmem:[#allocation3 + $0x18] sm:$0xf]  ;;  %v448_v19 = vld [vmem:[#allocation3 + $0x24] sm:$0xf] }
  0x54   :  { %375 = vrot.lane.b32.xlu1 %v296_v20, %s6518_s29  ;;  %373 = vrot.lane.b32.xlu0 %v287_v21, %s6518_s29  ;;  %v445_v20 = vld [vmem:[#allocation3 + $0x20] sm:$0x1]  ;;  %vm6751_vm12 = vmor %vm2266_vm10, %vm2267_vm11  ;;  %v9728_v29 = vmov 0  ;;  %vm1344_vm13 = vsmask.f32 3328  ;;  %vm725_vm0 = vcmask 130048  }
  0x55   :  { %v9729_v29 = vsel %vm6751_vm12, 4294967295, %v9728_v29  ;;  %vm1345_vm14 = vsmask.f32 7440  ;;  %vm729_vm1 = vcmask 261120   ;;  %vm732_vm2 = vcmask 392192  }
  0x56   :  { %9730 = vst [vmem:[#allocation15_spill] sm:$0xff] %v9729_v29  ;;  %vm6857_vm15 = vmor %vm1344_vm13, %vm1345_vm14  ;;  %vm735_vm3 = vcmask 523264   ;;  %vm738_vm4 = vcmask 654336   ;;  %vm741_vm5 = vcmask 785408   ;;  %vm118_vm7 = vcmask 289792  }
  0x58   :  { %379 = vrot.lane.b32.xlu1 %v304_v32, %s6518_s29  ;;  %377 = vrot.lane.b32.xlu0 %v297_v30, %s6518_s29  ;;  %v452_v32 = vld [vmem:[#allocation3 + $0x2c] sm:$0x1] }
  0x5c   :  { %383 = vrot.lane.b32.xlu1 %v314_v40, %s6518_s29  ;;  %381 = vrot.lane.b32.xlu0 %v313_v43, %s6518_s29 }
  0x60   :  { %387 = vrot.lane.b32.xlu1 %v330_v50, %s6518_s29  ;;  %385 = vrot.lane.b32.xlu0 %v321_v47, %s6518_s29 }
  0x64   :  { %391 = vrot.lane.b32.xlu1 %v338_v53, %s6518_s29  ;;  %389 = vrot.lane.b32.xlu0 %v331_v54, %s6518_s29 }
  0x68   :  { %393 = vrot.lane.b32.xlu0 %v347_v58, %s6518_s29  ;;  %395 = vrot.lane.b32.xlu1 %v348_v57, %s6518_s29 }
  0xae   :  { %v354_v62 = vpop.permute.xlu1 %353  ;;  %v350_v63 = vpop.permute.xlu0 %349 }
  0xaf   :  { %v432_v0 = vsel %vm6701_vm8, %v354_v62, %v431_v60  ;;  %v425_v1 = vsel %vm6706_vm9, %v350_v63, %v424_v31 }
  0xb0   :  { %433 = vst [vmem:[#allocation3 + $0x8] sm:$0x1] %v432_v0  ;;  %426 = vst [vmem:[#allocation3] sm:$0xf] %v425_v1 }
  0xb2   :  { %v356_v3 = vpop.permute.xlu1 %355  ;;  %v352_v4 = vpop.permute.xlu0 %351 }
  0xb3   :  { %v435_v5 = vsel %vm6706_vm9, %v356_v3, %v434_v2  ;;  %428 = vst.msk [vmem:[#allocation3 + $0x4] sm:$0xf] %vm421_vm6, %v352_v4 }
  0xb4   :  { %436 = vst [vmem:[#allocation3 + $0xc] sm:$0xf] %v435_v5 }
  0xb6   :  { %v360_v7 = vpop.permute.xlu1 %359  ;;  %v358_v8 = vpop.permute.xlu0 %357 }
  0xb7   :  { %v439_v9 = vsel %vm6701_vm8, %v360_v7, %v438_v6  ;;  %437 = vst.msk [vmem:[#allocation3 + $0x10] sm:$0xf] %vm421_vm6, %v358_v8  ;;  %v6720_v10 = vld [vmem:[#allocation3] sm:$0xf]  ;;  %v6724_v12 = vld [vmem:[#allocation3 + $0x8] sm:$0x1] }
  0xb8   :  { %440 = vst [vmem:[#allocation3 + $0x14] sm:$0x1] %v439_v9  ;;  %777 = vrot.lane.b32.xlu0 %v6720_v10, %s6520_s5  ;;  %v2274_v21 = vrot.slane %v6724_v12, 5  ;;  %v498_v48 = vshrl.u32 %v6720_v10, 16  ;;  %v1349_v49 = vshll.u32 %v6720_v10, 16 }
  0xba   :  { %v364_v13 = vpop.permute.xlu1 %363  ;;  %v362_v14 = vpop.permute.xlu0 %361  ;;  %v6726_v15 = vld [vmem:[#allocation3 + $0x4] sm:$0xf]  ;;  %v1348_v60 = vrot.slane %v498_v48, 4  ;;  %v1351_v31 = vrot.slane %v1349_v49, 5 }
  0xbb   :  { %444 = vst.msk [vmem:[#allocation3 + $0x1c] sm:$0xf] %vm421_vm6, %v364_v13  ;;  %v442_v16 = vsel %vm6706_vm9, %v362_v14, %v441_v11  ;;  %779 = vrot.lane.b32.xlu1 %v6726_v15, %s6520_s5  ;;  %v2271_v17 = vrot.slane %v6726_v15, 5  ;;  %v6734_v18 = vld [vmem:[#allocation3 + $0xc] sm:$0xf]  ;;  %v1354_v52 = vshll.u32 %v6726_v15, 16 }
  0xbc   :  { %443 = vst [vmem:[#allocation3 + $0x18] sm:$0xf] %v442_v16  ;;  %781 = vrot.lane.b32.xlu0 %v6734_v18, %s6520_s5  ;;  %v510_v53 = vshrl.u32 %v6726_v15, 16  ;;  %v499_v62 = vshrl.u32 %v6734_v18, 16  ;;  %v1369_v63 = vshll.u32 %v6734_v18, 16  ;;  %v1352_v9 = vor.u32 %v1351_v31, %v1348_v60 }
  0xbd   :  { %v2273_v22 = vrot.slane %v2271_v17, 4  ;;  %v1356_v0 = vrot.slane %v1354_v52, 5  ;;  %v455_v60 = vld [vmem:[#allocation3 + $0x30] sm:$0xf] }
  0xbe   :  { %v368_v23 = vpop.permute.xlu1 %367  ;;  %v366_v24 = vpop.permute.xlu0 %365  ;;  %v6741_v25 = vld [vmem:[#allocation3 + $0x10] sm:$0xf]  ;;  %v1359_v1 = vrot.slane %v510_v53, 4  ;;  %v1368_v13 = vrot.slane %v499_v62, 4  ;;  %v1371_v14 = vrot.slane %v1369_v63, 5 }
  0xbf   :  { %v449_v26 = vsel %vm6706_vm9, %v368_v23, %v448_v19  ;;  %v446_v27 = vsel %vm6701_vm8, %v366_v24, %v445_v20  ;;  %v2278_v28 = vrot.slane %v6741_v25, 5  ;;  %783 = vrot.lane.b32.xlu1 %v6741_v25, %s6520_s5  ;;  %v6755_v30 = vld [vmem:[#allocation3 + $0x14] sm:$0x1]  ;;  %v6759_v33 = vsel %vm6751_vm12, %v2273_v22, %v2274_v21 }
  0xc0   :  { %450 = vst [vmem:[#allocation3 + $0x24] sm:$0xf] %v449_v26  ;;  %447 = vst [vmem:[#allocation3 + $0x20] sm:$0x1] %v446_v27  ;;  %v2281_v38 = vrot.slane %v6755_v30, 5  ;;  %v1374_v7 = vshll.u32 %v6741_v25, 16  ;;  %v1360_v11 = vor.u32 %v1359_v1, %v1356_v0  ;;  %v523_v26 = vlaneseq }
  0xc1   :  { %v2280_v37 = vrot.slane %v2278_v28, 4  ;;  %v511_v8 = vshrl.u32 %v6741_v25, 16  ;;  %v1363_v22 = vshll.u32 %v6724_v12, 16  ;;  %v6522_v23 = vmov 1983009808  }
  0xc2   :  { %v370_v34 = vpop.permute.xlu0 %369  ;;  %v372_v35 = vpop.permute.xlu1 %371  ;;  %v6761_v36 = vld [vmem:[#allocation3 + $0x1c] sm:$0xf]  ;;  %v521_v24 = vunpack.c.l.s4 %v6522_v23  ;;  %v1376_v27 = vrot.slane %v1374_v7, 5  ;;  %v6867_v1 = vshrl.u32 %v523_v26, 7  ;;  %v459_v7 = vld [vmem:[#allocation3 + $0x38] sm:$0x1] }
  0xc3   :  { %451 = vst.msk [vmem:[#allocation3 + $0x28] sm:$0xf] %vm421_vm6, %v370_v34  ;;  %v453_v39 = vsel %vm6701_vm8, %v372_v35, %v452_v32  ;;  %v6769_v40 = vld [vmem:[#allocation3 + $0x18] sm:$0xf]  ;;  %787 = vrot.lane.b32.xlu1 %v6761_v36, %s6520_s5  ;;  %v2285_v41 = vrot.slane %v6761_v36, 5  ;;  %v6778_v42 = vsel %vm6751_vm12, %v2280_v37, %v2281_v38  ;;  %v1379_v32 = vrot.slane %v511_v8, 4 }
  0xc4   :  { %454 = vst [vmem:[#allocation3 + $0x2c] sm:$0x1] %v453_v39  ;;  %785 = vrot.lane.b32.xlu0 %v6769_v40, %s6520_s5  ;;  %v504_v20 = vshrl.u32 %v6769_v40, 16  ;;  %v1389_v21 = vshll.u32 %v6769_v40, 16  ;;  %v1394_v34 = vshll.u32 %v6761_v36, 16  ;;  %v516_v35 = vshrl.u32 %v6761_v36, 16 }
  0xc5   :  { %v2287_v47 = vrot.slane %v2285_v41, 4  ;;  %v1353_v37 = vrot.slane %v1352_v9, 4  ;;  %v1361_v38 = vrot.slane %v1360_v11, 4  ;;  %v1372_v39 = vor.u32 %v1371_v14, %v1368_v13 }
  0xc6   :  { %v376_v43 = vpop.permute.xlu1 %375  ;;  %v6780_v44 = vpop.permute.xlu0 %373  ;;  %v1391_v49 = vrot.slane %v1389_v21, 5  ;;  %v1365_v31 = vrot.slane %v1363_v22, 5  ;;  %v522_v63 = vunpack.c.0.s8 %v521_v24  ;;  %v1380_v9 = vor.u32 %v1379_v32, %v1376_v27 }
  0xc7   :  { %v6782_v45 = vld [vmem:[#allocation3 + $0x24] sm:$0xf]  ;;  %v6784_v46 = vld [vmem:[#allocation3 + $0x20] sm:$0x1]  ;;  %458 = vst.msk [vmem:[#allocation3 + $0x34] sm:$0xf] %vm421_vm6, %v376_v43  ;;  %v6876_v21 = vsel %vm6857_vm15, %v1353_v37, %v1356_v0  ;;  %v456_v37 = vsel %vm6706_vm9, %v6780_v44, %v455_v60 }
  0xc8   :  { %789 = vrot.lane.b32.xlu0 %v6782_v45, %s6520_s5  ;;  %v2288_v50 = vrot.slane %v6784_v46, 5  ;;  %v1409_v52 = vshll.u32 %v6782_v45, 16  ;;  %v1383_v11 = vshll.u32 %v6755_v30, 16  ;;  %v1396_v13 = vrot.slane %v1394_v34, 5  ;;  %v469_v0 = vld [vmem:[#allocation3 + $0x48] sm:$0xf] }
  0xc9   :  { %v1399_v14 = vrot.slane %v516_v35, 4  ;;  %v1373_v22 = vrot.slane %v1372_v39, 4  ;;  %v6884_v30 = vsel %vm6857_vm15, %v1361_v38, %v1365_v31  ;;  %457 = vst [vmem:[#allocation3 + $0x30] sm:$0xf] %v456_v37  ;;  %v6054_v37 = vrot.slane %v6769_v40, 9 }
  0xca   :  { %v6794_v51 = vld [vmem:[#allocation3 + $0x28] sm:$0xf]  ;;  %v6798_v54 = vpop.permute.xlu1 %379  ;;  %v6800_v55 = vpop.permute.xlu0 %377  ;;  %v6807_v57 = vsel %vm6751_vm12, %v2287_v47, %v2288_v50  ;;  %v1388_v47 = vrot.slane %v504_v20, 4  ;;  %v505_v50 = vshrl.u32 %v6782_v45, 16 }
  0xcb   :  { %v2292_v56 = vrot.slane %v6794_v51, 5  ;;  %791 = vrot.lane.b32.xlu1 %v6794_v51, %s6520_s5  ;;  %v6809_v58 = vld [vmem:[#allocation3 + $0x2c] sm:$0x1]  ;;  %v1414_v23 = vshll.u32 %v6794_v51, 16  ;;  %v517_v24 = vshrl.u32 %v6794_v51, 16  ;;  %v460_v39 = vsel %vm6701_vm8, %v6800_v55, %v459_v7 }
  0xcc   :  { %1061 = vrot.lane.b32.xlu0 %v6720_v10, %s6521_s18  ;;  %v2295_v3 = vrot.slane %v6809_v58, 5  ;;  %v1392_v32 = vor.u32 %v1391_v49, %v1388_v47  ;;  %v1408_v34 = vrot.slane %v505_v50, 4  ;;  %v1381_v49 = vrot.slane %v1380_v9, 4  ;;  %461 = vst [vmem:[#allocation3 + $0x38] sm:$0x1] %v460_v39 }
  0xcd   :  { %v2294_v2 = vrot.slane %v2292_v56, 4  ;;  %v1400_v31 = vor.u32 %v1399_v14, %v1396_v13  ;;  %v1416_v60 = vrot.slane %v1414_v23, 5  ;;  %v515_v55 = vpack.i.b16 %v6794_v51, %v6761_v36  ;;  %v473_v23 = vld [vmem:[#allocation3 + $0x50] sm:$0x1] }
  0xce   :  { %v6822_v4 = vpop.permute.xlu1 %383  ;;  %v382_v5 = vpop.permute.xlu0 %381  ;;  %v1393_v7 = vrot.slane %v1392_v32, 4  ;;  %v1423_v32 = vshll.u32 %v6809_v58, 16 }
  0xcf   :  { %1063 = vrot.lane.b32.xlu1 %v6726_v15, %s6521_s18  ;;  %465 = vst.msk [vmem:[#allocation3 + $0x40] sm:$0xf] %vm421_vm6, %v382_v5  ;;  %v6831_v6 = vsel %vm6751_vm12, %v2294_v2, %v2295_v3  ;;  %v6523_v2 = vmov 1934713408   ;;  %v462_v5 = vld [vmem:[#allocation3 + $0x3c] sm:$0xf] }
  0xd0   :  { %1065 = vrot.lane.b32.xlu0 %v6734_v18, %s6521_s18  ;;  %v6869_v3 = vunpack.c.l.s4 %v6523_v2  ;;  %v1411_v2 = vrot.slane %v1409_v52, 5  ;;  %v463_v38 = vsel %vm6706_vm9, %v6798_v54, %v462_v5  ;;  %v1385_v52 = vrot.slane %v1383_v11, 5 }
  0xd1   :  { %464 = vst [vmem:[#allocation3 + $0x3c] sm:$0xf] %v463_v38  ;;  %v1419_v54 = vrot.slane %v517_v24, 4  ;;  %v6918_v5 = vsel %vm6857_vm15, %v1373_v22, %v1376_v27  ;;  %v6053_v11 = vrot.slane %v6734_v18, 9  ;;  %v1401_v27 = vrot.slane %v1400_v31, 4 }
  0xd2   :  { %v388_v16 = vpop.permute.xlu1 %387  ;;  %v6837_v19 = vpop.permute.xlu0 %385  ;;  %v1412_v9 = vor.u32 %v1411_v2, %v1408_v34  ;;  %v539_v14 = vunpack.c.0.s8 %v6869_v3  ;;  %v503_v34 = vpack.i.b16 %v6782_v45, %v6769_v40  ;;  %v6934_v38 = vsel %vm6857_vm15, %v1381_v49, %v1385_v52 }
  0xd3   :  { %1067 = vrot.lane.b32.xlu1 %v6741_v25, %s6521_s18  ;;  %472 = vst.msk [vmem:[#allocation3 + $0x4c] sm:$0xf] %vm421_vm6, %v388_v16  ;;  %v466_v16 = vld [vmem:[#allocation3 + $0x44] sm:$0x1]  ;;  %v1420_v3 = vor.u32 %v1419_v54, %v1416_v60  ;;  %v6942_v58 = vsel %vm6857_vm15, %v1393_v7, %v1396_v13  ;;  %v1425_v61 = vrot.slane %v1423_v32, 5  ;;  %v6970_v59 = vsel %vm6751_vm12, %v6053_v11, %v2278_v28 }
  0xd4   :  { %1069 = vrot.lane.b32.xlu0 %v6769_v40, %s6521_s18  ;;  %v467_v47 = vsel %vm6701_vm8, %v6822_v4, %v466_v16  ;;  %v470_v4 = vsel %vm6706_vm9, %v6837_v19, %v469_v0  ;;  %v509_v19 = vpack.i.b16 %v6741_v25, %v6726_v15  ;;  %v476_v16 = vld [vmem:[#allocation3 + $0x54] sm:$0xf]  ;;  %v480_v0 = vld [vmem:[#allocation3 + $0x5c] sm:$0x1]  ;;  %v1413_v31 = vrot.slane %v1412_v9, 4 }
  0xd5   :  { %468 = vst [vmem:[#allocation3 + $0x44] sm:$0x1] %v467_v47  ;;  %471 = vst [vmem:[#allocation3 + $0x48] sm:$0xf] %v470_v4  ;;  %v6055_v47 = vrot.slane %v6782_v45, 9  ;;  %v6052_v4 = vrot.slane %v6720_v10, 9  ;;  %v518_v40 = vpack.i.b16 %v517_v24, %v516_v35 }
  0xd6   :  { %v6851_v43 = vpop.permute.xlu0 %389  ;;  %v392_v44 = vpop.permute.xlu1 %391 }
  0xd7   :  { %1071 = vrot.lane.b32.xlu1 %v6761_v36, %s6521_s18  ;;  %v474_v52 = vsel %vm6701_vm8, %v6851_v43, %v473_v23  ;;  %v6964_v9 = vsel %vm6751_vm12, %v6052_v4, %v2271_v17  ;;  %v6976_v43 = vsel %vm6857_vm15, %v1413_v31, %v1416_v60  ;;  %v6983_v17 = vsel %vm6751_vm12, %v6054_v37, %v2285_v41 }
  0xd8   :  { %1073 = vrot.lane.b32.xlu0 %v6782_v45, %s6521_s18  ;;  %475 = vst [vmem:[#allocation3 + $0x50] sm:$0x1] %v474_v52  ;;  %v6989_v28 = vsel %vm6751_vm12, %v6055_v47, %v2292_v56  ;;  %v6994_v60 = vsub.s32 %v539_v14, %v6867_v1  ;;  %v506_v56 = vpack.i.b16 %v505_v50, %v504_v20 }
  0xd9   :  { %v1441_v31 = vpack.i.b16 %v6934_v38, %v6884_v30 }
  0xda   :  { %v394_v26 = vpop.permute.xlu0 %393  ;;  %v396_v2 = vpop.permute.xlu1 %395 }
  0xdb   :  { %1075 = vrot.lane.b32.xlu1 %v6794_v51, %s6521_s18  ;;  %479 = vst.msk [vmem:[#allocation3 + $0x58] sm:$0xf] %vm421_vm6, %v394_v26  ;;  %v1403_v26 = vshll.u32 %v6784_v46, 16  ;;  %v6914_v46 = vsub.s32 %v522_v63, %v6867_v1  ;;  %v497_v63 = vpack.i.b16 %v6734_v18, %v6720_v10  ;;  %v481_v13 = vsel %vm6701_vm8, %v396_v2, %v480_v0  ;;  %v7047_v2 = vld [vmem:[#allocation3 + $0x30] sm:$0xf] }
  0xdc   :  { %1695 = vrot.lane.b32.xlu0 %v6876_v21, %s6520_s5  ;;  %482 = vst [vmem:[#allocation3 + $0x5c] sm:$0x1] %v481_v13  ;;  %v500_v1 = vpack.i.b16 %v499_v62, %v498_v48  ;;  %v512_v10 = vpack.i.b16 %v511_v8, %v510_v53  ;;  %v7049_v0 = vld [vmem:[#allocation3 + $0x3c] sm:$0xf]  ;;  %v9665_v4 = vshrl.u32 %v7047_v2, 16  ;;  %vm744_vm6 = vcmask 916480  }
  0xdd   :  { %v1405_v22 = vrot.slane %v1403_v26, 5  ;;  %v602_v39 = vrot.slane %v515_v55, %v6914_v46  ;;  %v477_v26 = vsel %vm6706_vm9, %v392_v44, %v476_v16  ;;  %v594_v49 = vrot.slane %v509_v19, %v6914_v46 }
  0xde   :  { %478 = vst [vmem:[#allocation3 + $0x54] sm:$0xf] %v477_v26  ;;  %v534_v44 = vrot.slane %v503_v34, %v6914_v46  ;;  %v1421_v55 = vrot.slane %v1420_v3, 4  ;;  %v526_v19 = vrot.slane %v497_v63, %v6914_v46  ;;  %v568_v50 = vrot.slane %v506_v56, %v6914_v46 }
  0xdf   :  { %1697 = vrot.lane.b32.xlu1 %v6884_v30, %s6520_s5  ;;  %v6957_v54 = vsel %vm6857_vm15, %v1401_v27, %v1405_v22  ;;  %v603_v7 = vcombine.low %v594_v49, %v602_v39  ;;  %v604_v16 = vcombine.high %v594_v49, %v602_v39  ;;  %v560_v18 = vrot.slane %v500_v1, %v6914_v46  ;;  %v7054_v39 = vld [vmem:[#allocation3 + $0x48] sm:$0xf] }
  0xe0   :  { %1699 = vrot.lane.b32.xlu0 %v6918_v5, %s6520_s5  ;;  %v535_v11 = vcombine.low %v526_v19, %v534_v44  ;;  %v6998_v63 = vsel %vm6857_vm15, %v1421_v55, %v1425_v61  ;;  %v536_v23 = vcombine.high %v526_v19, %v534_v44  ;;  %v636_v51 = vrot.slane %v518_v40, %v6914_v46 }
  0xe1   :  { %v7001_v41 = vrot.slane %v603_v7, %v6994_v60  ;;  %v618_v20 = vrot.slane %v604_v16, %v6994_v60  ;;  %v569_v35 = vcombine.low %v560_v18, %v568_v50  ;;  %v628_v15 = vrot.slane %v512_v10, %v6914_v46 }
  0xe2   :  { %v7016_v14 = vrot.slane %v535_v11, %v6994_v60  ;;  %v550_v48 = vrot.slane %v536_v23, %v6994_v60  ;;  %v1447_v27 = vpack.i.b16 %v6998_v63, %v6957_v54  ;;  %v570_v34 = vcombine.high %v560_v18, %v568_v50 }
  0xe3   :  { %1701 = vrot.lane.b32.xlu1 %v6934_v38, %s6520_s5  ;;  %v6278_v45 = vcombine.high %v7001_v41, %v7001_v41  ;;  %v5972_v62 = vcombine.low %v618_v20, %v618_v20  ;;  %v637_v53 = vcombine.low %v628_v15, %v636_v51  ;;  %v6280_v8 = vcombine.high %v618_v20, %v618_v20 }
  0xe4   :  { %1703 = vrot.lane.b32.xlu0 %v6942_v58, %s6520_s5  ;;  %v6274_v36 = vcombine.high %v7016_v14, %v7016_v14  ;;  %v5965_v25 = vcombine.low %v550_v48, %v550_v48  ;;  %v577_v24 = vrot.slane %v569_v35, %v6994_v60  ;;  %v6276_v22 = vcombine.high %v550_v48, %v550_v48 }
  0xe5   :  { %v645_v32 = vrot.slane %v637_v53, %v6994_v60  ;;  %v1429_v3 = vpack.i.b16 %v6918_v5, %v6876_v21  ;;  %v7056_v47 = vld [vmem:[#allocation3 + $0x54] sm:$0xf]  ;;  %v1435_v26 = vpack.i.b16 %v6976_v43, %v6942_v58  ;;  %v9664_v49 = vshrl.u32 %v7049_v0, 16 }
  0xe6   :  { %v5962_v37 = vcombine.low %v577_v24, %v577_v24  ;;  %v1534_v52 = vrot.slane %v1447_v27, %v6914_v46  ;;  %v584_v61 = vrot.slane %v570_v34, %v6994_v60  ;;  %v638_v44 = vcombine.high %v628_v15, %v636_v51  ;;  %v7101_v34 = vld [vmem:[#allocation3 + $0x34] sm:$0xf] }
  0xe7   :  { %1705 = vrot.lane.b32.xlu1 %v6957_v54, %s6520_s5  ;;  %v5969_v13 = vcombine.low %v645_v32, %v645_v32  ;;  %v6275_v55 = vcombine.high %v577_v24, %v577_v24  ;;  %v3149_v7 = vpack.i.b16 %v9664_v49, %v9665_v4  ;;  %v9663_v19 = vshrl.u32 %v7054_v39, 16 }
  0xe8   :  { %1707 = vrot.lane.b32.xlu0 %v6976_v43, %s6520_s5  ;;  %v9662_v11 = vshrl.u32 %v7056_v47, 16  ;;  %v1526_v16 = vrot.slane %v1441_v31, %v6914_v46  ;;  %v1466_v56 = vrot.slane %v1435_v26, %v6914_v46  ;;  %v6279_v23 = vcombine.high %v645_v32, %v645_v32 }
  0xe9   :  { %v652_v40 = vrot.slane %v638_v44, %v6994_v60  ;;  %v1437_v20 = vshrl.u32 %v6976_v43, 16  ;;  %v5966_v50 = vcombine.low %v584_v61, %v584_v61  ;;  %v1431_v18 = vshrl.u32 %v6918_v5, 16 }
  0xea   :  { %v3155_v1 = vpack.i.b16 %v9662_v11, %v9663_v19  ;;  %v1535_v10 = vcombine.low %v1526_v16, %v1534_v52  ;;  %v1430_v51 = vshrl.u32 %v6876_v21, 16  ;;  %v1443_v24 = vshrl.u32 %v6934_v38, 16 }
  0xeb   :  { %1709 = vrot.lane.b32.xlu1 %v6998_v63, %s6520_s5  ;;  %v5973_v35 = vcombine.low %v652_v40, %v652_v40  ;;  %v1448_v27 = vshrl.u32 %v6957_v54, 16  ;;  %v6281_v31 = vcombine.high %v652_v40, %v652_v40  ;;  %vm5832_vm8 = vcmask 1041408  }
  0xec   :  { %1978 = vrot.lane.b32.xlu0 %v6876_v21, %s6521_s18  ;;  %v7091_v53 = vrot.slane %v1535_v10, %v6994_v60  ;;  %v1432_v32 = vpack.i.b16 %v1431_v18, %v1430_v51  ;;  %v7113_v44 = vrot.slane %v3155_v1, %v6914_v46  ;;  %v7133_v51 = vld [vmem:[#allocation3 + $0x4c] sm:$0xf]  ;;  %vm5828_vm9 = vcmask 293888  }
  0xed   :  { %9736 = vst [vmem:[#allocation19_spill] sm:$0xff] %v7133_v51 }
  0xee   :  { %9735 = vst [vmem:[#allocation18_spill] sm:$0xff] %v7113_v44 }
  0xef   :  { %1980 = vrot.lane.b32.xlu1 %v6884_v30, %s6521_s18 }
  0xf0   :  { %698 = vrot.lane.b32.xlu0 %v6278_v45, %s6524_s19  ;;  %v1458_v45 = vrot.slane %v1429_v3, %v6914_v46 }
  0xf2   :  { %v1467_v48 = vcombine.low %v1458_v45, %v1466_v56  ;;  %v1468_v26 = vcombine.high %v1458_v45, %v1466_v56 }
  0xf3   :  { %663 = vrot.lane.b32.xlu1 %v6274_v36, %s6524_s19  ;;  %v1436_v36 = vshrl.u32 %v6942_v58, 16 }
  0xf4   :  { %708 = vrot.lane.b32.xlu0 %v5972_v62, %s6525_s20  ;;  %v1449_v62 = vshrl.u32 %v6998_v63, 16  ;;  %v7099_v21 = vrot.slane %v1467_v48, %v6994_v60  ;;  %v1482_v40 = vrot.slane %v1468_v26, %v6994_v60 }
  0xf5   :  { %v1438_v15 = vpack.i.b16 %v1437_v20, %v1436_v36 }
  0xf6   :  { %v1450_v3 = vpack.i.b16 %v1449_v62, %v1448_v27  ;;  %v6010_v36 = vcombine.low %v1482_v40, %v1482_v40 }
  0xf7   :  { %673 = vrot.lane.b32.xlu1 %v5965_v25, %s6525_s20  ;;  %v6277_v25 = vcombine.high %v584_v61, %v584_v61  ;;  %v1500_v61 = vrot.slane %v1438_v15, %v6914_v46  ;;  %v7137_v15 = vld [vmem:[#allocation3 + $0x58] sm:$0xf] }
  0xf8   :  { %718 = vrot.lane.b32.xlu0 %v6280_v8, %s6526_s21  ;;  %v1536_v8 = vcombine.high %v1526_v16, %v1534_v52  ;;  %v7106_v52 = vrot.slane %v3149_v7, %v6914_v46  ;;  %v9661_v16 = vshrl.u32 %v7101_v34, 16  ;;  %v6298_v7 = vcombine.high %v7099_v21, %v7099_v21  ;;  %9737 = vst [vmem:[#allocation20_spill] sm:$0xff] %v7137_v15 }
  0xf9   :  { %v1568_v45 = vrot.slane %v1450_v3, %v6914_v46 }
  0xfa   :  { %9734 = vst [vmem:[#allocation17_spill] sm:$0xff] %v7106_v52 }
  0xfb   :  { %683 = vrot.lane.b32.xlu1 %v6276_v22, %s6526_s21  ;;  %v1442_v22 = vshrl.u32 %v6884_v30, 16  ;;  %v6302_v30 = vcombine.high %v7091_v53, %v7091_v53 }
  0xfc   :  { %658 = vrot.lane.b32.xlu0 %v5962_v37, %s6527_s22  ;;  %v7103_v37 = vld [vmem:[#allocation3 + $0x40] sm:$0xf] }
  0xfd   :  { %9733 = vst [vmem:[#allocation16_spill] sm:$0xff] %v7103_v37  ;;  %v9660_v56 = vshrl.u32 %v7103_v37, 16 }
  0xff   :  { %693 = vrot.lane.b32.xlu1 %v5969_v13, %s6527_s22  ;;  %v1550_v13 = vrot.slane %v1536_v8, %v6994_v60  ;;  %v3161_v20 = vpack.i.b16 %v9660_v56, %v9661_v16  ;;  %v6300_v8 = vcombine.high %v1482_v40, %v1482_v40 }
 0x100   :  { %668 = vrot.lane.b32.xlu0 %v6275_v55, %s6528_s23  ;;  %v1444_v55 = vpack.i.b16 %v1443_v24, %v1442_v22 }
 0x101   :  { %v6304_v62 = vcombine.high %v1550_v13, %v1550_v13 }
 0x102   :  { %v1560_v18 = vrot.slane %v1444_v55, %v6914_v46 }
 0x103   :  { %703 = vrot.lane.b32.xlu1 %v6279_v23, %s6528_s23  ;;  %v1492_v23 = vrot.slane %v1432_v32, %v6914_v46  ;;  %v9658_v32 = vshrl.u32 %v7137_v15, 16 }
 0x104   :  { %678 = vrot.lane.b32.xlu0 %v5966_v50, %s6529_s24  ;;  %v6017_v50 = vcombine.low %v1550_v13, %v1550_v13  ;;  %v1569_v48 = vcombine.low %v1560_v18, %v1568_v45  ;;  %v1570_v26 = vcombine.high %v1560_v18, %v1568_v45  ;;  %v9657_v18 = vrot.slane %v7101_v34, 5 }
 0x105   :  { %v1501_v10 = vcombine.low %v1492_v23, %v1500_v61  ;;  %v1502_v22 = vcombine.high %v1492_v23, %v1500_v61 }
 0x106   :  { %v1577_v24 = vrot.slane %v1569_v48, %v6994_v60  ;;  %v1584_v55 = vrot.slane %v1570_v26, %v6994_v60  ;;  %v9656_v48 = vrot.slane %v7103_v37, 5 }
 0x107   :  { %713 = vrot.lane.b32.xlu1 %v5973_v35, %s6529_s24  ;;  %v1509_v35 = vrot.slane %v1501_v10, %v6994_v60  ;;  %v1516_v13 = vrot.slane %v1502_v22, %v6994_v60  ;;  %v6191_v10 = vrot.slane %v7047_v2, 9 }
 0x108   :  { %688 = vrot.lane.b32.xlu0 %v6277_v25, %s6530_s25  ;;  %v9659_v25 = vshrl.u32 %v7133_v51, 16  ;;  %v6303_v61 = vcombine.high %v1577_v24, %v1577_v24  ;;  %v6018_v23 = vcombine.low %v1584_v55, %v1584_v55  ;;  %v6305_v45 = vcombine.high %v1584_v55, %v1584_v55 }
 0x109   :  { %v6007_v27 = vcombine.low %v1509_v35, %v1509_v35  ;;  %v6301_v40 = vcombine.high %v1516_v13, %v1516_v13 }
 0x10a   :  { %v3167_v3 = vpack.i.b16 %v9658_v32, %v9659_v25 }
 0x10b   :  { %723 = vrot.lane.b32.xlu1 %v6281_v31, %s6530_s25  ;;  %v6014_v31 = vcombine.low %v1577_v24, %v1577_v24  ;;  %v9654_v24 = vrot.slane %v7137_v15, 5 }
 0x10c   :  { %1630 = vrot.lane.b32.xlu0 %v6302_v30, %s6524_s19  ;;  %v6299_v30 = vcombine.high %v1509_v35, %v1509_v35  ;;  %v9655_v35 = vrot.slane %v7133_v51, 5  ;;  %v7174_v22 = vrot.slane %v3167_v3, %v6914_v46 }
 0x10e   :  { %9739 = vst [vmem:[#allocation22_spill] sm:$0xff] %v7174_v22 }
 0x10f   :  { %1595 = vrot.lane.b32.xlu1 %v6298_v7, %s6524_s19  ;;  %v6011_v7 = vcombine.low %v1516_v13, %v1516_v13 }
 0x110   :  { %1640 = vrot.lane.b32.xlu0 %v6017_v50, %s6525_s20 }
 0x113   :  { %1605 = vrot.lane.b32.xlu1 %v6010_v36, %s6525_s20  ;;  %v6192_v36 = vrot.slane %v7049_v0, 9 }
 0x114   :  { %1650 = vrot.lane.b32.xlu0 %v6304_v62, %s6526_s21  ;;  %v6193_v62 = vrot.slane %v7054_v39, 9 }
 0x115   :  { %v7186_v26 = vsel %vm6751_vm12, %v6192_v36, %v9656_v48 }
 0x117   :  { %1615 = vrot.lane.b32.xlu1 %v6300_v8, %s6526_s21  ;;  %v6194_v8 = vrot.slane %v7056_v47, 9 }
 0x118   :  { %1590 = vrot.lane.b32.xlu0 %v6007_v27, %s6527_s22  ;;  %v7169_v27 = vrot.slane %v3161_v20, %v6914_v46 }
 0x119   :  { %v7198_v20 = vsel %vm6751_vm12, %v6194_v8, %v9654_v24 }
 0x11a   :  { %9738 = vst [vmem:[#allocation21_spill] sm:$0xff] %v7169_v27 }
 0x11b   :  { %1625 = vrot.lane.b32.xlu1 %v6014_v31, %s6527_s22  ;;  %v7180_v31 = vsel %vm6751_vm12, %v6191_v10, %v9657_v18 }
 0x11c   :  { %1600 = vrot.lane.b32.xlu0 %v6299_v30, %s6528_s23  ;;  %v4936_v13 = vshrl.u32 %v7180_v31, 16 }
 0x11f   :  { %1635 = vrot.lane.b32.xlu1 %v6303_v61, %s6528_s23  ;;  %v4937_v61 = vshrl.u32 %v7186_v26, 16 }
 0x120   :  { %1610 = vrot.lane.b32.xlu0 %v6011_v7, %s6529_s24  ;;  %v4943_v7 = vshrl.u32 %v7198_v20, 16 }
 0x123   :  { %1645 = vrot.lane.b32.xlu1 %v6018_v23, %s6529_s24 }
 0x124   :  { %1620 = vrot.lane.b32.xlu0 %v6301_v40, %s6530_s25 }
 0x127   :  { %1655 = vrot.lane.b32.xlu1 %v6305_v45, %s6530_s25 }
 0x128   :  { %1982 = vrot.lane.b32.xlu0 %v6918_v5, %s6521_s18  ;;  %v7192_v5 = vsel %vm6751_vm12, %v6193_v62, %v9655_v35 }
 0x129   :  { %v4942_v55 = vshrl.u32 %v7192_v5, 16 }
 0x12a   :  { %v7204_v30 = vpop.permute.xlu0 %777 }
 0x12b   :  { %1984 = vrot.lane.b32.xlu1 %v6934_v38, %s6521_s18  ;;  %v4938_v38 = vpack.i.b16 %v4937_v61, %v4936_v13  ;;  %v4944_v40 = vpack.i.b16 %v4943_v7, %v4942_v55 }
 0x12c   :  { %1986 = vrot.lane.b32.xlu0 %v6942_v58, %s6521_s18 }
 0x12d   :  { %v7212_v23 = vpop.permute.xlu1 %779  ;;  %v7227_v36 = vrot.slane %v4938_v38, %v6914_v46 }
 0x12e   :  { %v7218_v45 = vpop.permute.xlu0 %781 }
 0x12f   :  { %1988 = vrot.lane.b32.xlu1 %v6957_v54, %s6521_s18  ;;  %9740 = vst [vmem:[#allocation23_spill] sm:$0xff] %v7227_v36  ;;  %v7230_v54 = vrot.slane %v4944_v40, %v6914_v46  ;;  %v795_v13 = vpack.i.b16 %v7218_v45, %v7204_v30  ;;  %v808_v36 = vshrl.u32 %v7212_v23, 16 }
 0x130   :  { %1990 = vrot.lane.b32.xlu0 %v6976_v43, %s6521_s18 }
 0x131   :  { %v7220_v58 = vpop.permute.xlu1 %783  ;;  %9741 = vst [vmem:[#allocation24_spill] sm:$0xff] %v7230_v54  ;;  %v824_v7 = vrot.slane %v795_v13, %v6914_v46 }
 0x132   :  { %v807_v55 = vpack.i.b16 %v7220_v58, %v7212_v23 }
 0x133   :  { %1992 = vrot.lane.b32.xlu1 %v6998_v63, %s6521_s18 }
 0x134   :  { %v892_v8 = vrot.slane %v807_v55, %v6914_v46 }
 0x135   :  { %v788_v43 = vpop.permute.xlu1 %787 }
 0x136   :  { %v7232_v62 = vpop.permute.xlu0 %785  ;;  %v814_v19 = vshrl.u32 %v788_v43, 16 }
 0x13a   :  { %v790_v61 = vpop.permute.xlu0 %789 }
 0x13b   :  { %v801_v63 = vpack.i.b16 %v790_v61, %v7232_v62 }
 0x13d   :  { %v832_v38 = vrot.slane %v801_v63, %v6914_v46  ;;  %v792_v40 = vpop.permute.xlu1 %791 }
 0x13e   :  { %v813_v10 = vpack.i.b16 %v792_v40, %v788_v43  ;;  %v7243_v3 = vpop.permute.xlu0 %1061  ;;  %v815_v1 = vshrl.u32 %v792_v40, 16  ;;  %v803_v40 = vshrl.u32 %v790_v61, 16  ;;  %v802_v43 = vshrl.u32 %v7232_v62, 16 }
 0x13f   :  { %v833_v50 = vcombine.low %v824_v7, %v832_v38  ;;  %v834_v24 = vcombine.high %v824_v7, %v832_v38 }
 0x140   :  { %v900_v35 = vrot.slane %v813_v10, %v6914_v46  ;;  %v816_v54 = vpack.i.b16 %v815_v1, %v814_v19  ;;  %v796_v19 = vshrl.u32 %v7204_v30, 16  ;;  %v804_v1 = vpack.i.b16 %v803_v40, %v802_v43 }
 0x141   :  { %v7247_v48 = vpop.permute.xlu1 %1063  ;;  %v7250_v18 = vrot.slane %v833_v50, %v6994_v60  ;;  %v848_v56 = vrot.slane %v834_v24, %v6994_v60 }
 0x142   :  { %v901_v32 = vcombine.low %v892_v8, %v900_v35  ;;  %v902_v25 = vcombine.high %v892_v8, %v900_v35  ;;  %v7252_v13 = vpop.permute.xlu0 %1065  ;;  %v934_v62 = vrot.slane %v816_v54, %v6914_v46  ;;  %v866_v30 = vrot.slane %v804_v1, %v6914_v46 }
 0x143   :  { %v6282_v63 = vcombine.high %v7250_v18, %v7250_v18  ;;  %v5980_v8 = vcombine.low %v848_v56, %v848_v56  ;;  %v1079_v24 = vpack.i.b16 %v7252_v13, %v7243_v3  ;;  %v6284_v11 = vcombine.high %v848_v56, %v848_v56 }
 0x144   :  { %v7258_v7 = vrot.slane %v901_v32, %v6994_v60  ;;  %v916_v35 = vrot.slane %v902_v25, %v6994_v60 }
 0x145   :  { %v7260_v55 = vpop.permute.xlu1 %1067  ;;  %961 = vrot.lane.b32.xlu1 %v6282_v63, %s6524_s19  ;;  %v1108_v49 = vrot.slane %v1079_v24, %v6914_v46 }
 0x146   :  { %v7263_v10 = vpop.permute.xlu0 %1069  ;;  %v6286_v50 = vcombine.high %v7258_v7, %v7258_v7  ;;  %v5987_v63 = vcombine.low %v916_v35, %v916_v35  ;;  %v1091_v25 = vpack.i.b16 %v7260_v55, %v7247_v48  ;;  %v6288_v56 = vcombine.high %v916_v35, %v916_v35 }
 0x148   :  { %996 = vrot.lane.b32.xlu0 %v6286_v50, %s6524_s19  ;;  %v809_v50 = vshrl.u32 %v7220_v58, 16  ;;  %v797_v58 = vshrl.u32 %v7218_v45, 16 }
 0x149   :  { %v7271_v38 = vpop.permute.xlu1 %1071  ;;  %971 = vrot.lane.b32.xlu1 %v5980_v8, %s6525_s20 }
 0x14a   :  { %v7274_v32 = vpop.permute.xlu0 %1073 }
 0x14b   :  { %v1085_v16 = vpack.i.b16 %v7274_v32, %v7263_v10 }
 0x14c   :  { %1006 = vrot.lane.b32.xlu0 %v5987_v63, %s6525_s20 }
 0x14d   :  { %v1116_v8 = vrot.slane %v1085_v16, %v6914_v46  ;;  %v1076_v4 = vpop.permute.xlu1 %1075  ;;  %981 = vrot.lane.b32.xlu1 %v6284_v11, %s6526_s21  ;;  %v1176_v16 = vrot.slane %v1091_v25, %v6914_v46  ;;  %v810_v11 = vpack.i.b16 %v809_v50, %v808_v36  ;;  %v798_v36 = vpack.i.b16 %v797_v58, %v796_v19 }
 0x14e   :  { %v1097_v22 = vpack.i.b16 %v1076_v4, %v7271_v38  ;;  %v7286_v27 = vpop.permute.xlu0 %1695  ;;  %v1099_v1 = vshrl.u32 %v1076_v4, 16 }
 0x14f   :  { %v1117_v63 = vcombine.low %v1108_v49, %v1116_v8  ;;  %v1118_v29 = vcombine.high %v1108_v49, %v1116_v8  ;;  %v926_v8 = vrot.slane %v810_v11, %v6914_v46  ;;  %v858_v43 = vrot.slane %v798_v36, %v6914_v46 }
 0x150   :  { %v1184_v24 = vrot.slane %v1097_v22, %v6914_v46  ;;  %1016 = vrot.lane.b32.xlu0 %v6288_v56, %s6526_s21  ;;  %v1098_v36 = vshrl.u32 %v7271_v38, 16  ;;  %v1086_v38 = vshrl.u32 %v7263_v10, 16 }
 0x151   :  { %v7294_v61 = vpop.permute.xlu1 %1697  ;;  %v7297_v35 = vrot.slane %v1117_v63, %v6994_v60  ;;  %v1132_v25 = vrot.slane %v1118_v29, %v6994_v60  ;;  %v935_v58 = vcombine.low %v926_v8, %v934_v62  ;;  %v867_v19 = vcombine.low %v858_v43, %v866_v30 }
 0x152   :  { %v1185_v49 = vcombine.low %v1176_v16, %v1184_v24  ;;  %v1186_v23 = vcombine.high %v1176_v16, %v1184_v24  ;;  %v7300_v45 = vpop.permute.xlu0 %1699  ;;  %v1100_v37 = vpack.i.b16 %v1099_v1, %v1098_v36 }
 0x153   :  { %v6290_v22 = vcombine.high %v7297_v35, %v7297_v35  ;;  %v5995_v29 = vcombine.low %v1132_v25, %v1132_v25  ;;  %v875_v4 = vrot.slane %v867_v19, %v6994_v60 }
 0x154   :  { %v7307_v50 = vrot.slane %v1185_v49, %v6994_v60  ;;  %v1200_v63 = vrot.slane %v1186_v23, %v6994_v60  ;;  %v6292_v49 = vcombine.high %v1132_v25, %v1132_v25  ;;  %v1093_v23 = vshrl.u32 %v7260_v55, 16 }
 0x155   :  { %v7310_v56 = vpop.permute.xlu1 %1701  ;;  %1245 = vrot.lane.b32.xlu1 %v6290_v22, %s6524_s19  ;;  %v943_v22 = vrot.slane %v935_v58, %v6994_v60  ;;  %v936_v25 = vcombine.high %v926_v8, %v934_v62  ;;  %v1092_v58 = vshrl.u32 %v7247_v48, 16  ;;  %v1081_v55 = vshrl.u32 %v7252_v13, 16 }
 0x156   :  { %v7314_v40 = vpop.permute.xlu0 %1703  ;;  %v6294_v54 = vcombine.high %v7307_v50, %v7307_v50  ;;  %v6002_v11 = vcombine.low %v1200_v63, %v1200_v63  ;;  %v6296_v51 = vcombine.high %v1200_v63, %v1200_v63  ;;  %v1080_v63 = vshrl.u32 %v7243_v3, 16 }
 0x157   :  { %v1094_v44 = vpack.i.b16 %v1093_v23, %v1092_v58  ;;  %v5977_v8 = vcombine.low %v875_v4, %v875_v4  ;;  %v1218_v48 = vrot.slane %v1100_v37, %v6914_v46  ;;  %v6287_v1 = vcombine.high %v943_v22, %v943_v22 }
 0x158   :  { %1280 = vrot.lane.b32.xlu0 %v6294_v54, %s6524_s19  ;;  %v1087_v54 = vshrl.u32 %v7274_v32, 16  ;;  %v868_v32 = vcombine.high %v858_v43, %v866_v30  ;;  %v950_v13 = vrot.slane %v936_v25, %v6994_v60  ;;  %v1082_v36 = vpack.i.b16 %v1081_v55, %v1080_v63 }
 0x159   :  { %v7321_v16 = vpop.permute.xlu1 %1705  ;;  %1255 = vrot.lane.b32.xlu1 %v5995_v29, %s6525_s20  ;;  %v6283_v3 = vcombine.high %v875_v4, %v875_v4 }
 0x15a   :  { %v7324_v24 = vpop.permute.xlu0 %1707  ;;  %v1088_v19 = vpack.i.b16 %v1087_v54, %v1086_v38  ;;  %v882_v23 = vrot.slane %v868_v32, %v6994_v60  ;;  %v5988_v58 = vcombine.low %v950_v13, %v950_v13  ;;  %v1142_v37 = vrot.slane %v1082_v36, %v6914_v46 }
 0x15b   :  { %v6289_v55 = vcombine.high %v950_v13, %v950_v13 }
 0x15c   :  { %1290 = vrot.lane.b32.xlu0 %v6002_v11, %s6525_s20  ;;  %v5984_v11 = vcombine.low %v943_v22, %v943_v22  ;;  %v1150_v30 = vrot.slane %v1088_v19, %v6914_v46  ;;  %v6285_v63 = vcombine.high %v882_v23, %v882_v23 }
 0x15d   :  { %v7330_v15 = vpop.permute.xlu1 %1709  ;;  %1265 = vrot.lane.b32.xlu1 %v6292_v49, %s6526_s21 }
 0x15e   :  { %v7334_v29 = vpop.permute.xlu0 %1978  ;;  %v1151_v25 = vcombine.low %v1142_v37, %v1150_v30  ;;  %v1152_v13 = vcombine.high %v1142_v37, %v1150_v30 }
 0x160   :  { %1300 = vrot.lane.b32.xlu0 %v6296_v51, %s6526_s21  ;;  %v1210_v51 = vrot.slane %v1094_v44, %v6914_v46  ;;  %v1159_v19 = vrot.slane %v1151_v25, %v6994_v60 }
 0x161   :  { %v7341_v49 = vpop.permute.xlu1 %1980  ;;  %991 = vrot.lane.b32.xlu1 %v5984_v11, %s6527_s22  ;;  %v5981_v11 = vcombine.low %v882_v23, %v882_v23  ;;  %v1731_v23 = vpack.i.b16 %v7330_v15, %v7321_v16 }
 0x162   :  { %v699_v62 = vpop.permute.xlu0 %698  ;;  %v1219_v54 = vcombine.low %v1210_v51, %v1218_v48  ;;  %v5992_v25 = vcombine.low %v1159_v19, %v1159_v19 }
 0x164   :  { %956 = vrot.lane.b32.xlu0 %v5977_v8, %s6527_s22  ;;  %v1227_v38 = vrot.slane %v1219_v54, %v6994_v60  ;;  %v1220_v8 = vcombine.high %v1210_v51, %v1218_v48 }
 0x165   :  { %1001 = vrot.lane.b32.xlu1 %v6287_v1, %s6528_s23  ;;  %v664_v10 = vpop.permute.xlu1 %663  ;;  %v1719_v1 = vpack.i.b16 %v7324_v24, %v7314_v40 }
 0x166   :  { %v709_v43 = vpop.permute.xlu0 %708  ;;  %v5999_v36 = vcombine.low %v1227_v38, %v1227_v38  ;;  %v6295_v37 = vcombine.high %v1227_v38, %v1227_v38  ;;  %v1818_v38 = vrot.slane %v1731_v23, %v6914_v46 }
 0x167   :  { %v1750_v30 = vrot.slane %v1719_v1, %v6914_v46  ;;  %v6291_v1 = vcombine.high %v1159_v19, %v1159_v19 }
 0x168   :  { %966 = vrot.lane.b32.xlu0 %v6283_v3, %s6528_s23  ;;  %v1713_v3 = vpack.i.b16 %v7300_v45, %v7286_v27 }
 0x169   :  { %1011 = vrot.lane.b32.xlu1 %v5988_v58, %s6529_s24  ;;  %v674_v22 = vpop.permute.xlu1 %673 }
 0x16a   :  { %v7355_v44 = vpop.permute.xlu0 %718 }
 0x16c   :  { %976 = vrot.lane.b32.xlu0 %v5981_v11, %s6529_s24  ;;  %v1234_v11 = vrot.slane %v1220_v8, %v6994_v60 }
 0x16d   :  { %1021 = vrot.lane.b32.xlu1 %v6289_v55, %s6530_s25  ;;  %v684_v4 = vpop.permute.xlu1 %683  ;;  %v1725_v55 = vpack.i.b16 %v7310_v56, %v7294_v61 }
 0x16e   :  { %v659_v32 = vpop.permute.xlu0 %658 }
 0x16f   :  { %v728_v48 = vsel %vm725_vm0, %v7016_v14, %v659_v32 }
 0x170   :  { %986 = vrot.lane.b32.xlu0 %v6285_v63, %s6530_s25  ;;  %v1742_v63 = vrot.slane %v1713_v3, %v6914_v46  ;;  %v731_v14 = vsel %vm729_vm1, %v728_v48, %v664_v10  ;;  %v6003_v3 = vcombine.low %v1234_v11, %v1234_v11  ;;  %v1810_v10 = vrot.slane %v1725_v55, %v6914_v46 }
 0x171   :  { %1275 = vrot.lane.b32.xlu1 %v5999_v36, %s6527_s22  ;;  %v694_v54 = vpop.permute.xlu1 %693  ;;  %v6297_v55 = vcombine.high %v1234_v11, %v1234_v11 }
 0x172   :  { %v749_v51 = vsel %vm725_vm0, %v7001_v41, %v694_v54  ;;  %v669_v58 = vpop.permute.xlu0 %668  ;;  %v1751_v52 = vcombine.low %v1742_v63, %v1750_v30  ;;  %v1819_v48 = vcombine.low %v1810_v10, %v1818_v38 }
 0x173   :  { %v751_v41 = vsel %vm729_vm1, %v749_v51, %v699_v62  ;;  %v734_v8 = vsel %vm732_vm2, %v731_v14, %v669_v58  ;;  %v1752_v14 = vcombine.high %v1742_v63, %v1750_v30 }
 0x174   :  { %1240 = vrot.lane.b32.xlu0 %v5992_v25, %s6527_s22  ;;  %v1166_v25 = vrot.slane %v1152_v13, %v6994_v60  ;;  %v737_v62 = vsel %vm735_vm3, %v734_v8, %v674_v22  ;;  %v1820_v8 = vcombine.high %v1810_v10, %v1818_v38 }
 0x175   :  { %1285 = vrot.lane.b32.xlu1 %v6295_v37, %s6528_s23  ;;  %v704_v32 = vpop.permute.xlu1 %703 }
 0x176   :  { %v753_v36 = vsel %vm732_vm2, %v751_v41, %v704_v32  ;;  %v679_v54 = vpop.permute.xlu0 %678  ;;  %v5996_v37 = vcombine.low %v1166_v25, %v1166_v25  ;;  %v7394_v41 = vrot.slane %v1751_v52, %v6994_v60  ;;  %v7404_v52 = vrot.slane %v1819_v48, %v6994_v60 }
 0x177   :  { %v755_v19 = vsel %vm735_vm3, %v753_v36, %v709_v43  ;;  %v740_v51 = vsel %vm738_vm4, %v737_v62, %v679_v54  ;;  %v1766_v54 = vrot.slane %v1752_v14, %v6994_v60 }
 0x178   :  { %1250 = vrot.lane.b32.xlu0 %v6291_v1, %s6528_s23  ;;  %v743_v22 = vsel %vm741_vm5, %v740_v51, %v684_v4  ;;  %v6293_v1 = vcombine.high %v1166_v25, %v1166_v25  ;;  %v6306_v4 = vcombine.high %v7394_v41, %v7394_v41  ;;  %v6310_v25 = vcombine.high %v7404_v52, %v7404_v52 }
 0x179   :  { %1295 = vrot.lane.b32.xlu1 %v6003_v3, %s6529_s24  ;;  %v714_v23 = vpop.permute.xlu1 %713  ;;  %v1834_v3 = vrot.slane %v1820_v8, %v6994_v60  ;;  %v6025_v10 = vcombine.low %v1766_v54, %v1766_v54  ;;  %v6308_v48 = vcombine.high %v1766_v54, %v1766_v54 }
 0x17a   :  { %v757_v13 = vsel %vm738_vm4, %v755_v19, %v714_v23  ;;  %v689_v58 = vpop.permute.xlu0 %688 }
 0x17b   :  { %v759_v43 = vsel %vm741_vm5, %v757_v13, %v7355_v44  ;;  %v746_v36 = vsel %vm744_vm6, %v743_v22, %v689_v58  ;;  %v6032_v23 = vcombine.low %v1834_v3, %v1834_v3  ;;  %v6312_v58 = vcombine.high %v1834_v3, %v1834_v3 }
 0x17c   :  { %1260 = vrot.lane.b32.xlu0 %v5996_v37, %s6529_s24 }
 0x17d   :  { %1305 = vrot.lane.b32.xlu1 %v6297_v55, %s6530_s25  ;;  %v724_v32 = vpop.permute.xlu1 %723 }
 0x17e   :  { %v761_v30 = vsel %vm744_vm6, %v759_v43, %v724_v32  ;;  %v1631_v11 = vpop.permute.xlu0 %1630 }
 0x17f   :  { %v5976_v63 = vcombine.low %v746_v36, %v761_v30 }
 0x180   :  { %1270 = vrot.lane.b32.xlu0 %v6293_v1, %s6530_s25 }
 0x181   :  { %768 = vst [vmem:[#allocation4] sm:$0x33] %v5976_v63  ;;  %1879 = vrot.lane.b32.xlu1 %v6306_v4, %s6524_s19  ;;  %v1596_v44 = vpop.permute.xlu1 %1595 }
 0x182   :  { %v1641_v38 = vpop.permute.xlu0 %1640 }
 0x184   :  { %1914 = vrot.lane.b32.xlu0 %v6310_v25, %s6524_s19 }
 0x185   :  { %1889 = vrot.lane.b32.xlu1 %v6025_v10, %s6525_s20  ;;  %v1606_v62 = vpop.permute.xlu1 %1605 }
 0x186   :  { %v1651_v19 = vpop.permute.xlu0 %1650 }
 0x188   :  { %1924 = vrot.lane.b32.xlu0 %v6032_v23, %s6525_s20 }
 0x189   :  { %1899 = vrot.lane.b32.xlu1 %v6308_v48, %s6526_s21  ;;  %v1616_v51 = vpop.permute.xlu1 %1615 }
 0x18a   :  { %v1591_v13 = vpop.permute.xlu0 %1590 }
 0x18b   :  { %v1659_v14 = vsel %vm725_vm0, %v7099_v21, %v1591_v13 }
 0x18c   :  { %1934 = vrot.lane.b32.xlu0 %v6312_v58, %s6526_s21  ;;  %v1661_v43 = vsel %vm729_vm1, %v1659_v14, %v1596_v44  ;;  %v1715_v14 = vshrl.u32 %v7300_v45, 16  ;;  %v1732_v45 = vshrl.u32 %v7321_v16, 16 }
 0x18d   :  { %v1626_v37 = vpop.permute.xlu1 %1625 }
 0x18e   :  { %v1674_v55 = vsel %vm725_vm0, %v7091_v53, %v1626_v37  ;;  %v1601_v22 = vpop.permute.xlu0 %1600 }
 0x18f   :  { %v1676_v32 = vsel %vm729_vm1, %v1674_v55, %v1631_v11  ;;  %v1663_v8 = vsel %vm732_vm2, %v1661_v43, %v1601_v22  ;;  %v1714_v22 = vshrl.u32 %v7286_v27, 16 }
 0x190   :  { %v1665_v63 = vsel %vm735_vm3, %v1663_v8, %v1606_v62 }
 0x191   :  { %v1636_v1 = vpop.permute.xlu1 %1635 }
 0x192   :  { %v1678_v36 = vsel %vm732_vm2, %v1676_v32, %v1636_v1  ;;  %v1611_v30 = vpop.permute.xlu0 %1610  ;;  %v1733_v1 = vshrl.u32 %v7330_v15, 16 }
 0x193   :  { %v1680_v4 = vsel %vm735_vm3, %v1678_v36, %v1641_v38  ;;  %v1667_v21 = vsel %vm738_vm4, %v1665_v63, %v1611_v30  ;;  %v1721_v38 = vshrl.u32 %v7324_v24, 16  ;;  %v1716_v36 = vpack.i.b16 %v1715_v14, %v1714_v22 }
 0x194   :  { %v1669_v44 = vsel %vm741_vm5, %v1667_v21, %v1616_v51  ;;  %v1720_v51 = vshrl.u32 %v7314_v40, 16  ;;  %v1727_v30 = vshrl.u32 %v7310_v56, 16  ;;  %v1726_v21 = vshrl.u32 %v7294_v61, 16 }
 0x195   :  { %v1646_v54 = vpop.permute.xlu1 %1645  ;;  %v1734_v15 = vpack.i.b16 %v1733_v1, %v1732_v45 }
 0x196   :  { %v1682_v53 = vsel %vm738_vm4, %v1680_v4, %v1646_v54  ;;  %v1621_v25 = vpop.permute.xlu0 %1620  ;;  %v1722_v43 = vpack.i.b16 %v1721_v38, %v1720_v51  ;;  %v1728_v16 = vpack.i.b16 %v1727_v30, %v1726_v21  ;;  %v1997_v30 = vshrl.u32 %v7334_v29, 16 }
 0x197   :  { %v1684_v11 = vsel %vm741_vm5, %v1682_v53, %v1651_v19  ;;  %v1671_v10 = vsel %vm744_vm6, %v1669_v44, %v1621_v25  ;;  %v1776_v44 = vrot.slane %v1716_v36, %v6914_v46  ;;  %v1852_v61 = vrot.slane %v1734_v15, %v6914_v46 }
 0x198   :  { %v1784_v27 = vrot.slane %v1722_v43, %v6914_v46  ;;  %v1844_v14 = vrot.slane %v1728_v16, %v6914_v46 }
 0x199   :  { %v1656_v3 = vpop.permute.xlu1 %1655 }
 0x19a   :  { %v1686_v23 = vsel %vm744_vm6, %v1684_v11, %v1656_v3  ;;  %v1983_v48 = vpop.permute.xlu0 %1982  ;;  %v1853_v43 = vcombine.low %v1844_v14, %v1852_v61 }
 0x19b   :  { %v6021_v13 = vcombine.low %v1671_v10, %v1686_v23  ;;  %v1996_v19 = vpack.i.b16 %v1983_v48, %v7334_v29  ;;  %v1785_v10 = vcombine.low %v1776_v44, %v1784_v27  ;;  %v1854_v29 = vcombine.high %v1844_v14, %v1852_v61 }
 0x19d   :  { %v1692_v62 = vrot.slane %v6021_v13, 6  ;;  %v7435_v58 = vpop.permute.xlu1 %1984  ;;  %v2025_v40 = vrot.slane %v1996_v19, %v6914_v46  ;;  %v1793_v22 = vrot.slane %v1785_v10, %v6994_v60 }
 0x19e   :  { %v1987_v37 = vpop.permute.xlu0 %1986  ;;  %v2008_v24 = vpack.i.b16 %v7435_v58, %v7341_v49  ;;  %v2010_v15 = vshrl.u32 %v7435_v58, 16 }
 0x19f   :  { %1694 = vst [vmem:[#allocation4 + $0x10] sm:$0xcc] %v1692_v62  ;;  %v2003_v36 = vshrl.u32 %v1987_v37, 16 }
 0x1a0   :  { %v7453_v11 = vrot.slane %v2008_v24, %v6914_v46  ;;  %v1786_v24 = vcombine.high %v1776_v44, %v1784_v27 }
 0x1a1   :  { %v1989_v55 = vpop.permute.xlu1 %1988 }
 0x1a2   :  { %v1991_v32 = vpop.permute.xlu0 %1990  ;;  %v1800_v27 = vrot.slane %v1786_v24, %v6994_v60 }
 0x1a3   :  { %v2002_v8 = vpack.i.b16 %v1991_v32, %v1987_v37  ;;  %v2004_v51 = vshrl.u32 %v1991_v32, 16 }
 0x1a5   :  { %v2033_v63 = vrot.slane %v2002_v8, %v6914_v46  ;;  %v1993_v4 = vpop.permute.xlu1 %1992  ;;  %v1998_v8 = vshrl.u32 %v1983_v48, 16  ;;  %v2005_v45 = vpack.i.b16 %v2004_v51, %v2003_v36  ;;  %v2015_v48 = vshrl.u32 %v1989_v55, 16 }
 0x1a6   :  { %v2014_v54 = vpack.i.b16 %v1993_v4, %v1989_v55 }
 0x1a7   :  { %v2034_v53 = vcombine.low %v2025_v40, %v2033_v63  ;;  %v2035_v25 = vcombine.high %v2025_v40, %v2033_v63  ;;  %v6022_v40 = vcombine.low %v1793_v22, %v1793_v22  ;;  %v2016_v63 = vshrl.u32 %v1993_v4, 16 }
 0x1a8   :  { %v7456_v56 = vrot.slane %v2014_v54, %v6914_v46  ;;  %v1861_v54 = vrot.slane %v1853_v43, %v6994_v60  ;;  %v1999_v21 = vpack.i.b16 %v1998_v8, %v1997_v30  ;;  %v2067_v37 = vrot.slane %v2005_v45, %v6914_v46 }
 0x1a9   :  { %v7459_v3 = vrot.slane %v2034_v53, %v6994_v60  ;;  %v2049_v62 = vrot.slane %v2035_v25, %v6994_v60  ;;  %v6307_v53 = vcombine.high %v1793_v22, %v1793_v22  ;;  %v2009_v25 = vshrl.u32 %v7341_v49, 16 }
 0x1aa   :  { %v2102_v23 = vcombine.low %v7453_v11, %v7456_v56  ;;  %v2017_v4 = vpack.i.b16 %v2016_v63, %v2015_v48  ;;  %v6029_v16 = vcombine.low %v1861_v54, %v1861_v54  ;;  %v2059_v10 = vrot.slane %v1999_v21, %v6914_v46 }
 0x1ab   :  { %v6314_v13 = vcombine.high %v7459_v3, %v7459_v3  ;;  %v6040_v1 = vcombine.low %v2049_v62, %v2049_v62  ;;  %v6316_v32 = vcombine.high %v2049_v62, %v2049_v62  ;;  %v2011_v58 = vpack.i.b16 %v2010_v15, %v2009_v25 }
 0x1ac   :  { %v7468_v38 = vrot.slane %v2102_v23, %v6994_v60  ;;  %v2068_v55 = vcombine.low %v2059_v10, %v2067_v37  ;;  %v2135_v62 = vrot.slane %v2017_v4, %v6914_v46  ;;  %v6311_v61 = vcombine.high %v1861_v54, %v1861_v54 }
 0x1ad   :  { %2162 = vrot.lane.b32.xlu1 %v6314_v13, %s6524_s19  ;;  %v6026_v13 = vcombine.low %v1800_v27, %v1800_v27  ;;  %v1868_v49 = vrot.slane %v1854_v29, %v6994_v60  ;;  %v2127_v14 = vrot.slane %v2011_v58, %v6914_v46  ;;  %v2069_v36 = vcombine.high %v2059_v10, %v2067_v37 }
 0x1ae   :  { %v6318_v19 = vcombine.high %v7468_v38, %v7468_v38  ;;  %v2076_v22 = vrot.slane %v2068_v55, %v6994_v60  ;;  %v2307_v21 = vshrl.u32 %v6989_v28, 16  ;;  %v2306_v29 = vshrl.u32 %v6983_v17, 16 }
 0x1af   :  { %v2136_v43 = vcombine.low %v2127_v14, %v2135_v62  ;;  %v6313_v45 = vcombine.high %v1868_v49, %v1868_v49  ;;  %v2083_v54 = vrot.slane %v2069_v36, %v6994_v60  ;;  %v2137_v15 = vcombine.high %v2127_v14, %v2135_v62 }
 0x1b0   :  { %2197 = vrot.lane.b32.xlu0 %v6318_v19, %s6524_s19  ;;  %v6309_v19 = vcombine.high %v1800_v27, %v1800_v27  ;;  %v6037_v24 = vcombine.low %v2076_v22, %v2076_v22  ;;  %v2301_v27 = vshrl.u32 %v6970_v59, 16  ;;  %v2299_v25 = vpack.i.b16 %v6970_v59, %v6964_v9 }
 0x1b1   :  { %2172 = vrot.lane.b32.xlu1 %v6040_v1, %s6525_s20  ;;  %v6033_v1 = vcombine.low %v1868_v49, %v1868_v49  ;;  %v2103_v4 = vcombine.high %v7453_v11, %v7456_v56  ;;  %v6041_v10 = vcombine.low %v2083_v54, %v2083_v54  ;;  %v2300_v58 = vshrl.u32 %v6964_v9, 16 }
 0x1b2   :  { %v2308_v55 = vpack.i.b16 %v2307_v21, %v2306_v29  ;;  %v2328_v11 = vrot.slane %v2299_v25, %v6914_v46 }
 0x1b3   :  { %v2302_v14 = vpack.i.b16 %v2301_v27, %v2300_v58 }
 0x1b4   :  { %1874 = vrot.lane.b32.xlu0 %v6022_v40, %s6527_s22  ;;  %v2144_v40 = vrot.slane %v2136_v43, %v6994_v60  ;;  %v2370_v43 = vrot.slane %v2308_v55, %v6914_v46 }
 0x1b5   :  { %2182 = vrot.lane.b32.xlu1 %v6316_v32, %s6526_s21  ;;  %v6315_v32 = vcombine.high %v2076_v22, %v2076_v22  ;;  %v2117_v22 = vrot.slane %v2103_v4, %v6994_v60  ;;  %v2312_v4 = vshrl.u32 %v6759_v33, 16 }
 0x1b6   :  { %v6044_v37 = vcombine.low %v2144_v40, %v2144_v40  ;;  %v6319_v62 = vcombine.high %v2144_v40, %v2144_v40  ;;  %v2362_v40 = vrot.slane %v2302_v14, %v6914_v46 }
 0x1b7   :  { %v7485_v44 = vpop.permute.xlu1 %961 }
 0x1b8   :  { %1884 = vrot.lane.b32.xlu0 %v6307_v53, %s6528_s23  ;;  %v2305_v53 = vpack.i.b16 %v6989_v28, %v6983_v17 }
 0x1b9   :  { %1909 = vrot.lane.b32.xlu1 %v6029_v16, %s6527_s22 }
 0x1ba   :  { %v7490_v23 = vpop.permute.xlu0 %996  ;;  %v2336_v49 = vrot.slane %v2305_v53, %v6914_v46 }
 0x1bb   :  { %v7496_v51 = vpop.permute.xlu1 %971 }
 0x1bc   :  { %1894 = vrot.lane.b32.xlu0 %v6026_v13, %s6529_s24  ;;  %v2338_v53 = vcombine.high %v2328_v11, %v2336_v49 }
 0x1bd   :  { %1919 = vrot.lane.b32.xlu1 %v6311_v61, %s6528_s23  ;;  %v2151_v61 = vrot.slane %v2137_v15, %v6994_v60  ;;  %v6047_v15 = vcombine.low %v2117_v22, %v2117_v22 }
 0x1be   :  { %v7500_v8 = vpop.permute.xlu0 %1006 }
 0x1bf   :  { %v7504_v30 = vpop.permute.xlu1 %981  ;;  %v6048_v36 = vcombine.low %v2151_v61, %v2151_v61  ;;  %v6321_v29 = vcombine.high %v2151_v61, %v2151_v61 }
 0x1c0   :  { %1904 = vrot.lane.b32.xlu0 %v6309_v19, %s6530_s25  ;;  %v6317_v19 = vcombine.high %v2083_v54, %v2083_v54  ;;  %v2318_v54 = vshrl.u32 %v6807_v57, 16 }
 0x1c1   :  { %1929 = vrot.lane.b32.xlu1 %v6033_v1, %s6529_s24 }
 0x1c2   :  { %v7509_v63 = vpop.permute.xlu0 %1016 }
 0x1c4   :  { %2157 = vrot.lane.b32.xlu0 %v6037_v24, %s6527_s22  ;;  %v2337_v24 = vcombine.low %v2328_v11, %v2336_v49 }
 0x1c5   :  { %1939 = vrot.lane.b32.xlu1 %v6313_v45, %s6530_s25  ;;  %v2319_v45 = vshrl.u32 %v6831_v6, 16 }
 0x1c6   :  { %v7550_v25 = vrot.slane %v2337_v24, %v6994_v60 }
 0x1c7   :  { %v7513_v48 = vpop.permute.xlu1 %1245 }
 0x1c8   :  { %2167 = vrot.lane.b32.xlu0 %v6315_v32, %s6528_s23  ;;  %v2313_v32 = vshrl.u32 %v6778_v42, 16 }
 0x1c9   :  { %2192 = vrot.lane.b32.xlu1 %v6044_v37, %s6527_s22  ;;  %v2371_v37 = vcombine.low %v2362_v40, %v2370_v43 }
 0x1ca   :  { %v7525_v16 = vpop.permute.xlu0 %1280  ;;  %v2314_v58 = vpack.i.b16 %v2313_v32, %v2312_v4 }
 0x1cb   :  { %v7528_v13 = vpop.permute.xlu1 %1255  ;;  %v2379_v14 = vrot.slane %v2371_v37, %v6994_v60 }
 0x1cc   :  { %2177 = vrot.lane.b32.xlu0 %v6041_v10, %s6529_s24  ;;  %v2320_v10 = vpack.i.b16 %v2319_v45, %v2318_v54  ;;  %v2317_v45 = vpack.i.b16 %v6831_v6, %v6807_v57 }
 0x1cd   :  { %2202 = vrot.lane.b32.xlu1 %v6319_v62, %s6528_s23  ;;  %v6320_v62 = vcombine.high %v2117_v22, %v2117_v22  ;;  %v2430_v22 = vrot.slane %v2314_v58, %v6914_v46  ;;  %v6056_v54 = vcombine.low %v2379_v14, %v2379_v14  ;;  %v6323_v58 = vcombine.high %v2379_v14, %v2379_v14 }
 0x1ce   :  { %v7535_v56 = vpop.permute.xlu0 %1290  ;;  %v2438_v24 = vrot.slane %v2320_v10, %v6914_v46  ;;  %v2311_v10 = vpack.i.b16 %v6778_v42, %v6759_v33 }
 0x1cf   :  { %v7539_v1 = vpop.permute.xlu1 %1265 }
 0x1d0   :  { %2187 = vrot.lane.b32.xlu0 %v6317_v19, %s6530_s25  ;;  %v2352_v19 = vrot.slane %v2338_v53, %v6994_v60  ;;  %v2439_v4 = vcombine.low %v2430_v22, %v2438_v24 }
 0x1d1   :  { %2212 = vrot.lane.b32.xlu1 %v6048_v36, %s6529_s24  ;;  %v6322_v36 = vcombine.high %v7550_v25, %v7550_v25 }
 0x1d2   :  { %v7547_v21 = vpop.permute.xlu0 %1300 }
 0x1d3   :  { %v992_v27 = vpop.permute.xlu1 %991 }
 0x1d4   :  { %2207 = vrot.lane.b32.xlu0 %v6047_v15, %s6525_s20  ;;  %v1040_v61 = vsel %vm725_vm0, %v7258_v7, %v992_v27  ;;  %v2372_v15 = vcombine.high %v2362_v40, %v2370_v43 }
 0x1d5   :  { %2222 = vrot.lane.b32.xlu1 %v6321_v29, %s6530_s25  ;;  %v1042_v7 = vsel %vm729_vm1, %v1040_v61, %v7490_v23  ;;  %v6059_v29 = vcombine.low %v2352_v19, %v2352_v19  ;;  %v2404_v23 = vrot.slane %v2317_v45, %v6914_v46  ;;  %v2396_v45 = vrot.slane %v2311_v10, %v6914_v46 }
 0x1d6   :  { %v957_v55 = vpop.permute.xlu0 %956 }
 0x1d7   :  { %v1025_v49 = vsel %vm725_vm0, %v7250_v18, %v957_v55  ;;  %v1002_v11 = vpop.permute.xlu1 %1001  ;;  %v2386_v55 = vrot.slane %v2372_v15, %v6994_v60 }
 0x1d8   :  { %2217 = vrot.lane.b32.xlu0 %v6320_v62, %s6526_s21  ;;  %v1027_v18 = vsel %vm729_vm1, %v1025_v49, %v7485_v44  ;;  %v1044_v37 = vsel %vm732_vm2, %v1042_v7, %v1002_v11  ;;  %v6324_v11 = vcombine.high %v2352_v19, %v2352_v19 }
 0x1d9   :  { %2465 = vrot.lane.b32.xlu1 %v6322_v36, %s6524_s19  ;;  %v1046_v44 = vsel %vm735_vm3, %v1044_v37, %v7500_v8  ;;  %v2447_v36 = vrot.slane %v2439_v4, %v6994_v60  ;;  %v6060_v7 = vcombine.low %v2386_v55, %v2386_v55  ;;  %v2440_v37 = vcombine.high %v2430_v22, %v2438_v24 }
 0x1da   :  { %v967_v32 = vpop.permute.xlu0 %966 }
 0x1db   :  { %v1029_v53 = vsel %vm732_vm2, %v1027_v18, %v967_v32  ;;  %v1012_v27 = vpop.permute.xlu1 %1011  ;;  %v2405_v32 = vcombine.low %v2396_v45, %v2404_v23  ;;  %v6063_v15 = vcombine.low %v2447_v36, %v2447_v36  ;;  %v6327_v24 = vcombine.high %v2447_v36, %v2447_v36 }
 0x1dc   :  { %2460 = vrot.lane.b32.xlu0 %v6056_v54, %s6527_s22  ;;  %v1031_v40 = vsel %vm735_vm3, %v1029_v53, %v7496_v51  ;;  %v1048_v62 = vsel %vm738_vm4, %v1046_v44, %v1012_v27  ;;  %v2454_v22 = vrot.slane %v2440_v37, %v6994_v60 }
 0x1dd   :  { %2475 = vrot.lane.b32.xlu1 %v6059_v29, %s6525_s20  ;;  %v1050_v51 = vsel %vm741_vm5, %v1048_v62, %v7509_v63  ;;  %v6325_v29 = vcombine.high %v2386_v55, %v2386_v55  ;;  %v7600_v4 = vrot.slane %v2405_v32, %v6994_v60 }
 0x1de   :  { %v977_v43 = vpop.permute.xlu0 %976 }
 0x1df   :  { %v1033_v61 = vsel %vm738_vm4, %v1031_v40, %v977_v43  ;;  %v1022_v49 = vpop.permute.xlu1 %1021 }
 0x1e0   :  { %2470 = vrot.lane.b32.xlu0 %v6323_v58, %s6528_s23  ;;  %v1035_v14 = vsel %vm741_vm5, %v1033_v61, %v7504_v30  ;;  %v1052_v18 = vsel %vm744_vm6, %v1050_v51, %v1022_v49  ;;  %v2406_v30 = vcombine.high %v2396_v45, %v2404_v23  ;;  %v6067_v49 = vcombine.low %v2454_v22, %v2454_v22 }
 0x1e1   :  { %2485 = vrot.lane.b32.xlu1 %v6324_v11, %s6526_s21 }
 0x1e2   :  { %v987_v8 = vpop.permute.xlu0 %986 }
 0x1e3   :  { %v1037_v19 = vsel %vm744_vm6, %v1035_v14, %v987_v8  ;;  %v1276_v54 = vpop.permute.xlu1 %1275  ;;  %v6329_v8 = vcombine.high %v2454_v22, %v2454_v22 }
 0x1e4   :  { %v5991_v53 = vcombine.low %v1037_v19, %v1052_v18  ;;  %2480 = vrot.lane.b32.xlu0 %v6060_v7, %s6529_s24  ;;  %v1324_v10 = vsel %vm725_vm0, %v7307_v50, %v1276_v54  ;;  %v6326_v50 = vcombine.high %v7600_v4, %v7600_v4 }
 0x1e5   :  { %2495 = vrot.lane.b32.xlu1 %v6063_v15, %s6527_s22  ;;  %v1326_v40 = vsel %vm729_vm1, %v1324_v10, %v7525_v16 }
 0x1e6   :  { %v1058_v27 = vrot.slane %v5991_v53, 6  ;;  %v1241_v63 = vpop.permute.xlu0 %1240 }
 0x1e7   :  { %v1309_v44 = vsel %vm725_vm0, %v7297_v35, %v1241_v63  ;;  %v1286_v43 = vpop.permute.xlu1 %1285  ;;  %v2420_v35 = vrot.slane %v2406_v30, %v6994_v60 }
 0x1e8   :  { %1060 = vst [vmem:[#allocation4] sm:$0xcc] %v1058_v27  ;;  %2490 = vrot.lane.b32.xlu0 %v6325_v29, %s6530_s25  ;;  %v1311_v23 = vsel %vm729_vm1, %v1309_v44, %v7513_v48  ;;  %v1328_v55 = vsel %vm732_vm2, %v1326_v40, %v1286_v43 }
 0x1e9   :  { %2505 = vrot.lane.b32.xlu1 %v6327_v24, %s6528_s23  ;;  %v1330_v16 = vsel %vm735_vm3, %v1328_v55, %v7535_v56  ;;  %v6066_v36 = vcombine.low %v2420_v35, %v2420_v35  ;;  %v6328_v18 = vcombine.high %v2420_v35, %v2420_v35 }
 0x1ea   :  { %v1251_v58 = vpop.permute.xlu0 %1250 }
 0x1eb   :  { %v1313_v62 = vsel %vm732_vm2, %v1311_v23, %v1251_v58  ;;  %v1296_v61 = vpop.permute.xlu1 %1295 }
 0x1ec   :  { %2500 = vrot.lane.b32.xlu0 %v6326_v50, %s6524_s19  ;;  %v1315_v48 = vsel %vm735_vm3, %v1313_v62, %v7528_v13  ;;  %v1332_v45 = vsel %vm738_vm4, %v1330_v16, %v1296_v61 }
 0x1ed   :  { %2515 = vrot.lane.b32.xlu1 %v6067_v49, %s6529_s24  ;;  %v1334_v7 = vsel %vm741_vm5, %v1332_v45, %v7547_v21 }
 0x1ee   :  { %v1261_v11 = vpop.permute.xlu0 %1260 }
 0x1ef   :  { %v1317_v51 = vsel %vm738_vm4, %v1315_v48, %v1261_v11  ;;  %v1306_v14 = vpop.permute.xlu1 %1305 }
 0x1f0   :  { %2510 = vrot.lane.b32.xlu0 %v6066_v36, %s6525_s20  ;;  %v1319_v56 = vsel %vm741_vm5, %v1317_v51, %v7539_v1  ;;  %v1336_v13 = vsel %vm744_vm6, %v1334_v7, %v1306_v14 }
 0x1f1   :  { %2525 = vrot.lane.b32.xlu1 %v6329_v8, %s6530_s25 }
 0x1f2   :  { %v1271_v32 = vpop.permute.xlu0 %1270 }
 0x1f3   :  { %v1321_v19 = vsel %vm744_vm6, %v1319_v56, %v1271_v32  ;;  %v1880_v15 = vpop.permute.xlu1 %1879 }
 0x1f4   :  { %v6006_v54 = vcombine.low %v1321_v19, %v1336_v13  ;;  %2520 = vrot.lane.b32.xlu0 %v6328_v18, %s6526_s21 }
 0x1f5   :  { %2566 = vrot.lane.b32.xlu1 %v6759_v33, %s6520_s5 }
 0x1f6   :  { %1343 = vst [vmem:[#allocation4 + $0x10] sm:$0x33] %v6006_v54  ;;  %v1915_v37 = vpop.permute.xlu0 %1914 }
 0x1f7   :  { %v1890_v53 = vpop.permute.xlu1 %1889 }
 0x1f8   :  { %2564 = vrot.lane.b32.xlu0 %v6964_v9, %s6520_s5 }
 0x1f9   :  { %2570 = vrot.lane.b32.xlu1 %v6778_v42, %s6520_s5 }
 0x1fa   :  { %v1925_v27 = vpop.permute.xlu0 %1924 }
 0x1fb   :  { %v1900_v63 = vpop.permute.xlu1 %1899 }
 0x1fc   :  { %2568 = vrot.lane.b32.xlu0 %v6970_v59, %s6520_s5 }
 0x1fd   :  { %2574 = vrot.lane.b32.xlu1 %v6807_v57, %s6520_s5  ;;  %v6437_v1 = vld [vmem:[#allocation4 + $0x4] ss:$16 sps:$4 sm:$0xff]   ;;  %v6439_v21 = vld [vmem:[#allocation4] ss:$16 sps:$4 sm:$0xff]  }
 0x1fe   :  { %5845 = vmatprep.subr.bf16.mxu0 %v6437_v1  ;;  %v1935_v29 = vpop.permute.xlu0 %1934 }
 0x1ff   :  { %5846 = vmatpush1.bf16.msra.mxu0 %v6439_v21 }
 0x200   :  { %2572 = vrot.lane.b32.xlu0 %v6983_v17, %s6520_s5 }
 0x201   :  { %2578 = vrot.lane.b32.xlu1 %v6831_v6, %s6520_s5 }
 0x204   :  { %2576 = vrot.lane.b32.xlu0 %v6989_v28, %s6520_s5 }
 0x21f   :  { %v2163_v30 = vpop.permute.xlu1 %2162 }
 0x222   :  { %v2198_v10 = vpop.permute.xlu0 %2197 }
 0x223   :  { %v2173_v44 = vpop.permute.xlu1 %2172 }
 0x226   :  { %v1875_v43 = vpop.permute.xlu0 %1874 }
 0x227   :  { %v2183_v24 = vpop.permute.xlu1 %2182  ;;  %v1943_v58 = vsel %vm725_vm0, %v7394_v41, %v1875_v43 }
 0x228   :  { %v1945_v35 = vsel %vm729_vm1, %v1943_v58, %v1880_v15 }
 0x22a   :  { %v1885_v22 = vpop.permute.xlu0 %1884 }
 0x22b   :  { %v1910_v40 = vpop.permute.xlu1 %1909  ;;  %v1947_v61 = vsel %vm732_vm2, %v1945_v35, %v1885_v22 }
 0x22c   :  { %v1958_v23 = vsel %vm725_vm0, %v7404_v52, %v1910_v40  ;;  %v1949_v11 = vsel %vm735_vm3, %v1947_v61, %v1890_v53 }
 0x22d   :  { %v1960_v55 = vsel %vm729_vm1, %v1958_v23, %v1915_v37 }
 0x22e   :  { %v1895_v50 = vpop.permute.xlu0 %1894 }
 0x22f   :  { %v1920_v62 = vpop.permute.xlu1 %1919  ;;  %v1951_v41 = vsel %vm738_vm4, %v1949_v11, %v1895_v50 }
 0x230   :  { %v1962_v49 = vsel %vm732_vm2, %v1960_v55, %v1920_v62  ;;  %v1953_v51 = vsel %vm741_vm5, %v1951_v41, %v1900_v63 }
 0x231   :  { %v1964_v48 = vsel %vm735_vm3, %v1962_v49, %v1925_v27 }
 0x232   :  { %v1905_v16 = vpop.permute.xlu0 %1904 }
 0x233   :  { %v1930_v36 = vpop.permute.xlu1 %1929  ;;  %v1955_v7 = vsel %vm744_vm6, %v1953_v51, %v1905_v16 }
 0x234   :  { %v1966_v52 = vsel %vm738_vm4, %v1964_v48, %v1930_v36 }
 0x235   :  { %v1968_v8 = vsel %vm741_vm5, %v1966_v52, %v1935_v29 }
 0x236   :  { %v2158_v45 = vpop.permute.xlu0 %2157 }
 0x237   :  { %v1940_v14 = vpop.permute.xlu1 %1939  ;;  %v2226_v1 = vsel %vm725_vm0, %v7459_v3, %v2158_v45 }
 0x238   :  { %v1970_v32 = vsel %vm744_vm6, %v1968_v8, %v1940_v14  ;;  %v2228_v37 = vsel %vm729_vm1, %v2226_v1, %v2163_v30 }
 0x239   :  { %v6036_v56 = vcombine.low %v1955_v7, %v1970_v32 }
 0x23a   :  { %v2168_v18 = vpop.permute.xlu0 %2167 }
 0x23b   :  { %1977 = vst [vmem:[#allocation4 + $0x20] sm:$0x33] %v6036_v56  ;;  %v2193_v13 = vpop.permute.xlu1 %2192  ;;  %v2230_v27 = vsel %vm732_vm2, %v2228_v37, %v2168_v18 }
 0x23c   :  { %v2241_v21 = vsel %vm725_vm0, %v7468_v38, %v2193_v13  ;;  %v2232_v22 = vsel %vm735_vm3, %v2230_v27, %v2173_v44 }
 0x23d   :  { %v2243_v63 = vsel %vm729_vm1, %v2241_v21, %v2198_v10 }
 0x23e   :  { %v2178_v19 = vpop.permute.xlu0 %2177 }
 0x23f   :  { %v2203_v54 = vpop.permute.xlu1 %2202  ;;  %v2234_v3 = vsel %vm738_vm4, %v2232_v22, %v2178_v19 }
 0x240   :  { %v2245_v29 = vsel %vm732_vm2, %v2243_v63, %v2203_v54  ;;  %v2236_v30 = vsel %vm741_vm5, %v2234_v3, %v2183_v24 }
 0x242   :  { %v2188_v15 = vpop.permute.xlu0 %2187 }
 0x243   :  { %v2213_v53 = vpop.permute.xlu1 %2212  ;;  %v2238_v10 = vsel %vm744_vm6, %v2236_v30, %v2188_v15 }
 0x246   :  { %v2208_v43 = vpop.permute.xlu0 %2207 }
 0x247   :  { %v2247_v40 = vsel %vm735_vm3, %v2245_v29, %v2208_v43  ;;  %v2223_v58 = vpop.permute.xlu1 %2222 }
 0x248   :  { %v2249_v38 = vsel %vm738_vm4, %v2247_v40, %v2213_v53 }
 0x24a   :  { %v2218_v23 = vpop.permute.xlu0 %2217 }
 0x24b   :  { %v2251_v50 = vsel %vm741_vm5, %v2249_v38, %v2218_v23  ;;  %v2466_v35 = vpop.permute.xlu1 %2465 }
 0x24c   :  { %v2253_v55 = vsel %vm744_vm6, %v2251_v50, %v2223_v58 }
 0x24d   :  { %v6051_v62 = vcombine.low %v2238_v10, %v2253_v55 }
 0x24e   :  { %v2461_v61 = vpop.permute.xlu0 %2460 }
 0x24f   :  { %v2259_v44 = vrot.slane %v6051_v62, 6  ;;  %v2476_v49 = vpop.permute.xlu1 %2475  ;;  %v2529_v24 = vsel %vm725_vm0, %v7550_v25, %v2461_v61 }
 0x250   :  { %v2531_v8 = vsel %vm729_vm1, %v2529_v24, %v2466_v35 }
 0x251   :  { %2261 = vst [vmem:[#allocation4 + $0x20] sm:$0xcc] %v2259_v44 }
 0x252   :  { %v2471_v16 = vpop.permute.xlu0 %2470 }
 0x253   :  { %v2486_v11 = vpop.permute.xlu1 %2485  ;;  %v2533_v32 = vsel %vm732_vm2, %v2531_v8, %v2471_v16 }
 0x254   :  { %v2535_v13 = vsel %vm735_vm3, %v2533_v32, %v2476_v49 }
 0x256   :  { %v2481_v48 = vpop.permute.xlu0 %2480 }
 0x257   :  { %v2496_v36 = vpop.permute.xlu1 %2495  ;;  %v2537_v25 = vsel %vm738_vm4, %v2535_v13, %v2481_v48 }
 0x258   :  { %v2544_v45 = vsel %vm725_vm0, %v7600_v4, %v2496_v36  ;;  %v2539_v21 = vsel %vm741_vm5, %v2537_v25, %v2486_v11 }
 0x25a   :  { %v2491_v41 = vpop.permute.xlu0 %2490 }
 0x25b   :  { %v2506_v52 = vpop.permute.xlu1 %2505  ;;  %v2541_v53 = vsel %vm744_vm6, %v2539_v21, %v2491_v41 }
 0x25e   :  { %v2501_v51 = vpop.permute.xlu0 %2500 }
 0x25f   :  { %v2546_v14 = vsel %vm729_vm1, %v2544_v45, %v2501_v51  ;;  %v2516_v7 = vpop.permute.xlu1 %2515 }
 0x260   :  { %v2548_v18 = vsel %vm732_vm2, %v2546_v14, %v2506_v52 }
 0x262   :  { %v2511_v56 = vpop.permute.xlu0 %2510 }
 0x263   :  { %v2550_v19 = vsel %vm735_vm3, %v2548_v18, %v2511_v56  ;;  %v2526_v54 = vpop.permute.xlu1 %2525 }
 0x264   :  { %v2552_v4 = vsel %vm738_vm4, %v2550_v19, %v2516_v7 }
 0x266   :  { %v2521_v1 = vpop.permute.xlu0 %2520 }
 0x267   :  { %v2554_v15 = vsel %vm741_vm5, %v2552_v4, %v2521_v1  ;;  %v2567_v37 = vpop.permute.xlu1 %2566 }
 0x268   :  { %v2556_v27 = vsel %vm744_vm6, %v2554_v15, %v2526_v54  ;;  %v2595_v36 = vshrl.u32 %v2567_v37, 16 }
 0x269   :  { %v6070_v63 = vcombine.low %v2541_v53, %v2556_v27 }
 0x26a   :  { %v2565_v29 = vpop.permute.xlu0 %2564 }
 0x26b   :  { %2563 = vst [vmem:[#allocation4 + $0x30] sm:$0x33] %v6070_v63  ;;  %v2571_v43 = vpop.permute.xlu1 %2570  ;;  %v2583_v23 = vshrl.u32 %v2565_v29, 16 }
 0x26c   :  { %v2596_v44 = vshrl.u32 %v2571_v43, 16  ;;  %v2594_v4 = vpack.i.b16 %v2571_v43, %v2567_v37 }
 0x26e   :  { %v2569_v22 = vpop.permute.xlu0 %2568  ;;  %v2597_v8 = vpack.i.b16 %v2596_v44, %v2595_v36 }
 0x26f   :  { %v2575_v40 = vpop.permute.xlu1 %2574  ;;  %v2584_v58 = vshrl.u32 %v2569_v22, 16  ;;  %v2582_v30 = vpack.i.b16 %v2569_v22, %v2565_v29  ;;  %v2679_v29 = vrot.slane %v2594_v4, %v6914_v46 }
 0x270   :  { %v2601_v16 = vshrl.u32 %v2575_v40, 16  ;;  %v2713_v19 = vrot.slane %v2597_v8, %v6914_v46  ;;  %v7787_v8 = vld [vmem:[#allocation3 + $0x40] sm:$0xf] }
 0x271   :  { %v2585_v50 = vpack.i.b16 %v2584_v58, %v2583_v23  ;;  %v2611_v49 = vrot.slane %v2582_v30, %v6914_v46 }
 0x272   :  { %v2573_v3 = vpop.permute.xlu0 %2572 }
 0x273   :  { %v2579_v38 = vpop.permute.xlu1 %2578  ;;  %v2589_v10 = vshrl.u32 %v2573_v3, 16  ;;  %v2645_v41 = vrot.slane %v2585_v50, %v6914_v46 }
 0x274   :  { %v2602_v55 = vshrl.u32 %v2579_v38, 16  ;;  %v2600_v54 = vpack.i.b16 %v2579_v38, %v2575_v40 }
 0x276   :  { %v2577_v35 = vpop.permute.xlu0 %2576  ;;  %v2603_v52 = vpack.i.b16 %v2602_v55, %v2601_v16  ;;  %v2687_v53 = vrot.slane %v2600_v54, %v6914_v46 }
 0x277   :  { %v2588_v62 = vpack.i.b16 %v2577_v35, %v2573_v3  ;;  %v2590_v61 = vshrl.u32 %v2577_v35, 16 }
 0x278   :  { %v2721_v32 = vrot.slane %v2603_v52, %v6914_v46  ;;  %v2688_v58 = vcombine.low %v2679_v29, %v2687_v53  ;;  %v2689_v23 = vcombine.high %v2679_v29, %v2687_v53 }
 0x279   :  { %v2591_v11 = vpack.i.b16 %v2590_v61, %v2589_v10  ;;  %v2619_v48 = vrot.slane %v2588_v62, %v6914_v46 }
 0x27a   :  { %v2722_v21 = vcombine.low %v2713_v19, %v2721_v32  ;;  %v2723_v43 = vcombine.high %v2713_v19, %v2721_v32  ;;  %v7724_v30 = vrot.slane %v2688_v58, %v6994_v60  ;;  %v2703_v55 = vrot.slane %v2689_v23, %v6994_v60 }
 0x27b   :  { %v2620_v24 = vcombine.low %v2611_v49, %v2619_v48  ;;  %v2621_v45 = vcombine.high %v2611_v49, %v2619_v48  ;;  %v2653_v51 = vrot.slane %v2591_v11, %v6914_v46  ;;  %v7777_v48 = vld [vmem:[#allocation3 + $0x34] sm:$0xf] }
 0x27c   :  { %v2730_v40 = vrot.slane %v2722_v21, %v6994_v60  ;;  %v2737_v35 = vrot.slane %v2723_v43, %v6994_v60  ;;  %v6334_v10 = vcombine.high %v7724_v30, %v7724_v30  ;;  %v6081_v61 = vcombine.low %v2703_v55, %v2703_v55 }
 0x27d   :  { %v2654_v14 = vcombine.low %v2645_v41, %v2653_v51  ;;  %v7704_v7 = vrot.slane %v2620_v24, %v6994_v60  ;;  %v2635_v13 = vrot.slane %v2621_v45, %v6994_v60  ;;  %v2655_v25 = vcombine.high %v2645_v41, %v2653_v51 }
 0x27e   :  { %v6078_v3 = vcombine.low %v2730_v40, %v2730_v40  ;;  %v6335_v50 = vcombine.high %v2730_v40, %v2730_v40  ;;  %v6082_v62 = vcombine.low %v2737_v35, %v2737_v35  ;;  %v6337_v44 = vcombine.high %v2737_v35, %v2737_v35  ;;  %v7816_v40 = vld [vmem:[#allocation3 + $0x58] sm:$0xf] }
 0x27f   :  { %v6330_v56 = vcombine.high %v7704_v7, %v7704_v7  ;;  %v2662_v18 = vrot.slane %v2654_v14, %v6994_v60  ;;  %v6074_v15 = vcombine.low %v2635_v13, %v2635_v13  ;;  %v2669_v63 = vrot.slane %v2655_v25, %v6994_v60  ;;  %v7802_v25 = vld [vmem:[#allocation3 + $0x4c] sm:$0xf] }
 0x280   :  { %v6332_v22 = vcombine.high %v2635_v13, %v2635_v13  ;;  %v6336_v49 = vcombine.high %v2703_v55, %v2703_v55  ;;  %v3993_v36 = vshll.u32 %v7777_v48, 16  ;;  %v9743_v41 = vshrl.u32 %v7049_v0, 16 }
 0x281   :  { %2748 = vrot.lane.b32.xlu1 %v6330_v56, %s6524_s19  ;;  %v6071_v1 = vcombine.low %v2662_v18, %v2662_v18  ;;  %v6331_v27 = vcombine.high %v2662_v18, %v2662_v18  ;;  %v6075_v37 = vcombine.low %v2669_v63, %v2669_v63  ;;  %v6333_v38 = vcombine.high %v2669_v63, %v2669_v63 }
 0x282   :  { %v4007_v52 = vrot.slane %v9743_v41, 4  ;;  %v7785_v51 = vrot.slane %v3993_v36, 5  ;;  %v4013_v14 = vshll.u32 %v7787_v8, 16  ;;  %v9744_v56 = vshrl.u32 %v7054_v39, 16 }
 0x283   :  { %2743 = vrot.lane.b32.xlu0 %v6071_v1, %s6527_s22  ;;  %v4033_v1 = vshll.u32 %v7802_v25, 16  ;;  %v9745_v21 = vshrl.u32 %v7056_v47, 16  ;;  %v4053_v58 = vshll.u32 %v7816_v40, 16 }
 0x284   :  { %v4027_v18 = vrot.slane %v9744_v56, 4  ;;  %v7800_v54 = vrot.slane %v4013_v14, 5 }
 0x285   :  { %2758 = vrot.lane.b32.xlu1 %v6074_v15, %s6525_s20  ;;  %v4047_v15 = vrot.slane %v9745_v21, 4  ;;  %v7826_v43 = vrot.slane %v4053_v58, 5 }
 0x287   :  { %2753 = vrot.lane.b32.xlu0 %v6331_v27, %s6528_s23  ;;  %v7809_v27 = vrot.slane %v4033_v1, 5 }
 0x289   :  { %2768 = vrot.lane.b32.xlu1 %v6332_v22, %s6526_s21 }
 0x28b   :  { %2763 = vrot.lane.b32.xlu0 %v6075_v37, %s6529_s24 }
 0x28d   :  { %2778 = vrot.lane.b32.xlu1 %v6078_v3, %s6527_s22 }
 0x28f   :  { %2773 = vrot.lane.b32.xlu0 %v6333_v38, %s6530_s25 }
 0x291   :  { %2788 = vrot.lane.b32.xlu1 %v6335_v50, %s6528_s23 }
 0x293   :  { %2783 = vrot.lane.b32.xlu0 %v6334_v10, %s6524_s19 }
 0x295   :  { %2798 = vrot.lane.b32.xlu1 %v6082_v62, %s6529_s24 }
 0x297   :  { %2793 = vrot.lane.b32.xlu0 %v6081_v61, %s6525_s20 }
 0x299   :  { %2808 = vrot.lane.b32.xlu1 %v6337_v44, %s6530_s25 }
 0x29b   :  { %2803 = vrot.lane.b32.xlu0 %v6336_v49, %s6526_s21 }
 0x29d   :  { %2850 = vrot.lane.b32.xlu1 %v6759_v33, %s6521_s18  ;;  %v7753_v33 = vld [vmem:[#allocation3 + $0x30] sm:$0xf] }
 0x29f   :  { %2848 = vrot.lane.b32.xlu0 %v6964_v9, %s6521_s18  ;;  %v7765_v9 = vld [vmem:[#allocation3 + $0x54] sm:$0xf] }
 0x2a0   :  { %v4048_v0 = vshll.u32 %v7765_v9, 16 }
 0x2a1   :  { %2854 = vrot.lane.b32.xlu1 %v6778_v42, %s6521_s18  ;;  %v7757_v42 = vld [vmem:[#allocation3 + $0x3c] sm:$0xf] }
 0x2a2   :  { %v4008_v16 = vshll.u32 %v7757_v42, 16  ;;  %v4050_v53 = vrot.slane %v4048_v0, 5 }
 0x2a3   :  { %2852 = vrot.lane.b32.xlu0 %v6970_v59, %s6521_s18  ;;  %v9742_v59 = vshrl.u32 %v7047_v2, 16 }
 0x2a4   :  { %v4010_v24 = vrot.slane %v4008_v16, 5  ;;  %v4051_v22 = vor.u32 %v4050_v53, %v4047_v15 }
 0x2a5   :  { %2858 = vrot.lane.b32.xlu1 %v6807_v57, %s6521_s18  ;;  %v7761_v57 = vld [vmem:[#allocation3 + $0x48] sm:$0xf] }
 0x2a6   :  { %v4028_v45 = vshll.u32 %v7761_v57, 16  ;;  %v4011_v32 = vor.u32 %v4010_v24, %v4007_v52  ;;  %v4052_v37 = vrot.slane %v4051_v22, 4 }
 0x2a7   :  { %2856 = vrot.lane.b32.xlu0 %v6983_v17, %s6521_s18  ;;  %v3987_v17 = vrot.slane %v9742_v59, 4 }
 0x2a8   :  { %v4030_v13 = vrot.slane %v4028_v45, 5  ;;  %v4012_v4 = vrot.slane %v4011_v32, 4  ;;  %v7833_v3 = vsel %vm6857_vm15, %v4052_v37, %v7826_v43 }
 0x2a9   :  { %2862 = vrot.lane.b32.xlu1 %v6831_v6, %s6521_s18  ;;  %v3988_v6 = vshll.u32 %v7753_v33, 16 }
 0x2aa   :  { %v4031_v39 = vor.u32 %v4030_v13, %v4027_v18  ;;  %v7814_v63 = vsel %vm6857_vm15, %v4012_v4, %v7800_v54 }
 0x2ab   :  { %2860 = vrot.lane.b32.xlu0 %v6989_v28, %s6521_s18  ;;  %v3990_v28 = vrot.slane %v3988_v6, 5 }
 0x2ac   :  { %v4032_v29 = vrot.slane %v4031_v39, 4 }
 0x2ad   :  { %3419 = vrot.lane.b32.xlu1 %v7753_v33, %s6520_s5  ;;  %v3991_v11 = vor.u32 %v3990_v28, %v3987_v17 }
 0x2ae   :  { %v7824_v47 = vsel %vm6857_vm15, %v4032_v29, %v7809_v27 }
 0x2af   :  { %v3992_v2 = vrot.slane %v3991_v11, 4 }
 0x2b1   :  { %3423 = vrot.lane.b32.xlu1 %v7757_v42, %s6520_s5  ;;  %v7798_v19 = vsel %vm6857_vm15, %v3992_v2, %v7785_v51 }
 0x2b5   :  { %3427 = vrot.lane.b32.xlu1 %v7761_v57, %s6520_s5 }
 0x2b9   :  { %3431 = vrot.lane.b32.xlu1 %v7765_v9, %s6520_s5 }
 0x2bd   :  { %3703 = vrot.lane.b32.xlu1 %v7753_v33, %s6521_s18 }
 0x2c1   :  { %3707 = vrot.lane.b32.xlu1 %v7757_v42, %s6521_s18 }
 0x2c5   :  { %3711 = vrot.lane.b32.xlu1 %v7761_v57, %s6521_s18 }
 0x2c9   :  { %3715 = vrot.lane.b32.xlu1 %v7765_v9, %s6521_s18 }
 0x2cd   :  { %4617 = vrot.lane.b32.xlu1 %v7798_v19, %s6521_s18 }
 0x2d1   :  { %4621 = vrot.lane.b32.xlu1 %v7814_v63, %s6521_s18 }
 0x2d5   :  { %4625 = vrot.lane.b32.xlu1 %v7824_v47, %s6521_s18 }
 0x2d9   :  { %4629 = vrot.lane.b32.xlu1 %v7833_v3, %s6521_s18 }
 0x2dd   :  { %5200 = vrot.lane.b32.xlu1 %v7180_v31, %s6520_s5 }
 0x2e1   :  { %5204 = vrot.lane.b32.xlu1 %v7186_v26, %s6520_s5 }
 0x2e5   :  { %5208 = vrot.lane.b32.xlu1 %v7192_v5, %s6520_s5 }
 0x2e9   :  { %5212 = vrot.lane.b32.xlu1 %v7198_v20, %s6520_s5 }
 0x2ed   :  { %4334 = vrot.lane.b32.xlu1 %v7798_v19, %s6520_s5 }
 0x2f1   :  { %4338 = vrot.lane.b32.xlu1 %v7814_v63, %s6520_s5 }
 0x2f3   :  { %v2749_v23 = vpop.permute.xlu1 %2748 }
 0x2f5   :  { %v2744_v38 = vpop.permute.xlu0 %2743  ;;  %4342 = vrot.lane.b32.xlu1 %v7824_v47, %s6520_s5 }
 0x2f6   :  { %v2812_v44 = vsel %vm725_vm0, %v7704_v7, %v2744_v38 }
 0x2f7   :  { %v2759_v50 = vpop.permute.xlu1 %2758  ;;  %v2814_v17 = vsel %vm729_vm1, %v2812_v44, %v2749_v23 }
 0x2f9   :  { %v2754_v35 = vpop.permute.xlu0 %2753  ;;  %4346 = vrot.lane.b32.xlu1 %v7833_v3, %s6520_s5 }
 0x2fa   :  { %v2816_v16 = vsel %vm732_vm2, %v2814_v17, %v2754_v35 }
 0x2fb   :  { %v2769_v10 = vpop.permute.xlu1 %2768  ;;  %v2818_v41 = vsel %vm735_vm3, %v2816_v16, %v2759_v50 }
 0x2fd   :  { %v2764_v55 = vpop.permute.xlu0 %2763  ;;  %5484 = vrot.lane.b32.xlu1 %v7180_v31, %s6521_s18 }
 0x2fe   :  { %v2820_v52 = vsel %vm738_vm4, %v2818_v41, %v2764_v55 }
 0x2ff   :  { %v2779_v62 = vpop.permute.xlu1 %2778  ;;  %v2822_v14 = vsel %vm741_vm5, %v2820_v52, %v2769_v10 }
 0x300   :  { %v2827_v6 = vsel %vm725_vm0, %v7724_v30, %v2779_v62 }
 0x301   :  { %v2774_v61 = vpop.permute.xlu0 %2773  ;;  %5488 = vrot.lane.b32.xlu1 %v7186_v26, %s6521_s18 }
 0x302   :  { %v2824_v56 = vsel %vm744_vm6, %v2822_v14, %v2774_v61  ;;  %v4076_v14 = vshrl.u32 %v7833_v3, 16 }
 0x303   :  { %v2789_v49 = vpop.permute.xlu1 %2788 }
 0x305   :  { %5492 = vrot.lane.b32.xlu1 %v7192_v5, %s6521_s18  ;;  %v2784_v59 = vpop.permute.xlu0 %2783 }
 0x306   :  { %v2829_v28 = vsel %vm729_vm1, %v2827_v6, %v2784_v59 }
 0x307   :  { %v2799_v11 = vpop.permute.xlu1 %2798  ;;  %v2831_v7 = vsel %vm732_vm2, %v2829_v28, %v2789_v49 }
 0x309   :  { %5496 = vrot.lane.b32.xlu1 %v7198_v20, %s6521_s18  ;;  %v2794_v36 = vpop.permute.xlu0 %2793 }
 0x30a   :  { %v2833_v30 = vsel %vm735_vm3, %v2831_v7, %v2794_v36 }
 0x30b   :  { %v2809_v24 = vpop.permute.xlu1 %2808  ;;  %v2835_v2 = vsel %vm738_vm4, %v2833_v30, %v2799_v11 }
 0x30d   :  { %v2804_v45 = vpop.permute.xlu0 %2803 }
 0x30e   :  { %v2837_v32 = vsel %vm741_vm5, %v2835_v2, %v2804_v45  ;;  %v4070_v45 = vshrl.u32 %v7814_v63, 16  ;;  %v4075_v2 = vshrl.u32 %v7824_v47, 16 }
 0x30f   :  { %v2839_v18 = vsel %vm744_vm6, %v2837_v32, %v2809_v24  ;;  %v7877_v13 = vpop.permute.xlu1 %2850  ;;  %v4069_v24 = vshrl.u32 %v7798_v19, 16 }
 0x310   :  { %9746 = vst [vmem:[#allocation25_spill] sm:$0xff] %v7877_v13  ;;  %v6085_v0 = vcombine.low %v2824_v56, %v2839_v18  ;;  %v2879_v22 = vshrl.u32 %v7877_v13, 16  ;;  %v8078_v13 = vld [vmem:[#allocation3 + $0x50] sm:$0x1] }
 0x311   :  { %v7879_v1 = vpop.permute.xlu0 %2848 }
 0x312   :  { %9747 = vst [vmem:[#allocation26_spill] sm:$0xff] %v7879_v1  ;;  %v2845_v4 = vrot.slane %v6085_v0, 6  ;;  %v2867_v50 = vshrl.u32 %v7879_v1, 16 }
 0x313   :  { %v7881_v39 = vpop.permute.xlu1 %2854 }
 0x314   :  { %9748 = vst [vmem:[#allocation27_spill] sm:$0xff] %v7881_v39  ;;  %2847 = vst [vmem:[#allocation4 + $0x30] sm:$0xcc] %v2845_v4  ;;  %v2880_v53 = vshrl.u32 %v7881_v39, 16  ;;  %v4071_v4 = vpack.i.b16 %v4070_v45, %v4069_v24  ;;  %v4074_v24 = vpack.i.b16 %v7833_v3, %v7824_v47 }
 0x315   :  { %v7883_v21 = vpop.permute.xlu0 %2852 }
 0x316   :  { %9749 = vst [vmem:[#allocation28_spill] sm:$0xff] %v7883_v21  ;;  %v2868_v58 = vshrl.u32 %v7883_v21, 16  ;;  %v2881_v35 = vpack.i.b16 %v2880_v53, %v2879_v22  ;;  %v4077_v53 = vpack.i.b16 %v4076_v14, %v4075_v2  ;;  %v7970_v47 = vrot.slane %v4074_v24, %v6914_v46  ;;  %v9767_v21 = vld [vmem:[#allocation19_spill] sm:$0xff] }
 0x317   :  { %v7885_v15 = vpop.permute.xlu1 %2858  ;;  %v9768_v1 = vshrl.u32 %v9767_v21, 16 }
 0x318   :  { %9750 = vst [vmem:[#allocation29_spill] sm:$0xff] %v7885_v15  ;;  %v2885_v10 = vshrl.u32 %v7885_v15, 16  ;;  %v2869_v61 = vpack.i.b16 %v2868_v58, %v2867_v50  ;;  %v7902_v17 = vrot.slane %v2881_v35, %v6914_v46  ;;  %v7930_v35 = vrot.slane %v4071_v4, %v6914_v46 }
 0x319   :  { %v7888_v29 = vpop.permute.xlu0 %2856 }
 0x31a   :  { %9751 = vst [vmem:[#allocation30_spill] sm:$0xff] %v7888_v29  ;;  %v2873_v44 = vshrl.u32 %v7888_v29, 16  ;;  %9754 = vst [vmem:[#allocation33_spill] sm:$0xff] %v7902_v17  ;;  %v7908_v11 = vrot.slane %v2869_v61, %v6914_v46 }
 0x31b   :  { %v7892_v37 = vpop.permute.xlu1 %2862  ;;  %v6440_v23 = vld [vmem:[#allocation4 + $0x24] ss:$16 sps:$4 sm:$0xff]   ;;  %v6442_v38 = vld [vmem:[#allocation4 + $0x20] ss:$16 sps:$4 sm:$0xff]  }
 0x31c   :  { %9752 = vst [vmem:[#allocation31_spill] sm:$0xff] %v7892_v37  ;;  %v2886_v55 = vshrl.u32 %v7892_v37, 16  ;;  %5847 = vmatprep.subr.bf16.mxu0 %v6440_v23  ;;  %9756 = vst [vmem:[#allocation35_spill] sm:$0xff] %v7908_v11  ;;  %v9769_v37 = vld [vmem:[#allocation20_spill] sm:$0xff] }
 0x31d   :  { %v7897_v62 = vpop.permute.xlu0 %2860  ;;  %5848 = vmatpush1.bf16.msra.mxu0 %v6442_v38 }
 0x31e   :  { %9753 = vst [vmem:[#allocation32_spill] sm:$0xff] %v7897_v62  ;;  %v2887_v49 = vpack.i.b16 %v2886_v55, %v2885_v10  ;;  %v2874_v6 = vshrl.u32 %v7897_v62, 16  ;;  %v7933_v10 = vrot.slane %v4077_v53, %v6914_v46  ;;  %v4038_v62 = vrot.slane %v9768_v1, 4 }
 0x31f   :  { %v3420_v59 = vpop.permute.xlu1 %3419 }
 0x320   :  { %v7905_v28 = vrot.slane %v2887_v49, %v6914_v46  ;;  %v2875_v16 = vpack.i.b16 %v2874_v6, %v2873_v44  ;;  %v3438_v22 = vshrl.u32 %v3420_v59, 16 }
 0x322   :  { %9755 = vst [vmem:[#allocation34_spill] sm:$0xff] %v7905_v28  ;;  %v7913_v7 = vrot.slane %v2875_v16, %v6914_v46 }
 0x323   :  { %v3424_v41 = vpop.permute.xlu1 %3423 }
 0x324   :  { %9757 = vst [vmem:[#allocation36_spill] sm:$0xff] %v7913_v7  ;;  %v2938_v30 = vcombine.low %v7908_v11, %v7913_v7  ;;  %v3439_v18 = vshrl.u32 %v3424_v41, 16  ;;  %v3437_v49 = vpack.i.b16 %v3424_v41, %v3420_v59  ;;  %v4140_v59 = vcombine.low %v7930_v35, %v7933_v10 }
 0x325   :  { %v3146_v11 = vpack.i.b16 %v7757_v42, %v7753_v33 }
 0x326   :  { %v7924_v32 = vrot.slane %v2938_v30, %v6994_v60  ;;  %v3440_v23 = vpack.i.b16 %v3439_v18, %v3438_v22  ;;  %v4068_v30 = vpack.i.b16 %v7814_v63, %v7798_v19  ;;  %v7961_v14 = vrot.slane %v3437_v49, %v6914_v46 }
 0x327   :  { %v3428_v56 = vpop.permute.xlu1 %3427  ;;  %v7979_v18 = vrot.slane %v4140_v59, %v6994_v60  ;;  %v8060_v29 = vrot.slane %v3146_v11, %v6914_v46 }
 0x328   :  { %9758 = vst [vmem:[#allocation37_spill] sm:$0xff] %v7924_v32  ;;  %v6086_v0 = vcombine.low %v7924_v32, %v7924_v32  ;;  %v3444_v38 = vshrl.u32 %v3428_v56, 16  ;;  %v7940_v6 = vrot.slane %v3440_v23, %v6914_v46  ;;  %v7967_v63 = vrot.slane %v4068_v30, %v6914_v46  ;;  %v8047_v32 = vld [vmem:[#allocation3 + $0x44] sm:$0x1] }
 0x329   :  { %v6146_v22 = vcombine.low %v7979_v18, %v7979_v18 }
 0x32a   :  { %3027 = vrot.lane.b32.xlu0 %v6086_v0, %s6527_s22  ;;  %v4106_v23 = vcombine.low %v7967_v63, %v7970_v47  ;;  %v4107_v12 = vcombine.high %v7967_v63, %v7970_v47 }
 0x32b   :  { %v3432_v58 = vpop.permute.xlu1 %3431 }
 0x32c   :  { %v3445_v50 = vshrl.u32 %v3432_v58, 16  ;;  %v3443_v55 = vpack.i.b16 %v3432_v58, %v3428_v56  ;;  %v8005_v24 = vrot.slane %v4106_v23, %v6994_v60  ;;  %v9762_v23 = vld [vmem:[#allocation17_spill] sm:$0xff]  ;;  %v8186_v47 = vrot.slane %v4107_v12, %v6994_v60 }
 0x32e   :  { %v3446_v61 = vpack.i.b16 %v3445_v50, %v3444_v38  ;;  %3421 = vrot.lane.b32.xlu0 %v7777_v48, %s6520_s5  ;;  %v7950_v45 = vrot.slane %v3443_v55, %v6914_v46  ;;  %9760 = vst [vmem:[#allocation39_spill] sm:$0xff] %v8005_v24 }
 0x32f   :  { %v7937_v44 = vpop.permute.xlu1 %3703 }
 0x330   :  { %v7943_v16 = vrot.slane %v3446_v61, %v6914_v46  ;;  %v3475_v3 = vcombine.low %v7961_v14, %v7950_v45  ;;  %v3722_v53 = vshrl.u32 %v7937_v44, 16 }
 0x332   :  { %v3509_v2 = vcombine.low %v7940_v6, %v7943_v16  ;;  %3425 = vrot.lane.b32.xlu0 %v7787_v8, %s6520_s5  ;;  %v7991_v58 = vrot.slane %v3475_v3, %v6994_v60 }
 0x333   :  { %v7958_v41 = vpop.permute.xlu1 %3707 }
 0x334   :  { %v7964_v19 = vrot.slane %v3509_v2, %v6994_v60  ;;  %v3723_v4 = vshrl.u32 %v7958_v41, 16  ;;  %9759 = vst [vmem:[#allocation38_spill] sm:$0xff] %v7991_v58  ;;  %v6354_v30 = vcombine.high %v7991_v58, %v7991_v58 }
 0x336   :  { %3429 = vrot.lane.b32.xlu0 %v7802_v25, %s6520_s5  ;;  %v6116_v56 = vcombine.low %v7964_v19, %v7964_v19  ;;  %v3724_v50 = vpack.i.b16 %v3723_v4, %v3722_v53 }
 0x337   :  { %v7981_v0 = vpop.permute.xlu1 %3711 }
 0x338   :  { %3598 = vrot.lane.b32.xlu1 %v6116_v56, %s6527_s22  ;;  %v3728_v55 = vshrl.u32 %v7981_v0, 16  ;;  %v8010_v59 = vrot.slane %v3724_v50, %v6914_v46  ;;  %v9761_v56 = vshrl.u32 %v7101_v34, 16  ;;  %v9763_v50 = vld [vmem:[#allocation18_spill] sm:$0xff] }
 0x33a   :  { %3433 = vrot.lane.b32.xlu0 %v7816_v40, %s6520_s5  ;;  %v3998_v4 = vrot.slane %v9761_v56, 4  ;;  %v9765_v56 = vld [vmem:[#allocation16_spill] sm:$0xff] }
 0x33b   :  { %v7995_v38 = vpop.permute.xlu1 %3715  ;;  %v9766_v52 = vshrl.u32 %v9765_v56, 16 }
 0x33c   :  { %v3729_v61 = vshrl.u32 %v7995_v38, 16  ;;  %4229 = vrot.lane.b32.xlu1 %v6146_v22, %s6527_s22  ;;  %v6370_v22 = vcombine.high %v8005_v24, %v8005_v24  ;;  %v3999_v53 = vor.u32 %v3998_v4, %v7785_v51  ;;  %v4022_v4 = vshll.u32 %v8047_v32, 16 }
 0x33d   :  { %v4018_v36 = vrot.slane %v9766_v52, 4  ;;  %v3152_v52 = vpack.i.b16 %v7765_v9, %v7761_v57  ;;  %v6355_v9 = vcombine.high %v7964_v19, %v7964_v19 }
 0x33e   :  { %v3730_v49 = vpack.i.b16 %v3729_v61, %v3728_v55  ;;  %3705 = vrot.lane.b32.xlu0 %v7777_v48, %s6521_s18  ;;  %v9764_v55 = vcombine.low %v9762_v23, %v9763_v50  ;;  %v4000_v24 = vrot.slane %v3999_v53, 4  ;;  %v4024_v1 = vrot.slane %v4022_v4, 5 }
 0x33f   :  { %v8007_v2 = vpop.permute.xlu1 %4617  ;;  %v4019_v42 = vor.u32 %v4018_v36, %v7800_v54  ;;  %v8071_v54 = vrot.slane %v3152_v52, %v6914_v46  ;;  %v4042_v52 = vshll.u32 %v8078_v13, 16  ;;  %v9770_v4 = vshrl.u32 %v9769_v37, 16 }
 0x340   :  { %v8013_v3 = vrot.slane %v3730_v49, %v6914_v46  ;;  %3603 = vrot.lane.b32.xlu1 %v6354_v30, %s6524_s19  ;;  %v8028_v61 = vrot.slane %v9764_v55, %v6994_v60  ;;  %v8033_v30 = vld [vmem:[#allocation3 + $0x38] sm:$0x1]  ;;  %v4636_v57 = vshrl.u32 %v8007_v2, 16 }
 0x341   :  { %v4002_v7 = vshll.u32 %v8033_v30, 16  ;;  %v4020_v39 = vrot.slane %v4019_v42, 4 }
 0x342   :  { %3709 = vrot.lane.b32.xlu0 %v7787_v8, %s6521_s18  ;;  %v3793_v55 = vcombine.low %v8010_v59, %v8013_v3 }
 0x343   :  { %v8030_v49 = vpop.permute.xlu1 %4621  ;;  %v4004_v58 = vrot.slane %v4002_v7, 5 }
 0x344   :  { %4234 = vrot.lane.b32.xlu1 %v6370_v22, %s6524_s19  ;;  %v6101_v22 = vcombine.low %v8028_v61, %v8028_v61  ;;  %v4637_v33 = vshrl.u32 %v8030_v49, 16 }
 0x345   :  { %v8082_v19 = vsel %vm6857_vm15, %v4000_v24, %v4004_v58  ;;  %v3184_v58 = vcombine.low %v8060_v29, %v8071_v54 }
 0x346   :  { %3713 = vrot.lane.b32.xlu0 %v7802_v25, %s6521_s18  ;;  %v4638_v7 = vpack.i.b16 %v4637_v33, %v4636_v57  ;;  %v4058_v33 = vrot.slane %v9770_v4, 4  ;;  %v3727_v57 = vpack.i.b16 %v7995_v38, %v7981_v0  ;;  %v4044_v4 = vrot.slane %v4042_v52, 5 }
 0x347   :  { %v8051_v51 = vpop.permute.xlu1 %4625 }
 0x348   :  { %3307 = vrot.lane.b32.xlu1 %v6101_v22, %s6527_s22  ;;  %v8068_v22 = vrot.slane %v3793_v55, %v6994_v60  ;;  %v4642_v11 = vshrl.u32 %v8051_v51, 16  ;;  %v4039_v55 = vor.u32 %v4038_v62, %v7809_v27  ;;  %v6371_v27 = vcombine.high %v7979_v18, %v7979_v18 }
 0x349   :  { %v3721_v62 = vpack.i.b16 %v7958_v41, %v7937_v44  ;;  %v8103_v0 = vrot.slane %v4638_v7, %v6914_v46  ;;  %v4059_v18 = vor.u32 %v4058_v33, %v7826_v43  ;;  %v3476_v41 = vcombine.high %v7961_v14, %v7950_v45 }
 0x34a   :  { %3717 = vrot.lane.b32.xlu0 %v7816_v40, %s6521_s18  ;;  %v6131_v42 = vcombine.low %v8068_v22, %v8068_v22  ;;  %v9775_v7 = vrot.slane %v9765_v56, 5 }
 0x34b   :  { %v8073_v36 = vpop.permute.xlu1 %4629  ;;  %v8132_v43 = vrot.slane %v3721_v62, %v6914_v46  ;;  %v4060_v14 = vrot.slane %v4059_v18, 4  ;;  %v9772_v62 = vrot.slane %v7101_v34, 5 }
 0x34c   :  { %v4643_v53 = vshrl.u32 %v8073_v36, 16  ;;  %3608 = vrot.lane.b32.xlu1 %v6355_v9, %s6528_s23  ;;  %v8111_v9 = vsel %vm6857_vm15, %v4020_v39, %v4024_v1  ;;  %v8127_v39 = vrot.slane %v3184_v58, %v6994_v60 }
 0x34e   :  { %v4644_v15 = vpack.i.b16 %v4643_v53, %v4642_v11  ;;  %4619 = vrot.lane.b32.xlu0 %v8082_v19, %s6521_s18  ;;  %v8113_v11 = vld [vmem:[#allocation3 + $0x5c] sm:$0x1]  ;;  %v4040_v53 = vrot.slane %v4039_v55, 4  ;;  %9771 = vst [vmem:[#allocation17_spill] sm:$0xff] %v8127_v39  ;;  %v6346_v33 = vcombine.high %v8127_v39, %v8127_v39  ;;  %v4917_v39 = vrot.slane %v8047_v32, 5 }
 0x34f   :  { %v8096_v24 = vpop.permute.xlu1 %5200  ;;  %v4062_v44 = vshll.u32 %v8113_v11, 16 }
 0x350   :  { %v8106_v38 = vrot.slane %v4644_v15, %v6914_v46  ;;  %3882 = vrot.lane.b32.xlu1 %v6131_v42, %s6527_s22  ;;  %v8120_v15 = vrot.slane %v3727_v57, %v6914_v46  ;;  %v8137_v45 = vsel %vm6857_vm15, %v4040_v53, %v4044_v4  ;;  %v8146_v57 = vrot.slane %v3476_v41, %v6994_v60 }
 0x351   :  { %v4064_v55 = vrot.slane %v4062_v44, 5  ;;  %v4909_v53 = vrot.slane %v9772_v62, 4  ;;  %v4910_v4 = vrot.slane %v8033_v30, 5  ;;  %v5219_v18 = vshrl.u32 %v8096_v24, 16 }
 0x352   :  { %4623 = vrot.lane.b32.xlu0 %v8111_v9, %s6521_s18  ;;  %v3759_v52 = vcombine.low %v8132_v43, %v8120_v15  ;;  %v6119_v44 = vcombine.low %v8146_v57, %v8146_v57 }
 0x353   :  { %v8129_v1 = vpop.permute.xlu1 %5204  ;;  %v8176_v62 = vsel %vm6751_vm12, %v4909_v53, %v4910_v4 }
 0x354   :  { %4239 = vrot.lane.b32.xlu1 %v6371_v27, %s6528_s23  ;;  %v5220_v58 = vshrl.u32 %v8129_v1, 16  ;;  %v8154_v27 = vsel %vm6857_vm15, %v4060_v14, %v4064_v55  ;;  %v8165_v41 = vrot.slane %v3759_v52, %v6994_v60  ;;  %v4916_v52 = vrot.slane %v9775_v7, 4 }
 0x355   :  { %v9776_v7 = vrot.slane %v9767_v21, 5 }
 0x356   :  { %4627 = vrot.lane.b32.xlu0 %v8137_v45, %s6521_s18  ;;  %9773 = vst [vmem:[#allocation18_spill] sm:$0xff] %v8165_v41  ;;  %v5221_v34 = vpack.i.b16 %v5220_v58, %v5219_v18  ;;  %v6362_v63 = vcombine.high %v8165_v41, %v8165_v41  ;;  %v8199_v32 = vsel %vm6751_vm12, %v4916_v52, %v4917_v39  ;;  %v4924_v18 = vrot.slane %v8078_v13, 5 }
 0x357   :  { %v8148_v42 = vpop.permute.xlu1 %5208  ;;  %v4923_v4 = vrot.slane %v9776_v7, 4  ;;  %v9777_v13 = vrot.slane %v9769_v37, 5  ;;  %v6347_v39 = vcombine.high %v8028_v61, %v8028_v61 }
 0x358   :  { %3312 = vrot.lane.b32.xlu1 %v6346_v33, %s6524_s19  ;;  %v5225_v55 = vshrl.u32 %v8148_v42, 16  ;;  %v8191_v53 = vrot.slane %v5221_v34, %v6914_v46 }
 0x359   :  { %v8217_v21 = vsel %vm6751_vm12, %v4923_v4, %v4924_v18 }
 0x35a   :  { %4631 = vrot.lane.b32.xlu0 %v8154_v27, %s6521_s18 }
 0x35b   :  { %v8169_v14 = vpop.permute.xlu1 %5212 }
 0x35c   :  { %v5226_v30 = vshrl.u32 %v8169_v14, 16  ;;  %3613 = vrot.lane.b32.xlu1 %v6119_v44, %s6525_s20  ;;  %v3510_v44 = vcombine.high %v7940_v6, %v7943_v16  ;;  %v4930_v6 = vrot.slane %v9777_v13, 4  ;;  %v4931_v16 = vrot.slane %v8113_v11, 5 }
 0x35d   :  { %v6363_v13 = vcombine.high %v8068_v22, %v8068_v22 }
 0x35e   :  { %v5227_v17 = vpack.i.b16 %v5226_v30, %v5225_v55  ;;  %5202 = vrot.lane.b32.xlu0 %v8176_v62, %s6520_s5  ;;  %v8227_v55 = vrot.slane %v3510_v44, %v6994_v60  ;;  %v8235_v37 = vsel %vm6751_vm12, %v4930_v6, %v4931_v16  ;;  %v4707_v44 = vcombine.low %v8103_v0, %v8106_v38 }
 0x35f   :  { %v8188_v58 = vpop.permute.xlu1 %4334 }
 0x360   :  { %v8194_v56 = vrot.slane %v5227_v17, %v6914_v46  ;;  %3887 = vrot.lane.b32.xlu1 %v6362_v63, %s6524_s19  ;;  %v6149_v17 = vcombine.low %v8186_v47, %v8186_v47  ;;  %v4353_v11 = vshrl.u32 %v8188_v58, 16  ;;  %v6120_v61 = vcombine.low %v8227_v55, %v8227_v55 }
 0x361   :  { %v4141_v63 = vcombine.high %v7930_v35, %v7933_v10 }
 0x362   :  { %5206 = vrot.lane.b32.xlu0 %v8199_v32, %s6520_s5  ;;  %v5290_v16 = vcombine.low %v8191_v53, %v8194_v56 }
 0x363   :  { %v8212_v34 = vpop.permute.xlu1 %4338  ;;  %v8256_v35 = vrot.slane %v4141_v63, %v6994_v60  ;;  %v3185_v63 = vcombine.high %v8060_v29, %v8071_v54  ;;  %v4635_v54 = vpack.i.b16 %v8030_v49, %v8007_v2  ;;  %v5218_v2 = vpack.i.b16 %v8129_v1, %v8096_v24 }
 0x364   :  { %4244 = vrot.lane.b32.xlu1 %v6149_v17, %s6525_s20  ;;  %v4354_v52 = vshrl.u32 %v8212_v34, 16  ;;  %v6372_v1 = vcombine.high %v8186_v47, %v8186_v47  ;;  %v9780_v47 = vcombine.high %v9762_v23, %v9763_v50  ;;  %v9783_v23 = vcombine.high %v8010_v59, %v8013_v3 }
 0x365   :  { %v6150_v22 = vcombine.low %v8256_v35, %v8256_v35  ;;  %v6373_v59 = vcombine.high %v8256_v35, %v8256_v35  ;;  %v4087_v35 = vshrl.u32 %v8137_v45, 16 }
 0x366   :  { %5210 = vrot.lane.b32.xlu0 %v8217_v21, %s6520_s5  ;;  %v4355_v4 = vpack.i.b16 %v4354_v52, %v4353_v11  ;;  %v8274_v52 = vrot.slane %v4707_v44, %v6994_v60  ;;  %v4641_v44 = vpack.i.b16 %v8073_v36, %v8051_v51  ;;  %v6356_v51 = vcombine.high %v8146_v57, %v8146_v57 }
 0x367   :  { %v8229_v30 = vpop.permute.xlu1 %4342  ;;  %v8375_v50 = vrot.slane %v9783_v23, %v6994_v60 }
 0x368   :  { %3317 = vrot.lane.b32.xlu1 %v6347_v39, %s6528_s23  ;;  %v4359_v18 = vshrl.u32 %v8229_v30, 16  ;;  %v8259_v10 = vrot.slane %v4355_v4, %v6914_v46  ;;  %v6176_v11 = vcombine.low %v8274_v52, %v8274_v52 }
 0x36a   :  { %5214 = vrot.lane.b32.xlu0 %v8235_v37, %s6520_s5  ;;  %9778 = vst [vmem:[#allocation16_spill] sm:$0xff] %v8259_v10 }
 0x36b   :  { %v8244_v7 = vpop.permute.xlu1 %4346 }
 0x36c   :  { %v4360_v33 = vshrl.u32 %v8244_v7, 16  ;;  %3618 = vrot.lane.b32.xlu1 %v6120_v61, %s6529_s24  ;;  %v8282_v61 = vrot.slane %v5290_v16, %v6994_v60 }
 0x36e   :  { %v4361_v17 = vpack.i.b16 %v4360_v33, %v4359_v18  ;;  %4336 = vrot.lane.b32.xlu0 %v8082_v19, %s6520_s5  ;;  %v6210_v4 = vcombine.low %v8282_v61, %v8282_v61  ;;  %v8292_v18 = vrot.slane %v3185_v63, %v6994_v60  ;;  %v3760_v33 = vcombine.high %v8132_v43, %v8120_v15 }
 0x36f   :  { %v5224_v15 = vpack.i.b16 %v8169_v14, %v8148_v42  ;;  %v8319_v43 = vrot.slane %v4635_v54, %v6914_v46  ;;  %v8334_v14 = vrot.slane %v5218_v2, %v6914_v46  ;;  %v8359_v63 = vrot.slane %v9780_v47, %v6994_v60 }
 0x370   :  { %v8262_v6 = vrot.slane %v4361_v17, %v6914_v46  ;;  %3892 = vrot.lane.b32.xlu1 %v6363_v13, %s6528_s23  ;;  %v6104_v29 = vcombine.low %v8292_v18, %v8292_v18  ;;  %v8307_v17 = vrot.slane %v4641_v44, %v6914_v46  ;;  %v8316_v36 = vrot.slane %v3760_v33, %v6994_v60 }
 0x371   :  { %v8327_v42 = vrot.slane %v5224_v15, %v6914_v46  ;;  %v6105_v33 = vcombine.low %v8359_v63, %v8359_v63  ;;  %v4081_v47 = vshrl.u32 %v8082_v19, 16 }
 0x372   :  { %9779 = vst [vmem:[#allocation19_spill] sm:$0xff] %v8262_v6  ;;  %4340 = vrot.lane.b32.xlu0 %v8111_v9, %s6520_s5  ;;  %v4673_v49 = vcombine.low %v8319_v43, %v8307_v17  ;;  %v6134_v57 = vcombine.low %v8316_v36, %v8316_v36  ;;  %v4424_v15 = vcombine.low %v8259_v10, %v8262_v6 }
 0x373   :  { %v5256_v24 = vcombine.low %v8334_v14, %v8327_v42 }
 0x374   :  { %4249 = vrot.lane.b32.xlu1 %v6150_v22, %s6529_s24  ;;  %v8344_v13 = vrot.slane %v4673_v49, %v6994_v60  ;;  %v8390_v3 = vrot.slane %v4424_v15, %v6994_v60 }
 0x375   :  { %v8350_v22 = vrot.slane %v5256_v24, %v6994_v60 }
 0x376   :  { %4344 = vrot.lane.b32.xlu0 %v8137_v45, %s6520_s5  ;;  %v6386_v16 = vcombine.high %v8344_v13, %v8344_v13  ;;  %v6161_v24 = vcombine.low %v8390_v3, %v8390_v3 }
 0x378   :  { %4796 = vrot.lane.b32.xlu1 %v6176_v11, %s6527_s22  ;;  %v6402_v11 = vcombine.high %v8350_v22, %v8350_v22 }
 0x37a   :  { %4348 = vrot.lane.b32.xlu0 %v8154_v27, %s6520_s5 }
 0x37c   :  { %5379 = vrot.lane.b32.xlu1 %v6210_v4, %s6527_s22  ;;  %v8361_v4 = vpop.permute.xlu1 %5484 }
 0x37d   :  { %9781 = vst [vmem:[#allocation20_spill] sm:$0xff] %v8361_v4 }
 0x37e   :  { %5486 = vrot.lane.b32.xlu0 %v8176_v62, %s6521_s18 }
 0x380   :  { %3322 = vrot.lane.b32.xlu1 %v6104_v29, %s6525_s20  ;;  %v8367_v44 = vpop.permute.xlu1 %5488  ;;  %v6357_v29 = vcombine.high %v8227_v55, %v8227_v55 }
 0x381   :  { %9782 = vst [vmem:[#allocation15_spill] sm:$0xff] %v8367_v44 }
 0x382   :  { %5490 = vrot.lane.b32.xlu0 %v8199_v32, %s6521_s18 }
 0x384   :  { %3623 = vrot.lane.b32.xlu1 %v6356_v51, %s6526_s21  ;;  %v6135_v51 = vcombine.low %v8375_v50, %v8375_v50  ;;  %v8384_v2 = vpop.permute.xlu1 %5492 }
 0x385   :  { %9785 = vst [vmem:[#allocation41_spill] sm:$0xff] %v8384_v2 }
 0x386   :  { %5494 = vrot.lane.b32.xlu0 %v8217_v21, %s6521_s18 }
 0x388   :  { %3897 = vrot.lane.b32.xlu1 %v6134_v57, %s6525_s20  ;;  %v8393_v57 = vpop.permute.xlu1 %5496 }
 0x389   :  { %9786 = vst [vmem:[#allocation42_spill] sm:$0xff] %v8393_v57  ;;  %v9825_v57 = vld [vmem:[#allocation31_spill] sm:$0xff] }
 0x38a   :  { %5498 = vrot.lane.b32.xlu0 %v8235_v37, %s6521_s18 }
 0x38c   :  { %4254 = vrot.lane.b32.xlu1 %v6372_v1, %s6526_s21  ;;  %v9787_v1 = vld [vmem:[#allocation24_spill] sm:$0xff] }
 0x390   :  { %4801 = vrot.lane.b32.xlu1 %v6386_v16, %s6524_s19  ;;  %v9788_v16 = vld [vmem:[#allocation23_spill] sm:$0xff] }
 0x394   :  { %5384 = vrot.lane.b32.xlu1 %v6402_v11, %s6524_s19  ;;  %v5007_v11 = vcombine.low %v9788_v16, %v9787_v1 }
 0x396   :  { %v8409_v39 = vrot.slane %v5007_v11, %v6994_v60 }
 0x398   :  { %3327 = vrot.lane.b32.xlu1 %v6105_v33, %s6529_s24  ;;  %v4082_v33 = vshrl.u32 %v8111_v9, 16 }
 0x39a   :  { %v4083_v12 = vpack.i.b16 %v4082_v33, %v4081_v47 }
 0x39c   :  { %v8377_v54 = vpop.permute.xlu0 %3027  ;;  %3628 = vrot.lane.b32.xlu1 %v6357_v29, %s6530_s25  ;;  %v4088_v29 = vshrl.u32 %v8154_v27, 16  ;;  %v8419_v11 = vrot.slane %v4083_v12, %v6914_v46  ;;  %v4080_v12 = vpack.i.b16 %v8111_v9, %v8082_v19 }
 0x39d   :  { %9784 = vst [vmem:[#allocation40_spill] sm:$0xff] %v8377_v54 }
 0x39e   :  { %v4089_v54 = vpack.i.b16 %v4088_v29, %v4087_v35 }
 0x3a0   :  { %v3422_v49 = vpop.permute.xlu0 %3421  ;;  %3902 = vrot.lane.b32.xlu1 %v6135_v51, %s6529_s24  ;;  %v8422_v47 = vrot.slane %v4089_v54, %v6914_v46 }
 0x3a1   :  { %v3450_v41 = vshrl.u32 %v3422_v49, 16 }
 0x3a2   :  { %v4208_v19 = vcombine.low %v8419_v11, %v8422_v47 }
 0x3a4   :  { %v3426_v55 = vpop.permute.xlu0 %3425  ;;  %4259 = vrot.lane.b32.xlu1 %v6373_v59, %s6530_s25  ;;  %v6387_v59 = vcombine.high %v8274_v52, %v8274_v52  ;;  %v6195_v52 = vcombine.low %v8409_v39, %v8409_v39 }
 0x3a5   :  { %v3451_v15 = vshrl.u32 %v3426_v55, 16 }
 0x3a7   :  { %v3452_v16 = vpack.i.b16 %v3451_v15, %v3450_v41  ;;  %v4352_v41 = vpack.i.b16 %v8212_v34, %v8188_v58  ;;  %v6403_v58 = vcombine.high %v8282_v61, %v8282_v61  ;;  %v4086_v34 = vpack.i.b16 %v8154_v27, %v8137_v45 }
 0x3a8   :  { %v3430_v23 = vpop.permute.xlu0 %3429  ;;  %4513 = vrot.lane.b32.xlu1 %v6161_v24, %s6527_s22  ;;  %v4358_v24 = vpack.i.b16 %v8244_v7, %v8229_v30  ;;  %v3449_v30 = vpack.i.b16 %v3426_v55, %v3422_v49  ;;  %v4935_v61 = vpack.i.b16 %v7186_v26, %v7180_v31  ;;  %v6348_v31 = vcombine.high %v8292_v18, %v8292_v18 }
 0x3a9   :  { %v3456_v4 = vshrl.u32 %v3430_v23, 16  ;;  %v8430_v7 = vrot.slane %v3452_v16, %v6914_v46  ;;  %v8454_v9 = vrot.slane %v4352_v41, %v6914_v46  ;;  %v8470_v16 = vrot.slane %v4080_v12, %v6914_v46 }
 0x3aa   :  { %v8404_v51 = vpop.permute.xlu1 %3598  ;;  %v8438_v54 = vrot.slane %v4358_v24, %v6914_v46  ;;  %v8462_v45 = vrot.slane %v3449_v30, %v6914_v46  ;;  %v8479_v26 = vrot.slane %v4086_v34, %v6914_v46  ;;  %v4674_v41 = vcombine.high %v8319_v43, %v8307_v17 }
 0x3ab   :  { %9789 = vst [vmem:[#allocation43_spill] sm:$0xff] %v8404_v51  ;;  %v6364_v12 = vcombine.high %v8316_v36, %v8316_v36 }
 0x3ac   :  { %v3434_v1 = vpop.permute.xlu0 %3433  ;;  %4806 = vrot.lane.b32.xlu1 %v6387_v59, %s6528_s23 }
 0x3ad   :  { %v3457_v2 = vshrl.u32 %v3434_v1, 16  ;;  %v3455_v33 = vpack.i.b16 %v3434_v1, %v3430_v23  ;;  %v4941_v1 = vpack.i.b16 %v7198_v20, %v7192_v5  ;;  %v4390_v23 = vcombine.low %v8454_v9, %v8438_v54 }
 0x3ae   :  { %v8414_v44 = vpop.permute.xlu1 %4229  ;;  %v8486_v20 = vrot.slane %v4208_v19, %v6994_v60 }
 0x3af   :  { %9790 = vst [vmem:[#allocation44_spill] sm:$0xff] %v8414_v44  ;;  %v3458_v35 = vpack.i.b16 %v3457_v2, %v3456_v4  ;;  %v8447_v2 = vrot.slane %v3455_v33, %v6914_v46  ;;  %v8492_v33 = vrot.slane %v4935_v61, %v6914_v46  ;;  %v4174_v61 = vcombine.low %v8470_v16, %v8479_v26 }
 0x3b0   :  { %v8426_v29 = vpop.permute.xlu0 %3705  ;;  %5096 = vrot.lane.b32.xlu1 %v6195_v52, %s6527_s22 }
 0x3b1   :  { %v8433_v15 = vrot.slane %v3458_v35, %v6914_v46  ;;  %v3543_v24 = vcombine.low %v8462_v45, %v8447_v2  ;;  %v8497_v35 = vrot.slane %v4941_v1, %v6914_v46  ;;  %v3734_v34 = vshrl.u32 %v8426_v29, 16 }
 0x3b2   :  { %v8440_v4 = vpop.permute.xlu1 %3603 }
 0x3b3   :  { %9791 = vst [vmem:[#allocation45_spill] sm:$0xff] %v8440_v4  ;;  %v3577_v49 = vcombine.low %v8430_v7, %v8433_v15  ;;  %v8512_v19 = vrot.slane %v3543_v24, %v6994_v60  ;;  %v8524_v24 = vrot.slane %v4674_v41, %v6994_v60 }
 0x3b4   :  { %v8456_v55 = vpop.permute.xlu0 %3709  ;;  %5389 = vrot.lane.b32.xlu1 %v6403_v58, %s6528_s23  ;;  %v8506_v58 = vrot.slane %v4390_v23, %v6994_v60 }
 0x3b5   :  { %v8465_v27 = vrot.slane %v3577_v49, %v6994_v60  ;;  %v3735_v18 = vshrl.u32 %v8456_v55, 16  ;;  %v6153_v49 = vcombine.low %v8486_v20, %v8486_v20  ;;  %9794 = vst [vmem:[#allocation48_spill] sm:$0xff] %v8512_v19 }
 0x3b6   :  { %v8474_v59 = vpop.permute.xlu1 %4234 }
 0x3b7   :  { %9792 = vst [vmem:[#allocation46_spill] sm:$0xff] %v8474_v59  ;;  %v6123_v5 = vcombine.low %v8465_v27, %v8465_v27  ;;  %v3736_v43 = vpack.i.b16 %v3735_v18, %v3734_v34  ;;  %v6358_v18 = vcombine.high %v8512_v19, %v8512_v19  ;;  %v6359_v4 = vcombine.high %v8465_v27, %v8465_v27 }
 0x3b8   :  { %v8488_v52 = vpop.permute.xlu0 %3713  ;;  %3332 = vrot.lane.b32.xlu1 %v6348_v31, %s6526_s21  ;;  %v6378_v31 = vcombine.high %v8506_v58, %v8506_v58  ;;  %v6349_v27 = vcombine.high %v8359_v63, %v8359_v63  ;;  %v6365_v63 = vcombine.high %v8375_v50, %v8375_v50 }
 0x3b9   :  { %3633 = vrot.lane.b32.xlu0 %v6123_v5, %s6527_s22  ;;  %v3740_v36 = vshrl.u32 %v8488_v52, 16  ;;  %v4973_v5 = vcombine.low %v8492_v33, %v8497_v35 }
 0x3ba   :  { %v8501_v30 = vpop.permute.xlu1 %3307 }
 0x3bb   :  { %9793 = vst [vmem:[#allocation47_spill] sm:$0xff] %v8501_v30  ;;  %v8550_v59 = vrot.slane %v4973_v5, %v6994_v60 }
 0x3bc   :  { %v3718_v17 = vpop.permute.xlu0 %3717  ;;  %3907 = vrot.lane.b32.xlu1 %v6364_v12, %s6526_s21  ;;  %v8531_v12 = vrot.slane %v4174_v61, %v6994_v60  ;;  %v6179_v61 = vcombine.low %v8524_v24, %v8524_v24 }
 0x3bd   :  { %v3741_v1 = vshrl.u32 %v3718_v17, 16  ;;  %4264 = vrot.lane.b32.xlu0 %v6153_v49, %s6527_s22  ;;  %v8537_v49 = vrot.slane %v3736_v43, %v6914_v46  ;;  %9798 = vst [vmem:[#allocation52_spill] sm:$0xff] %v8550_v59  ;;  %v6394_v5 = vcombine.high %v8550_v59, %v8550_v59 }
 0x3be   :  { %v8519_v23 = vpop.permute.xlu1 %3608  ;;  %9796 = vst [vmem:[#allocation50_spill] sm:$0xff] %v8531_v12 }
 0x3bf   :  { %9795 = vst [vmem:[#allocation49_spill] sm:$0xff] %v8519_v23  ;;  %v3742_v30 = vpack.i.b16 %v3741_v1, %v3740_v36  ;;  %v5257_v36 = vcombine.high %v8334_v14, %v8327_v42 }
 0x3c0   :  { %v8533_v34 = vpop.permute.xlu0 %4619  ;;  %4518 = vrot.lane.b32.xlu1 %v6378_v31, %s6524_s19  ;;  %v9799_v31 = vld [vmem:[#allocation21_spill] sm:$0xff] }
 0x3c1   :  { %v8540_v41 = vrot.slane %v3742_v30, %v6914_v46  ;;  %3638 = vrot.lane.b32.xlu0 %v6358_v18, %s6524_s19  ;;  %v6374_v30 = vcombine.high %v8531_v12, %v8531_v12  ;;  %v9800_v18 = vld [vmem:[#allocation22_spill] sm:$0xff]  ;;  %v8571_v43 = vrot.slane %v5257_v36, %v6994_v60  ;;  %v3158_v12 = vpack.i.b16 %v7787_v8, %v7777_v48 }
 0x3c2   :  { %v8545_v1 = vpop.permute.xlu1 %3882  ;;  %v9801_v44 = vcombine.low %v9799_v31, %v9800_v18 }
 0x3c3   :  { %9797 = vst [vmem:[#allocation51_spill] sm:$0xff] %v8545_v1  ;;  %v3861_v1 = vcombine.low %v8537_v49, %v8540_v41  ;;  %v8595_v48 = vrot.slane %v3158_v12, %v6914_v46 }
 0x3c4   :  { %v8560_v23 = vrot.slane %v9801_v44, %v6994_v60  ;;  %v8562_v42 = vpop.permute.xlu0 %4623  ;;  %4811 = vrot.lane.b32.xlu1 %v6179_v61, %s6525_s20  ;;  %v3164_v61 = vpack.i.b16 %v7816_v40, %v7802_v25 }
 0x3c5   :  { %4269 = vrot.lane.b32.xlu0 %v6374_v30, %s6524_s19  ;;  %v8592_v19 = vrot.slane %v3861_v1, %v6994_v60  ;;  %v3739_v1 = vpack.i.b16 %v3718_v17, %v8488_v52  ;;  %v3544_v52 = vcombine.high %v8462_v45, %v8447_v2  ;;  %v6379_v2 = vcombine.high %v8390_v3, %v8390_v3 }
 0x3c6   :  { %v8566_v14 = vpop.permute.xlu1 %4239  ;;  %v6108_v44 = vcombine.low %v8560_v23, %v8560_v23  ;;  %v8598_v8 = vrot.slane %v3164_v61, %v6914_v46  ;;  %v6375_v61 = vcombine.high %v8486_v20, %v8486_v20  ;;  %v9808_v45 = vcombine.high %v8103_v0, %v8106_v38 }
 0x3c7   :  { %9802 = vst [vmem:[#allocation21_spill] sm:$0xff] %v8566_v14  ;;  %v6213_v14 = vcombine.low %v8571_v43, %v8571_v43  ;;  %v6138_v12 = vcombine.low %v8592_v19, %v8592_v19  ;;  %v8626_v17 = vrot.slane %v3739_v1, %v6914_v46 }
 0x3c8   :  { %v8581_v30 = vpop.permute.xlu0 %4627  ;;  %5101 = vrot.lane.b32.xlu1 %v6394_v5, %s6524_s19  ;;  %v3252_v5 = vcombine.low %v8595_v48, %v8598_v8  ;;  %v8648_v20 = vrot.slane %v9808_v45, %v6994_v60 }
 0x3c9   :  { %3342 = vrot.lane.b32.xlu0 %v6108_v44, %s6527_s22 }
 0x3ca   :  { %v8585_v36 = vpop.permute.xlu1 %3312  ;;  %9809 = vst [vmem:[#allocation57_spill] sm:$0xff] %v8648_v20  ;;  %v6180_v0 = vcombine.low %v8648_v20, %v8648_v20 }
 0x3cb   :  { %9803 = vst [vmem:[#allocation22_spill] sm:$0xff] %v8585_v36 }
 0x3cc   :  { %v8600_v25 = vpop.permute.xlu0 %4631  ;;  %5394 = vrot.lane.b32.xlu1 %v6213_v14, %s6525_s20 }
 0x3cd   :  { %3643 = vrot.lane.b32.xlu0 %v6359_v4, %s6528_s23  ;;  %v3733_v4 = vpack.i.b16 %v8456_v55, %v8426_v29 }
 0x3ce   :  { %v8604_v40 = vpop.permute.xlu1 %3613 }
 0x3cf   :  { %9804 = vst [vmem:[#allocation53_spill] sm:$0xff] %v8604_v40  ;;  %v8637_v55 = vrot.slane %v3733_v4, %v6914_v46 }
 0x3d0   :  { %v8613_v44 = vpop.permute.xlu0 %5202  ;;  %3337 = vrot.lane.b32.xlu1 %v6349_v27, %s6530_s25  ;;  %v8631_v27 = vrot.slane %v3252_v5, %v6994_v60  ;;  %v8655_v5 = vrot.slane %v3544_v52, %v6994_v60  ;;  %v4175_v52 = vcombine.high %v8470_v16, %v8479_v26 }
 0x3d1   :  { %3917 = vrot.lane.b32.xlu0 %v6138_v12, %s6527_s22  ;;  %v3827_v1 = vcombine.low %v8637_v55, %v8626_v17 }
 0x3d2   :  { %v8619_v14 = vpop.permute.xlu1 %3887  ;;  %9806 = vst [vmem:[#allocation55_spill] sm:$0xff] %v8631_v27  ;;  %v6350_v12 = vcombine.high %v8631_v27, %v8631_v27  ;;  %v6126_v38 = vcombine.low %v8655_v5, %v8655_v5  ;;  %v8691_v26 = vrot.slane %v4175_v52, %v6994_v60  ;;  %v4649_v52 = vshrl.u32 %v8562_v42, 16 }
 0x3d3   :  { %9805 = vst [vmem:[#allocation54_spill] sm:$0xff] %v8619_v14  ;;  %v4948_v27 = vshrl.u32 %v8176_v62, 16 }
 0x3d4   :  { %v8633_v29 = vpop.permute.xlu0 %5206  ;;  %3912 = vrot.lane.b32.xlu1 %v6365_v63, %s6530_s25  ;;  %v8668_v63 = vrot.slane %v3827_v1, %v6994_v60  ;;  %v9813_v1 = vcombine.high %v8191_v53, %v8194_v56 }
 0x3d5   :  { %4274 = vrot.lane.b32.xlu0 %v6375_v61, %s6528_s23 }
 0x3d6   :  { %v8640_v50 = vpop.permute.xlu1 %4244  ;;  %9811 = vst [vmem:[#allocation59_spill] sm:$0xff] %v8668_v63  ;;  %v8686_v14 = vrot.slane %v9813_v1, %v6994_v60  ;;  %v6366_v16 = vcombine.high %v8668_v63, %v8668_v63 }
 0x3d7   :  { %9807 = vst [vmem:[#allocation56_spill] sm:$0xff] %v8640_v50 }
 0x3d8   :  { %v8657_v4 = vpop.permute.xlu0 %5210  ;;  %4523 = vrot.lane.b32.xlu1 %v6379_v2, %s6528_s23  ;;  %v4391_v2 = vcombine.high %v8454_v9, %v8438_v54  ;;  %9814 = vst [vmem:[#allocation61_spill] sm:$0xff] %v8686_v14  ;;  %v6214_v53 = vcombine.low %v8686_v14, %v8686_v14  ;;  %v4655_v9 = vshrl.u32 %v8600_v25, 16 }
 0x3d9   :  { %3347 = vrot.lane.b32.xlu0 %v6350_v12, %s6524_s19  ;;  %v6395_v12 = vcombine.high %v8409_v39, %v8409_v39  ;;  %v3578_v39 = vcombine.high %v8430_v7, %v8433_v15  ;;  %v4654_v7 = vshrl.u32 %v8581_v30, 16  ;;  %v4648_v15 = vshrl.u32 %v8533_v34, 16 }
 0x3da   :  { %v8661_v3 = vpop.permute.xlu1 %3317  ;;  %v8704_v56 = vrot.slane %v4391_v2, %v6994_v60 }
 0x3db   :  { %9810 = vst [vmem:[#allocation58_spill] sm:$0xff] %v8661_v3  ;;  %v4656_v63 = vpack.i.b16 %v4655_v9, %v4654_v7  ;;  %v6351_v3 = vcombine.high %v8560_v23, %v8560_v23 }
 0x3dc   :  { %v8672_v61 = vpop.permute.xlu0 %5214  ;;  %4816 = vrot.lane.b32.xlu1 %v6180_v0, %s6529_s24  ;;  %9816 = vst [vmem:[#allocation63_spill] sm:$0xff] %v8704_v56  ;;  %v6164_v2 = vcombine.low %v8704_v56, %v8704_v56  ;;  %v4949_v56 = vshrl.u32 %v8199_v32, 16 }
 0x3dd   :  { %3648 = vrot.lane.b32.xlu0 %v6126_v38, %s6525_s20  ;;  %v6156_v38 = vcombine.low %v8691_v26, %v8691_v26  ;;  %v4774_v7 = vrot.slane %v4656_v63, %v6914_v46 }
 0x3de   :  { %v8678_v45 = vpop.permute.xlu1 %3618 }
 0x3df   :  { %9812 = vst [vmem:[#allocation60_spill] sm:$0xff] %v8678_v45  ;;  %v4955_v45 = vshrl.u32 %v8235_v37, 16 }
 0x3e0   :  { %v8693_v0 = vpop.permute.xlu0 %4336  ;;  %5106 = vrot.lane.b32.xlu1 %v6395_v12, %s6528_s23 }
 0x3e1   :  { %3922 = vrot.lane.b32.xlu0 %v6366_v16, %s6524_s19  ;;  %v8721_v16 = vrot.slane %v3578_v39, %v6994_v60  ;;  %v5237_v39 = vshrl.u32 %v8657_v4, 16 }
 0x3e2   :  { %v8699_v54 = vpop.permute.xlu1 %3892 }
 0x3e3   :  { %9815 = vst [vmem:[#allocation62_spill] sm:$0xff] %v8699_v54  ;;  %v4974_v54 = vcombine.high %v8492_v33, %v8497_v35  ;;  %v6388_v35 = vcombine.high %v8524_v24, %v8524_v24  ;;  %v6127_v23 = vcombine.low %v8721_v16, %v8721_v16  ;;  %v4954_v24 = vshrl.u32 %v8217_v21, 16 }
 0x3e4   :  { %v8710_v12 = vpop.permute.xlu0 %4340  ;;  %5399 = vrot.lane.b32.xlu1 %v6214_v53, %s6529_s24  ;;  %v5238_v53 = vshrl.u32 %v8672_v61, 16 }
 0x3e5   :  { %4279 = vrot.lane.b32.xlu0 %v6156_v38, %s6525_s20  ;;  %v4650_v38 = vpack.i.b16 %v4649_v52, %v4648_v15  ;;  %v4366_v50 = vshrl.u32 %v8710_v12, 16  ;;  %v8743_v9 = vrot.slane %v4974_v54, %v6994_v60  ;;  %v4209_v52 = vcombine.high %v8419_v11, %v8422_v47 }
 0x3e6   :  { %v8716_v1 = vpop.permute.xlu1 %4249  ;;  %v5231_v15 = vshrl.u32 %v8613_v44, 16  ;;  %v4956_v6 = vpack.i.b16 %v4955_v45, %v4954_v24 }
 0x3e7   :  { %9817 = vst [vmem:[#allocation64_spill] sm:$0xff] %v8716_v1  ;;  %v5232_v1 = vshrl.u32 %v8633_v29, 16  ;;  %9818 = vst [vmem:[#allocation65_spill] sm:$0xff] %v8743_v9  ;;  %v4766_v40 = vrot.slane %v4650_v38, %v6914_v46  ;;  %v6198_v38 = vcombine.low %v8743_v9, %v8743_v9  ;;  %v8767_v20 = vrot.slane %v4209_v52, %v6994_v60 }
 0x3e8   :  { %v8728_v36 = vpop.permute.xlu0 %4344  ;;  %4528 = vrot.lane.b32.xlu1 %v6164_v2, %s6525_s20  ;;  %v5239_v2 = vpack.i.b16 %v5238_v53, %v5237_v39  ;;  %v9819_v39 = vld [vmem:[#allocation33_spill] sm:$0xff] }
 0x3e9   :  { %3352 = vrot.lane.b32.xlu0 %v6351_v3, %s6528_s23  ;;  %v4365_v3 = vshrl.u32 %v8693_v0, 16  ;;  %v5233_v11 = vpack.i.b16 %v5232_v1, %v5231_v15  ;;  %v4371_v63 = vshrl.u32 %v8728_v36, 16  ;;  %v3006_v51 = vcombine.low %v9819_v39, %v7905_v28  ;;  %v9826_v28 = vld [vmem:[#allocation25_spill] sm:$0xff]  ;;  %v9827_v39 = vld [vmem:[#allocation27_spill] sm:$0xff] }
 0x3ea   :  { %v8736_v33 = vpop.permute.xlu1 %4796  ;;  %v6367_v15 = vcombine.high %v8592_v19, %v8592_v19  ;;  %v6404_v19 = vcombine.high %v8571_v43, %v8571_v43  ;;  %v6157_v24 = vcombine.low %v8767_v20, %v8767_v20 }
 0x3eb   :  { %v4367_v47 = vpack.i.b16 %v4366_v50, %v4365_v3  ;;  %v8770_v50 = vrot.slane %v5239_v2, %v6914_v46  ;;  %v5349_v10 = vrot.slane %v5233_v11, %v6914_v46 }
 0x3ec   :  { %v8754_v54 = vpop.permute.xlu0 %4348  ;;  %4821 = vrot.lane.b32.xlu1 %v6388_v35, %s6526_s21  ;;  %v4775_v35 = vcombine.low %v4766_v40, %v4774_v7 }
 0x3ed   :  { %v4372_v53 = vshrl.u32 %v8754_v54, 16  ;;  %3653 = vrot.lane.b32.xlu0 %v6127_v23, %s6529_s24  ;;  %v4950_v23 = vpack.i.b16 %v4949_v56, %v4948_v27  ;;  %v8779_v9 = vrot.slane %v4367_v47, %v6914_v46  ;;  %v8790_v27 = vrot.slane %v3006_v51, %v6994_v60 }
 0x3ee   :  { %v8762_v14 = vpop.permute.xlu1 %5379  ;;  %v5358_v45 = vcombine.low %v5349_v10, %v8770_v50  ;;  %v8798_v11 = vrot.slane %v4775_v35, %v6994_v60  ;;  %v8807_v51 = vrot.slane %v4956_v6, %v6914_v46  ;;  %v3253_v6 = vcombine.high %v8595_v48, %v8598_v8 }
 0x3ef   :  { %v4373_v1 = vpack.i.b16 %v4372_v53, %v4371_v63  ;;  %v8804_v43 = vrot.slane %v4950_v23, %v6914_v46  ;;  %v4776_v63 = vcombine.high %v4766_v40, %v4774_v7 }
 0x3f0   :  { %v8774_v3 = vpop.permute.xlu0 %5486  ;;  %5111 = vrot.lane.b32.xlu1 %v6198_v38, %s6525_s20  ;;  %v6093_v38 = vcombine.low %v8790_v27, %v8790_v27 }
 0x3f1   :  { %v8782_v52 = vrot.slane %v4373_v1, %v6914_v46  ;;  %3927 = vrot.lane.b32.xlu0 %v6367_v15, %s6528_s23  ;;  %v6183_v1 = vcombine.low %v8798_v11, %v8798_v11  ;;  %v8820_v15 = vrot.slane %v5358_v45, %v6994_v60  ;;  %v5076_v7 = vcombine.high %v8804_v43, %v8807_v51 }
 0x3f2   :  { %v8785_v2 = vpop.permute.xlu1 %3322  ;;  %v5515_v48 = vshrl.u32 %v8774_v3, 16 }
 0x3f3   :  { %9820 = vst [vmem:[#allocation66_spill] sm:$0xff] %v8785_v2  ;;  %v4493_v56 = vcombine.high %v8779_v9, %v8782_v52  ;;  %9822 = vst [vmem:[#allocation68_spill] sm:$0xff] %v8820_v15  ;;  %v6217_v8 = vcombine.low %v8820_v15, %v8820_v15 }
 0x3f4   :  { %v8800_v47 = vpop.permute.xlu0 %5490  ;;  %5404 = vrot.lane.b32.xlu1 %v6404_v19, %s6526_s21 }
 0x3f5   :  { %4284 = vrot.lane.b32.xlu0 %v6157_v24, %s6529_s24  ;;  %v8815_v35 = vrot.slane %v4493_v56, %v6994_v60  ;;  %v5516_v40 = vshrl.u32 %v8800_v47, 16  ;;  %v8836_v56 = vrot.slane %v4776_v63, %v6994_v60  ;;  %v8842_v24 = vrot.slane %v3253_v6, %v6994_v60 }
 0x3f6   :  { %v8810_v53 = vpop.permute.xlu1 %3623  ;;  %v8851_v63 = vrot.slane %v5076_v7, %v6994_v60  ;;  %v5359_v6 = vcombine.high %v5349_v10, %v8770_v50  ;;  %v4647_v10 = vpack.i.b16 %v8562_v42, %v8533_v34  ;;  %v6360_v34 = vcombine.high %v8655_v5, %v8655_v5 }
 0x3f7   :  { %9821 = vst [vmem:[#allocation67_spill] sm:$0xff] %v8810_v53  ;;  %v6172_v45 = vcombine.low %v8815_v35, %v8815_v35  ;;  %v9824_v53 = vld [vmem:[#allocation29_spill] sm:$0xff]  ;;  %v6111_v7 = vcombine.low %v8842_v24, %v8842_v24  ;;  %v4364_v5 = vpack.i.b16 %v8710_v12, %v8693_v0 }
 0x3f8   :  { %v8824_v23 = vpop.permute.xlu0 %5494  ;;  %3062 = vrot.lane.b32.xlu1 %v6093_v38, %s6527_s22  ;;  %v2884_v59 = vpack.i.b16 %v9825_v57, %v9824_v53  ;;  %v2878_v57 = vpack.i.b16 %v9827_v39, %v9826_v28  ;;  %v4370_v28 = vpack.i.b16 %v8754_v54, %v8728_v36  ;;  %v8890_v42 = vrot.slane %v5359_v6, %v6994_v60 }
 0x3f9   :  { %4831 = vrot.lane.b32.xlu0 %v6183_v1, %s6527_s22  ;;  %v5517_v1 = vpack.i.b16 %v5516_v40, %v5515_v48  ;;  %v3828_v40 = vcombine.high %v8637_v55, %v8626_v17  ;;  %v4653_v48 = vpack.i.b16 %v8600_v25, %v8581_v30  ;;  %v6206_v30 = vcombine.low %v8851_v63, %v8851_v63 }
 0x3fa   :  { %v8831_v19 = vpop.permute.xlu1 %3897  ;;  %v8881_v25 = vrot.slane %v2884_v59, %v6914_v46  ;;  %v8903_v36 = vrot.slane %v2878_v57, %v6914_v46  ;;  %v4947_v54 = vpack.i.b16 %v8199_v32, %v8176_v62  ;;  %v8921_v0 = vrot.slane %v4370_v28, %v6914_v46 }
 0x3fb   :  { %9823 = vst [vmem:[#allocation69_spill] sm:$0xff] %v8831_v19  ;;  %v5521_v19 = vshrl.u32 %v8824_v23, 16  ;;  %v8872_v50 = vrot.slane %v5517_v1, %v6914_v46  ;;  %v8893_v39 = vrot.slane %v4653_v48, %v6914_v46  ;;  %v8900_v53 = vrot.slane %v3828_v40, %v6994_v60 }
 0x3fc   :  { %v8844_v38 = vpop.permute.xlu0 %5498  ;;  %4568 = vrot.lane.b32.xlu1 %v6172_v45, %s6529_s24  ;;  %v6393_v45 = vcombine.high %v8836_v56, %v8836_v56  ;;  %v2972_v1 = vcombine.low %v8903_v36, %v8881_v25  ;;  %v6409_v62 = vcombine.high %v8890_v42, %v8890_v42  ;;  %v8942_v6 = vrot.slane %v4947_v54, %v6914_v46 }
 0x3fd   :  { %v5522_v2 = vshrl.u32 %v8844_v38, 16  ;;  %5414 = vrot.lane.b32.xlu0 %v6217_v8, %s6527_s22  ;;  %v6376_v28 = vcombine.high %v8691_v26, %v8691_v26 }
 0x3fe   :  { %v8856_v15 = vpop.permute.xlu1 %4254 }
 0x3ff   :  { %v5523_v8 = vpack.i.b16 %v5522_v2, %v5521_v19  ;;  %v5236_v2 = vpack.i.b16 %v8672_v61, %v8657_v4  ;;  %v4953_v4 = vpack.i.b16 %v8235_v37, %v8217_v21  ;;  %v8913_v61 = vrot.slane %v4647_v10, %v6914_v46 }
 0x400   :  { %4861 = vrot.lane.b32.xlu1 %v6393_v45, %s6530_s25  ;;  %v5230_v19 = vpack.i.b16 %v8633_v29, %v8613_v44  ;;  %v6141_v44 = vcombine.low %v8900_v53, %v8900_v53  ;;  %v8938_v29 = vrot.slane %v4364_v5, %v6914_v46  ;;  %v8960_v10 = vrot.slane %v2972_v1, %v6994_v60 }
 0x401   :  { %v8875_v17 = vrot.slane %v5523_v8, %v6914_v46  ;;  %3357 = vrot.lane.b32.xlu0 %v6111_v7, %s6525_s20  ;;  %v4741_v21 = vcombine.low %v8913_v61, %v8893_v39  ;;  %v8933_v37 = vrot.slane %v5236_v2, %v6914_v46  ;;  %v8945_v45 = vrot.slane %v4953_v4, %v6914_v46 }
 0x402   :  { %v8885_v55 = vpop.permute.xlu1 %4801  ;;  %v8948_v40 = vrot.slane %v5230_v19, %v6914_v46  ;;  %v4459_v48 = vcombine.high %v8938_v29, %v8921_v0  ;;  %v5520_v8 = vpack.i.b16 %v8844_v38, %v8824_v23  ;;  %9828 = vst [vmem:[#allocation29_spill] sm:$0xff] %v8960_v10  ;;  %v5514_v23 = vpack.i.b16 %v8800_v47, %v8774_v3 }
 0x403   :  { %v5642_v59 = vcombine.low %v8872_v50, %v8875_v17  ;;  %v5042_v5 = vcombine.high %v8942_v6, %v8945_v45 }
 0x404   :  { %5151 = vrot.lane.b32.xlu1 %v6206_v30, %s6529_s24  ;;  %v5324_v30 = vcombine.low %v8948_v40, %v8933_v37  ;;  %v8974_v38 = vrot.slane %v5520_v8, %v6914_v46  ;;  %v8981_v26 = vrot.slane %v4459_v48, %v6994_v60  ;;  %v5599_v54 = vrot.slane %v5514_v23, %v6914_v46 }
 0x405   :  { %3658 = vrot.lane.b32.xlu0 %v6360_v34, %s6526_s21  ;;  %v8928_v32 = vrot.slane %v5642_v59, %v6994_v60  ;;  %v8967_v34 = vrot.slane %v4741_v21, %v6994_v60  ;;  %v6342_v59 = vcombine.high %v8960_v10, %v8960_v10  ;;  %v6361_v23 = vcombine.high %v8721_v16, %v8721_v16 }
 0x406   :  { %v8923_v12 = vpop.permute.xlu1 %5384  ;;  %v8988_v47 = vrot.slane %v5324_v30, %v6994_v60  ;;  %v5608_v4 = vcombine.low %v5599_v54, %v8974_v38  ;;  %v6384_v1 = vcombine.high %v8981_v26, %v8981_v26  ;;  %v6343_v16 = vcombine.high %v8790_v27, %v8790_v27 }
 0x407   :  { %v6232_v57 = vcombine.low %v8928_v32, %v8928_v32  ;;  %v6390_v3 = vcombine.high %v8967_v34, %v8967_v34  ;;  %v6377_v27 = vcombine.high %v8767_v20, %v8767_v20  ;;  %v6401_v20 = vcombine.high %v8851_v63, %v8851_v63 }
 0x408   :  { %5444 = vrot.lane.b32.xlu1 %v6409_v62, %s6530_s25  ;;  %v8999_v62 = vrot.slane %v5042_v5, %v6994_v60  ;;  %v6406_v21 = vcombine.high %v8988_v47, %v8988_v47  ;;  %v9016_v30 = vrot.slane %v5608_v4, %v6994_v60  ;;  %v6415_v63 = vcombine.high %v8928_v32, %v8928_v32 }
 0x409   :  { %3932 = vrot.lane.b32.xlu0 %v6141_v44, %s6525_s20  ;;  %v9829_v44 = vcombine.high %v9799_v31, %v9800_v18 }
 0x40a   :  { %v8955_v7 = vpop.permute.xlu1 %3327  ;;  %9830 = vst [vmem:[#allocation31_spill] sm:$0xff] %v9016_v30  ;;  %v6414_v18 = vcombine.high %v9016_v30, %v9016_v30 }
 0x40b   :  { %v9007_v48 = vrot.slane %v9829_v44, %v6994_v60 }
 0x40c   :  { %5698 = vrot.lane.b32.xlu1 %v6232_v57, %s6527_s22  ;;  %v6400_v57 = vcombine.high %v8999_v62, %v8999_v62 }
 0x40d   :  { %4289 = vrot.lane.b32.xlu0 %v6376_v28, %s6526_s21  ;;  %v6112_v28 = vcombine.low %v9007_v48, %v9007_v48 }
 0x40e   :  { %v8976_v2 = vpop.permute.xlu1 %3628 }
 0x410   :  { %3067 = vrot.lane.b32.xlu1 %v6342_v59, %s6524_s19  ;;  %v9831_v59 = vcombine.high %v8537_v49, %v8540_v41  ;;  %v4492_v49 = vcombine.low %v8779_v9, %v8782_v52  ;;  %v5448_v9 = vsel %vm725_vm0, %v8350_v22, %v8762_v14  ;;  %v2973_v52 = vcombine.high %v8903_v36, %v8881_v25 }
 0x411   :  { %4836 = vrot.lane.b32.xlu0 %v6390_v3, %s6524_s19  ;;  %v4865_v3 = vsel %vm725_vm0, %v8344_v13, %v8736_v33  ;;  %v6385_v33 = vcombine.high %v8815_v35, %v8815_v35  ;;  %v5450_v35 = vsel %vm729_vm1, %v5448_v9, %v8923_v12  ;;  %v5075_v22 = vcombine.low %v8804_v43, %v8807_v51  ;;  %v9836_v9 = vld [vmem:[#allocation68_spill] sm:$0xff] }
 0x412   :  { %v8994_v19 = vpop.permute.xlu1 %3902  ;;  %v9030_v5 = vrot.slane %v9831_v59, %v6994_v60  ;;  %v4867_v4 = vsel %vm729_vm1, %v4865_v3, %v8885_v55  ;;  %v9055_v55 = vrot.slane %v4492_v49, %v6994_v60  ;;  %v5609_v14 = vcombine.high %v5599_v54, %v8974_v38 }
 0x413   :  { %v2987_v36 = vrot.slane %v2973_v52, %v6994_v60  ;;  %v9088_v43 = vrot.slane %v5075_v22, %v6994_v60  ;;  %v6407_v52 = vcombine.high %v9836_v9, %v9836_v9 }
 0x414   :  { %4573 = vrot.lane.b32.xlu1 %v6384_v1, %s6526_s21  ;;  %v5623_v54 = vrot.slane %v5609_v14, %v6994_v60 }
 0x415   :  { %5419 = vrot.lane.b32.xlu0 %v6406_v21, %s6524_s19  ;;  %v6142_v21 = vcombine.low %v9030_v5, %v9030_v5  ;;  %v6096_v38 = vcombine.low %v2987_v36, %v2987_v36 }
 0x416   :  { %v9011_v8 = vpop.permute.xlu1 %4259 }
 0x418   :  { %5156 = vrot.lane.b32.xlu1 %v6400_v57, %s6526_s21 }
 0x419   :  { %3362 = vrot.lane.b32.xlu0 %v6112_v28, %s6529_s24  ;;  %v6168_v28 = vcombine.low %v9055_v55, %v9055_v55 }
 0x41a   :  { %v4514_v31 = vpop.permute.xlu1 %4513 }
 0x41b   :  { %v4582_v59 = vsel %vm725_vm0, %v8506_v58, %v4514_v31  ;;  %v4458_v31 = vcombine.low %v8938_v29, %v8921_v0  ;;  %v6368_v29 = vcombine.high %v8900_v53, %v8900_v53  ;;  %v5041_v53 = vcombine.low %v8942_v6, %v8945_v45 }
 0x41c   :  { %5703 = vrot.lane.b32.xlu1 %v6414_v18, %s6524_s19  ;;  %v6391_v18 = vcombine.high %v8798_v11, %v8798_v11  ;;  %v5643_v11 = vcombine.high %v8872_v50, %v8875_v17 }
 0x41d   :  { %3663 = vrot.lane.b32.xlu0 %v6361_v23, %s6530_s25  ;;  %v6202_v23 = vcombine.low %v9088_v43, %v9088_v43 }
 0x41e   :  { %v4807_v1 = vpop.permute.xlu1 %4806  ;;  %v5657_v17 = vrot.slane %v5643_v11, %v6994_v60 }
 0x41f   :  { %v9044_v41 = vsel %vm732_vm2, %v4867_v4, %v4807_v1  ;;  %v6235_v4 = vcombine.low %v5623_v54, %v5623_v54  ;;  %v9833_v1 = vld [vmem:[#allocation33_spill] sm:$0xff] }
 0x420   :  { %3072 = vrot.lane.b32.xlu1 %v6343_v16, %s6528_s23  ;;  %v9834_v16 = vld [vmem:[#allocation34_spill] sm:$0xff]  ;;  %v6236_v14 = vcombine.low %v5657_v17, %v5657_v17 }
 0x421   :  { %3937 = vrot.lane.b32.xlu0 %v6142_v21, %s6529_s24  ;;  %v9835_v49 = vcombine.high %v9833_v1, %v9834_v16  ;;  %v9159_v1 = vrot.slane %v5041_v53, %v6994_v60 }
 0x422   :  { %v5097_v13 = vpop.permute.xlu1 %5096 }
 0x423   :  { %v3021_v21 = vrot.slane %v9835_v49, %v6994_v60  ;;  %v6417_v49 = vcombine.high %v5657_v17, %v5657_v17 }
 0x424   :  { %4578 = vrot.lane.b32.xlu1 %v6385_v33, %s6530_s25 }
 0x425   :  { %4294 = vrot.lane.b32.xlu0 %v6377_v27, %s6530_s25  ;;  %v6097_v58 = vcombine.low %v3021_v21, %v3021_v21  ;;  %v6345_v45 = vcombine.high %v3021_v21, %v3021_v21 }
 0x426   :  { %v5390_v44 = vpop.permute.xlu1 %5389 }
 0x427   :  { %v9069_v57 = vsel %vm732_vm2, %v5450_v35, %v5390_v44  ;;  %v6352_v44 = vcombine.high %v8842_v24, %v8842_v24  ;;  %v9137_v24 = vrot.slane %v4458_v31, %v6994_v60 }
 0x428   :  { %9832 = vst [vmem:[#allocation25_spill] sm:$0xff] %v9069_v57  ;;  %5161 = vrot.lane.b32.xlu1 %v6401_v20, %s6530_s25  ;;  %v9837_v20 = vld [vmem:[#allocation52_spill] sm:$0xff] }
 0x429   :  { %4548 = vrot.lane.b32.xlu0 %v6168_v28, %s6527_s22  ;;  %v5165_v28 = vsel %vm725_vm0, %v9837_v20, %v5097_v13 }
 0x42a   :  { %v9078_v25 = vpop.permute.xlu1 %3332 }
 0x42b   :  { %v9083_v12 = vpop.permute.xlu0 %3633 }
 0x42c   :  { %5708 = vrot.lane.b32.xlu1 %v6415_v63, %s6528_s23  ;;  %v4742_v63 = vcombine.high %v8913_v61, %v8893_v39  ;;  %v6382_v39 = vcombine.high %v9137_v24, %v9137_v24 }
 0x42d   :  { %4841 = vrot.lane.b32.xlu0 %v6391_v18, %s6528_s23 }
 0x42e   :  { %v9092_v51 = vpop.permute.xlu1 %3907  ;;  %v4756_v61 = vrot.slane %v4742_v63, %v6994_v60  ;;  %v6187_v63 = vcombine.low %v8836_v56, %v8836_v56  ;;  %v6171_v56 = vcombine.low %v8981_v26, %v8981_v26  ;;  %v9842_v26 = vld [vmem:[#allocation16_spill] sm:$0xff] }
 0x42f   :  { %v9095_v32 = vpop.permute.xlu0 %4264 }
 0x430   :  { %3077 = vrot.lane.b32.xlu1 %v6096_v38, %s6525_s20  ;;  %v6344_v38 = vcombine.high %v2987_v36, %v2987_v36  ;;  %v5325_v36 = vcombine.high %v8948_v40, %v8933_v37  ;;  %v6392_v53 = vcombine.high %v4756_v61, %v4756_v61 }
 0x431   :  { %5131 = vrot.lane.b32.xlu0 %v6202_v23, %s6527_s22 }
 0x432   :  { %v4519_v3 = vpop.permute.xlu1 %4518  ;;  %v5339_v37 = vrot.slane %v5325_v36, %v6994_v60 }
 0x433   :  { %v4584_v33 = vsel %vm729_vm1, %v4582_v59, %v4519_v3  ;;  %v9110_v27 = vpop.permute.xlu0 %3638  ;;  %v6416_v59 = vcombine.high %v5623_v54, %v5623_v54  ;;  %v6398_v54 = vcombine.high %v9159_v1, %v9159_v1 }
 0x434   :  { %5713 = vrot.lane.b32.xlu1 %v6235_v4, %s6525_s20  ;;  %v6186_v4 = vcombine.low %v4756_v61, %v4756_v61  ;;  %v9845_v61 = vld [vmem:[#allocation15_spill] sm:$0xff] }
 0x435   :  { %5424 = vrot.lane.b32.xlu0 %v6407_v52, %s6528_s23 }
 0x436   :  { %v9116_v50 = vpop.permute.xlu1 %4811 }
 0x437   :  { %v9121_v35 = vpop.permute.xlu0 %4269 }
 0x438   :  { %3082 = vrot.lane.b32.xlu1 %v6097_v58, %s6529_s24  ;;  %v6220_v58 = vcombine.low %v5339_v37, %v5339_v37 }
 0x439   :  { %3367 = vrot.lane.b32.xlu0 %v6352_v44, %s6526_s21  ;;  %v6353_v44 = vcombine.high %v9007_v48, %v9007_v48 }
 0x43a   :  { %v5102_v22 = vpop.permute.xlu1 %5101 }
 0x43b   :  { %v5167_v18 = vsel %vm729_vm1, %v5165_v28, %v5102_v22  ;;  %v9132_v0 = vpop.permute.xlu0 %3342  ;;  %v6369_v28 = vcombine.high %v9030_v5, %v9030_v5  ;;  %v6399_v5 = vcombine.high %v9088_v43, %v9088_v43 }
 0x43c   :  { %5718 = vrot.lane.b32.xlu1 %v6236_v14, %s6529_s24  ;;  %v6383_v14 = vcombine.high %v9055_v55, %v9055_v55  ;;  %v6221_v55 = vcombine.low %v8890_v42, %v8890_v42  ;;  %v9841_v42 = vld [vmem:[#allocation42_spill] sm:$0xff] }
 0x43d   :  { %3942 = vrot.lane.b32.xlu0 %v6368_v29, %s6526_s21  ;;  %v5510_v36 = vshrl.u32 %v9841_v42, 16 }
 0x43e   :  { %v9141_v13 = vpop.permute.xlu1 %5394 }
 0x43f   :  { %9838 = vst [vmem:[#allocation27_spill] sm:$0xff] %v9141_v13  ;;  %v9143_v23 = vpop.permute.xlu0 %3643 }
 0x440   :  { %3087 = vrot.lane.b32.xlu1 %v6344_v38, %s6526_s21 }
 0x441   :  { %4553 = vrot.lane.b32.xlu0 %v6382_v39, %s6524_s19 }
 0x442   :  { %v9152_v11 = vpop.permute.xlu1 %3337 }
 0x443   :  { %v9156_v3 = vpop.permute.xlu0 %3917 }
 0x444   :  { %5723 = vrot.lane.b32.xlu1 %v6416_v59, %s6526_s21  ;;  %v6205_v59 = vcombine.low %v8999_v62, %v8999_v62  ;;  %v9847_v62 = vld [vmem:[#allocation20_spill] sm:$0xff] }
 0x445   :  { %4846 = vrot.lane.b32.xlu0 %v6186_v4, %s6525_s20 }
 0x446   :  { %v9163_v6 = vpop.permute.xlu1 %3912 }
 0x447   :  { %v9165_v16 = vpop.permute.xlu0 %4274 }
 0x448   :  { %3092 = vrot.lane.b32.xlu1 %v6345_v45, %s6530_s25  ;;  %v6408_v45 = vcombine.high %v5339_v37, %v5339_v37 }
 0x449   :  { %5136 = vrot.lane.b32.xlu0 %v6398_v54, %s6524_s19  ;;  %v9843_v54 = vld [vmem:[#allocation19_spill] sm:$0xff] }
 0x44a   :  { %v4524_v40 = vpop.permute.xlu1 %4523 }
 0x44b   :  { %v9173_v9 = vsel %vm732_vm2, %v4584_v33, %v4524_v40  ;;  %v9175_v52 = vpop.permute.xlu0 %3347  ;;  %v9844_v40 = vcombine.high %v9842_v26, %v9843_v54  ;;  %v9850_v54 = vld [vmem:[#allocation57_spill] sm:$0xff] }
 0x44c   :  { %9839 = vst [vmem:[#allocation33_spill] sm:$0xff] %v9173_v9  ;;  %5728 = vrot.lane.b32.xlu1 %v6417_v49, %s6530_s25  ;;  %v9859_v9 = vld [vmem:[#allocation48_spill] sm:$0xff] }
 0x44d   :  { %5429 = vrot.lane.b32.xlu0 %v6220_v58, %s6525_s20  ;;  %v9234_v49 = vrot.slane %v9844_v40, %v6994_v60  ;;  %v5504_v58 = vshrl.u32 %v9845_v61, 16  ;;  %v9852_v40 = vld [vmem:[#allocation24_spill] sm:$0xff] }
 0x44e   :  { %v9179_v21 = vpop.permute.xlu1 %4816 }
 0x44f   :  { %v9181_v31 = vpop.permute.xlu0 %3648 }
 0x451   :  { %3372 = vrot.lane.b32.xlu0 %v6353_v44, %s6530_s25  ;;  %v9846_v44 = vld [vmem:[#allocation41_spill] sm:$0xff] }
 0x452   :  { %v5107_v17 = vpop.permute.xlu1 %5106 }
 0x453   :  { %v9187_v33 = vsel %vm732_vm2, %v5167_v18, %v5107_v17  ;;  %v9189_v20 = vpop.permute.xlu0 %3922  ;;  %v5509_v17 = vshrl.u32 %v9846_v44, 16 }
 0x454   :  { %9840 = vst [vmem:[#allocation34_spill] sm:$0xff] %v9187_v33  ;;  %v5502_v33 = vpack.i.b16 %v9845_v61, %v9847_v62 }
 0x455   :  { %3947 = vrot.lane.b32.xlu0 %v6369_v28, %s6530_s25  ;;  %v5503_v28 = vshrl.u32 %v9847_v62, 16 }
 0x457   :  { %v9194_v22 = vpop.permute.xlu0 %4279  ;;  %v5505_v37 = vpack.i.b16 %v5504_v58, %v5503_v28  ;;  %v9854_v58 = vld [vmem:[#allocation26_spill] sm:$0xff]  ;;  %v9855_v28 = vld [vmem:[#allocation28_spill] sm:$0xff] }
 0x459   :  { %4558 = vrot.lane.b32.xlu0 %v6383_v14, %s6528_s23  ;;  %v5511_v14 = vpack.i.b16 %v5510_v36, %v5509_v17  ;;  %v9851_v36 = vld [vmem:[#allocation23_spill] sm:$0xff]  ;;  %v9261_v10 = vrot.slane %v5505_v37, %v6914_v46 }
 0x45a   :  { %v9853_v17 = vcombine.high %v9851_v36, %v9852_v40 }
 0x45b   :  { %v9199_v48 = vpop.permute.xlu0 %3352 }
 0x45c   :  { %v9256_v30 = vrot.slane %v9853_v17, %v6994_v60 }
 0x45d   :  { %4851 = vrot.lane.b32.xlu0 %v6187_v63, %s6529_s24 }
 0x45f   :  { %v9204_v18 = vpop.permute.xlu0 %3653 }
 0x461   :  { %5141 = vrot.lane.b32.xlu0 %v6399_v5, %s6528_s23  ;;  %v6165_v5 = vcombine.low %v9234_v49, %v9234_v49 }
 0x463   :  { %v9209_v29 = vpop.permute.xlu0 %3927 }
 0x465   :  { %5434 = vrot.lane.b32.xlu0 %v6221_v55, %s6529_s24  ;;  %v9848_v55 = vld [vmem:[#allocation30_spill] sm:$0xff] }
 0x467   :  { %v9214_v38 = vpop.permute.xlu0 %4284 }
 0x469   :  { %4563 = vrot.lane.b32.xlu0 %v6171_v56, %s6525_s20  ;;  %v9849_v56 = vld [vmem:[#allocation32_spill] sm:$0xff] }
 0x46b   :  { %v9219_v39 = vpop.permute.xlu0 %4831 }
 0x46d   :  { %4856 = vrot.lane.b32.xlu0 %v6392_v53, %s6526_s21  ;;  %v2872_v53 = vpack.i.b16 %v9849_v56, %v9848_v55 }
 0x46f   :  { %v9222_v43 = vpop.permute.xlu0 %5414 }
 0x471   :  { %5146 = vrot.lane.b32.xlu0 %v6205_v59, %s6525_s20  ;;  %v9246_v59 = vrot.slane %v5511_v14, %v6914_v46  ;;  %v9265_v14 = vrot.slane %v2872_v53, %v6914_v46 }
 0x473   :  { %v9228_v4 = vpop.permute.xlu0 %3357  ;;  %v5574_v55 = vcombine.low %v9261_v10, %v9246_v59 }
 0x475   :  { %5439 = vrot.lane.b32.xlu0 %v6408_v45, %s6526_s21  ;;  %v6389_v45 = vcombine.high %v9850_v54, %v9850_v54  ;;  %v6199_v54 = vcombine.low %v9256_v30, %v9256_v30  ;;  %v9282_v17 = vrot.slane %v5574_v55, %v6994_v60  ;;  %v9857_v55 = vld [vmem:[#allocation43_spill] sm:$0xff] }
 0x477   :  { %v3659_v63 = vpop.permute.xlu0 %3658 }
 0x479   :  { %4533 = vrot.lane.b32.xlu0 %v6165_v5, %s6529_s24  ;;  %v2866_v5 = vpack.i.b16 %v9855_v28, %v9854_v58  ;;  %v5508_v58 = vpack.i.b16 %v9841_v42, %v9846_v44  ;;  %v3682_v42 = vsel %vm725_vm0, %v9859_v9, %v9083_v12  ;;  %v9319_v9 = vrot.slane %v5502_v33, %v6914_v46 }
 0x47a   :  { %v3684_v13 = vsel %vm729_vm1, %v3682_v42, %v9110_v27 }
 0x47b   :  { %v9248_v26 = vpop.permute.xlu0 %3932  ;;  %v9272_v36 = vrot.slane %v2866_v5, %v6914_v46  ;;  %v9304_v44 = vrot.slane %v5508_v58, %v6914_v46  ;;  %v3686_v12 = vsel %vm732_vm2, %v3684_v13, %v9143_v23  ;;  %v9862_v58 = vld [vmem:[#allocation53_spill] sm:$0xff]  ;;  %v9864_v23 = vld [vmem:[#allocation67_spill] sm:$0xff] }
 0x47c   :  { %v3688_v27 = vsel %vm735_vm3, %v3686_v12, %v9181_v31 }
 0x47d   :  { %4826 = vrot.lane.b32.xlu0 %v6389_v45, %s6530_s25  ;;  %v2904_v37 = vcombine.low %v9272_v36, %v9265_v14  ;;  %v9856_v45 = vld [vmem:[#allocation61_spill] sm:$0xff]  ;;  %v5540_v13 = vcombine.low %v9319_v9, %v9304_v44 }
 0x47e   :  { %v6405_v53 = vcombine.high %v9856_v45, %v9856_v45  ;;  %v9858_v45 = vld [vmem:[#allocation38_spill] sm:$0xff] }
 0x47f   :  { %v4290_v56 = vpop.permute.xlu0 %4289  ;;  %v9288_v28 = vrot.slane %v2904_v37, %v6994_v60  ;;  %v9860_v37 = vld [vmem:[#allocation45_spill] sm:$0xff] }
 0x481   :  { %5116 = vrot.lane.b32.xlu0 %v6199_v54, %s6529_s24  ;;  %v6225_v54 = vcombine.low %v9282_v17, %v9282_v17  ;;  %v6338_v62 = vcombine.high %v9288_v28, %v9288_v28 }
 0x483   :  { %v9277_v40 = vpop.permute.xlu0 %4836 }
 0x485   :  { %5409 = vrot.lane.b32.xlu0 %v6405_v53, %s6530_s25  ;;  %v3667_v53 = vsel %vm725_vm0, %v9858_v45, %v9857_v55 }
 0x486   :  { %v3669_v57 = vsel %vm729_vm1, %v3667_v53, %v9860_v37  ;;  %v9863_v53 = vld [vmem:[#allocation60_spill] sm:$0xff] }
 0x487   :  { %v9290_v5 = vpop.permute.xlu0 %5419 }
 0x489   :  { %5663 = vrot.lane.b32.xlu0 %v6225_v54, %s6527_s22  ;;  %v9861_v54 = vld [vmem:[#allocation49_spill] sm:$0xff] }
 0x48a   :  { %v3671_v55 = vsel %vm732_vm2, %v3669_v57, %v9861_v54  ;;  %v3690_v57 = vsel %vm738_vm4, %v3688_v27, %v9204_v18  ;;  %v9865_v54 = vld [vmem:[#allocation63_spill] sm:$0xff]  ;;  %v9866_v18 = vld [vmem:[#allocation44_spill] sm:$0xff]  ;;  %v9868_v27 = vld [vmem:[#allocation50_spill] sm:$0xff] }
 0x48b   :  { %v9310_v61 = vpop.permute.xlu0 %3362  ;;  %v3673_v45 = vsel %vm735_vm3, %v3671_v55, %v9862_v58  ;;  %v3692_v33 = vsel %vm741_vm5, %v3690_v57, %v3659_v63  ;;  %v6380_v31 = vcombine.high %v9865_v54, %v9865_v54  ;;  %v9867_v58 = vld [vmem:[#allocation39_spill] sm:$0xff]  ;;  %v4313_v63 = vsel %vm725_vm0, %v9868_v27, %v9095_v32  ;;  %v9870_v57 = vld [vmem:[#allocation46_spill] sm:$0xff]  ;;  %v9871_v54 = vld [vmem:[#allocation21_spill] sm:$0xff] }
 0x48c   :  { %v3675_v42 = vsel %vm738_vm4, %v3673_v45, %v9863_v53  ;;  %v4298_v45 = vsel %vm725_vm0, %v9867_v58, %v9866_v18  ;;  %v9869_v53 = vld [vmem:[#allocation65_spill] sm:$0xff] }
 0x48d   :  { %3032 = vrot.lane.b32.xlu0 %v6338_v62, %s6524_s19  ;;  %v3677_v46 = vsel %vm741_vm5, %v3675_v42, %v9864_v23  ;;  %v6396_v42 = vcombine.high %v9869_v53, %v9869_v53  ;;  %v4300_v23 = vsel %vm729_vm1, %v4298_v45, %v9870_v57 }
 0x48e   :  { %v3679_v62 = vsel %vm744_vm6, %v3677_v46, %v8976_v2  ;;  %v4315_v2 = vsel %vm729_vm1, %v4313_v63, %v9121_v35  ;;  %v9873_v35 = vld [vmem:[#allocation64_spill] sm:$0xff] }
 0x48f   :  { %v3664_v37 = vpop.permute.xlu0 %3663  ;;  %v4317_v32 = vsel %vm732_vm2, %v4315_v2, %v9165_v16 }
 0x490   :  { %v3694_v55 = vsel %vm744_vm6, %v3692_v33, %v3664_v37  ;;  %v9356_v37 = vrot.slane %v5540_v13, %v6994_v60  ;;  %v4319_v18 = vsel %vm735_vm3, %v4317_v32, %v9194_v22 }
 0x491   :  { %v6130_v12 = vcombine.low %v3679_v62, %v3694_v55  ;;  %4538 = vrot.lane.b32.xlu0 %v6380_v31, %s6526_s21  ;;  %v4302_v31 = vsel %vm732_vm2, %v4300_v23, %v9871_v54  ;;  %v9872_v62 = vld [vmem:[#allocation56_spill] sm:$0xff]  ;;  %v4321_v13 = vsel %vm738_vm4, %v4319_v18, %v9214_v38  ;;  %v9874_v38 = vld [vmem:[#allocation37_spill] sm:$0xff] }
 0x492   :  { %v4304_v55 = vsel %vm735_vm3, %v4302_v31, %v9872_v62  ;;  %v4323_v16 = vsel %vm741_vm5, %v4321_v13, %v4290_v56  ;;  %v6410_v27 = vcombine.high %v9356_v37, %v9356_v37  ;;  %v6339_v23 = vcombine.high %v9874_v38, %v9874_v38  ;;  %v9876_v13 = vld [vmem:[#allocation36_spill] sm:$0xff] }
 0x493   :  { %v3700_v46 = vrot.slane %v6130_v12, 6  ;;  %v9353_v33 = vpop.permute.xlu0 %3937  ;;  %v4306_v12 = vsel %vm738_vm4, %v4304_v55, %v9873_v35  ;;  %v4880_v56 = vsel %vm725_vm0, %v8967_v34, %v9219_v39  ;;  %v2905_v31 = vcombine.high %v9272_v36, %v9265_v14 }
 0x494   :  { %v4308_v58 = vsel %vm741_vm5, %v4306_v12, %v8856_v15  ;;  %v9382_v15 = vpop.permute.xlu1 %5399  ;;  %v6397_v34 = vcombine.high %v9256_v30, %v9256_v30  ;;  %v5463_v39 = vsel %vm725_vm0, %v8988_v47, %v9222_v43  ;;  %v6411_v14 = vcombine.high %v9282_v17, %v9282_v17  ;;  %v9875_v12 = vld [vmem:[#allocation35_spill] sm:$0xff] }
 0x495   :  { %3702 = vst [vmem:[#allocation4 + $0x8] sm:$0xcc] %v3700_v46  ;;  %5121 = vrot.lane.b32.xlu0 %v6396_v42, %s6526_s21  ;;  %v4310_v22 = vsel %vm744_vm6, %v4308_v58, %v9011_v8  ;;  %v4882_v8 = vsel %vm729_vm1, %v4880_v56, %v9277_v40  ;;  %v6381_v46 = vcombine.high %v9234_v49, %v9234_v49  ;;  %v9878_v56 = vld [vmem:[#allocation47_spill] sm:$0xff] }
 0x496   :  { %v5541_v49 = vcombine.high %v9319_v9, %v9304_v44  ;;  %v5465_v40 = vsel %vm729_vm1, %v5463_v39, %v9290_v5  ;;  %v2919_v36 = vrot.slane %v2905_v31, %v6994_v60  ;;  %v5575_v5 = vcombine.high %v9261_v10, %v9246_v59 }
 0x497   :  { %v4295_v45 = vpop.permute.xlu0 %4294  ;;  %v9877_v58 = vcombine.high %v9875_v12, %v9876_v13  ;;  %v9885_v12 = vld [vmem:[#allocation18_spill] sm:$0xff] }
 0x498   :  { %v4325_v63 = vsel %vm744_vm6, %v4323_v16, %v4295_v45  ;;  %v9398_v32 = vpop.permute.xlu1 %4528  ;;  %v6089_v43 = vcombine.low %v2919_v36, %v2919_v36  ;;  %v5555_v44 = vrot.slane %v5541_v49, %v6994_v60 }
 0x499   :  { %v6160_v53 = vcombine.low %v4310_v22, %v4325_v63  ;;  %5668 = vrot.lane.b32.xlu0 %v6410_v27, %s6524_s19  ;;  %v2953_v16 = vrot.slane %v9877_v58, %v6994_v60  ;;  %v5589_v63 = vrot.slane %v5575_v5, %v6994_v60 }
 0x49a   :  { %v6228_v35 = vcombine.low %v5555_v44, %v5555_v44  ;;  %v6412_v49 = vcombine.high %v5555_v44, %v5555_v44 }
 0x49b   :  { %v4331_v42 = vrot.slane %v6160_v53, 6  ;;  %v4549_v57 = vpop.permute.xlu0 %4548  ;;  %v6090_v22 = vcombine.low %v2953_v16, %v2953_v16 }
 0x49c   :  { %v9416_v18 = vpop.permute.xlu1 %4821  ;;  %v4597_v45 = vsel %vm725_vm0, %v9137_v24, %v4549_v57 }
 0x49d   :  { %4333 = vst [vmem:[#allocation4 + $0x18] sm:$0xcc] %v4331_v42  ;;  %3037 = vrot.lane.b32.xlu0 %v6339_v23, %s6528_s23  ;;  %v6229_v42 = vcombine.low %v5589_v63, %v5589_v63  ;;  %v6340_v23 = vcombine.high %v2919_v36, %v2919_v36  ;;  %v9883_v36 = vld [vmem:[#allocation66_spill] sm:$0xff] }
 0x49f   :  { %v4842_v2 = vpop.permute.xlu0 %4841 }
 0x4a0   :  { %v9393_v54 = vsel %vm732_vm2, %v4882_v8, %v4842_v2  ;;  %v9423_v9 = vpop.permute.xlu1 %5111  ;;  %v9879_v8 = vld [vmem:[#allocation17_spill] sm:$0xff] }
 0x4a1   :  { %4543 = vrot.lane.b32.xlu0 %v6381_v46, %s6530_s25  ;;  %v3376_v2 = vsel %vm725_vm0, %v9879_v8, %v9878_v56  ;;  %v9880_v46 = vld [vmem:[#allocation55_spill] sm:$0xff]  ;;  %v9889_v56 = vld [vmem:[#allocation69_spill] sm:$0xff] }
 0x4a2   :  { %v3391_v31 = vsel %vm725_vm0, %v9880_v46, %v9132_v0 }
 0x4a3   :  { %v5132_v62 = vpop.permute.xlu0 %5131 }
 0x4a4   :  { %v9434_v59 = vpop.permute.xlu1 %5404  ;;  %v5180_v24 = vsel %vm725_vm0, %v9159_v1, %v5132_v62  ;;  %v3393_v1 = vsel %vm729_vm1, %v3391_v31, %v9175_v52  ;;  %v6341_v52 = vcombine.high %v2953_v16, %v2953_v16 }
 0x4a5   :  { %5126 = vrot.lane.b32.xlu0 %v6397_v34, %s6530_s25  ;;  %v9881_v34 = vld [vmem:[#allocation22_spill] sm:$0xff] }
 0x4a6   :  { %v3378_v39 = vsel %vm729_vm1, %v3376_v2, %v9881_v34  ;;  %v6413_v34 = vcombine.high %v5589_v63, %v5589_v63  ;;  %v78_v63 = vstv %s77_s26 }
 0x4a7   :  { %v5425_v55 = vpop.permute.xlu0 %5424 }
 0x4a8   :  { %v9414_v30 = vsel %vm732_vm2, %v5465_v40, %v5425_v55  ;;  %v9440_v38 = vpop.permute.xlu1 %3062  ;;  %v9882_v40 = vld [vmem:[#allocation58_spill] sm:$0xff] }
 0x4a9   :  { %5673 = vrot.lane.b32.xlu0 %v6411_v14, %s6528_s23  ;;  %v3380_v55 = vsel %vm732_vm2, %v3378_v39, %v9882_v40  ;;  %v3395_v14 = vsel %vm732_vm2, %v3393_v1, %v9199_v48  ;;  %v9886_v48 = vld [vmem:[#allocation59_spill] sm:$0xff] }
 0x4aa   :  { %v3397_v0 = vsel %vm735_vm3, %v3395_v14, %v9228_v4  ;;  %v3966_v58 = vsel %vm725_vm0, %v9886_v48, %v9156_v3 }
 0x4ab   :  { %v3368_v47 = vpop.permute.xlu0 %3367 }
 0x4ac   :  { %v9466_v5 = vpop.permute.xlu1 %4568 }
 0x4ad   :  { %3042 = vrot.lane.b32.xlu0 %v6089_v43, %s6525_s20  ;;  %v3382_v43 = vsel %vm735_vm3, %v3380_v55, %v9883_v36 }
 0x4ae   :  { %v3384_v13 = vsel %vm738_vm4, %v3382_v43, %v8955_v7  ;;  %v9888_v7 = vld [vmem:[#allocation62_spill] sm:$0xff] }
 0x4af   :  { %v3943_v17 = vpop.permute.xlu0 %3942  ;;  %v3386_v16 = vsel %vm741_vm5, %v3384_v13, %v9078_v25  ;;  %v84_v13 = vstv %s83_s0 }
 0x4b0   :  { %v3388_v3 = vsel %vm744_vm6, %v3386_v16, %v9152_v11  ;;  %v9506_v2 = vpop.permute.xlu1 %4861 }
 0x4b1   :  { %5678 = vrot.lane.b32.xlu0 %v6228_v35, %s6525_s20  ;;  %v9884_v35 = vld [vmem:[#allocation51_spill] sm:$0xff] }
 0x4b2   :  { %v3951_v44 = vsel %vm725_vm0, %v9885_v12, %v9884_v35 }
 0x4b3   :  { %v4554_v27 = vpop.permute.xlu0 %4553 }
 0x4b4   :  { %v4599_v10 = vsel %vm729_vm1, %v4597_v45, %v4554_v27  ;;  %v3399_v45 = vsel %vm738_vm4, %v3397_v0, %v9310_v61  ;;  %v9887_v27 = vld [vmem:[#allocation54_spill] sm:$0xff] }
 0x4b5   :  { %3047 = vrot.lane.b32.xlu0 %v6090_v22, %s6529_s24  ;;  %v3953_v4 = vsel %vm729_vm1, %v3951_v44, %v9887_v27  ;;  %v3968_v22 = vsel %vm729_vm1, %v3966_v58, %v9189_v20  ;;  %v88_v27 = vstv %s87_s10 }
 0x4b6   :  { %v3970_v61 = vsel %vm732_vm2, %v3968_v22, %v9209_v29 }
 0x4b7   :  { %v9437_v53 = vpop.permute.xlu0 %4846  ;;  %v3972_v20 = vsel %vm735_vm3, %v3970_v61, %v9248_v26  ;;  %v93_v61 = vstv %s92_s11 }
 0x4b8   :  { %v3974_v11 = vsel %vm738_vm4, %v3972_v20, %v9353_v33  ;;  %v9518_v33 = vpop.permute.xlu1 %5151  ;;  %v114_v20 = vstv %s5945_s12 }
 0x4b9   :  { %5683 = vrot.lane.b32.xlu0 %v6229_v42, %s6529_s24  ;;  %v3401_v42 = vsel %vm741_vm5, %v3399_v45, %v3368_v47  ;;  %v3976_v46 = vsel %vm741_vm5, %v3974_v11, %v3943_v17 }
 0x4bb   :  { %v5137_v57 = vpop.permute.xlu0 %5136 }
 0x4bc   :  { %v9445_v60 = vsel %vm729_vm1, %v5180_v24, %v5137_v57  ;;  %v3955_v57 = vsel %vm732_vm2, %v3953_v4, %v9888_v7  ;;  %v9528_v0 = vpop.permute.xlu1 %5444  ;;  %v105_v4 = vstv %s5943_s9 }
 0x4bd   :  { %3052 = vrot.lane.b32.xlu0 %v6340_v23, %s6526_s21  ;;  %v3957_v25 = vsel %vm735_vm3, %v3955_v57, %v9889_v56 }
 0x4be   :  { %v3959_v47 = vsel %vm738_vm4, %v3957_v25, %v8994_v19 }
 0x4bf   :  { %v9458_v62 = vpop.permute.xlu0 %5429  ;;  %v3961_v29 = vsel %vm741_vm5, %v3959_v47, %v9092_v51 }
 0x4c0   :  { %v3963_v26 = vsel %vm744_vm6, %v3961_v29, %v9163_v6  ;;  %v76_v6 = vld [vmem:[%s9651_s4] sm:$0xff] }
 0x4c1   :  { %5688 = vrot.lane.b32.xlu0 %v6412_v49, %s6526_s21  ;;  %v5940_v49 = vld [vmem:[%s9651_s4 + $0x8] sm:$0xff]  ;;  %v79_v40 = vmul.f32 %v78_v63, %v76_v6  ;;  %s108_s4 = ssub.f32 0.0, %s9523_s30  ;;  %v4886_v6 = vsel %vm735_vm3, %v9393_v54, %v9437_v53 }
 0x4c3   :  { %v3373_v24 = vpop.permute.xlu0 %3372  ;;  %v80_v36 = vadd.f32 0.5, %v79_v40  ;;  %v4871_v40 = vsel %vm735_vm3, %v9044_v41, %v9116_v50  ;;  %v5469_v41 = vsel %vm735_vm3, %v9414_v30, %v9458_v62 }
 0x4c4   :  { %v3403_v23 = vsel %vm744_vm6, %v3401_v42, %v3373_v24  ;;  %v9536_v42 = vpop.permute.xlu1 %5698  ;;  %v109_v24 = vstv %s108_s4 }
 0x4c5   :  { %v6115_v8 = vcombine.low %v3388_v3, %v3403_v23  ;;  %3057 = vrot.lane.b32.xlu0 %v6341_v52, %s6530_s25  ;;  %v6418_v12 = vround.rtne.f32 %v80_v36  ;;  %v111_v23 = vstv %s9523_s30 }
 0x4c7   :  { %3410 = vst [vmem:[#allocation4 + $0x8] sm:$0x33] %v6115_v8  ;;  %v3948_v31 = vpop.permute.xlu0 %3947  ;;  %v5939_v48 = vadd.f32 -0.5, %v6418_v12  ;;  %v9890_v12 = vld [vmem:[#allocation27_spill] sm:$0xff] }
 0x4c8   :  { %v3978_v39 = vsel %vm744_vm6, %v3976_v46, %v3948_v31  ;;  %v9540_v11 = vpop.permute.xlu1 %3067 }
 0x4c9   :  { %v6145_v1 = vcombine.low %v3963_v26, %v3978_v39  ;;  %5693 = vrot.lane.b32.xlu0 %v6413_v34, %s6530_s25  ;;  %v85_v16 = vmul.f32 %v5939_v48, %v84_v13 }
 0x4cb   :  { %3985 = vst [vmem:[#allocation4 + $0x18] sm:$0x33] %v6145_v1  ;;  %v4559_v19 = vpop.permute.xlu0 %4558  ;;  %v89_v7 = vmax.f32 %v88_v27, %v85_v16 }
 0x4cc   :  { %v9516_v51 = vsel %vm732_vm2, %v4599_v10, %v4559_v19  ;;  %v99_v10 = vstv %s5941_s28  ;;  %v4574_v39 = vpop.permute.xlu1 %4573 }
 0x4cd   :  { %v100_v43 = vmul.f32 %v5940_v49, %v99_v10 }
 0x4cf   :  { %v4852_v17 = vpop.permute.xlu0 %4851  ;;  %v101_v44 = vadd.f32 0.5, %v100_v43 }
 0x4d0   :  { %v5157_v19 = vpop.permute.xlu1 %5156  ;;  %v4888_v49 = vsel %vm738_vm4, %v4886_v6, %v4852_v17 }
 0x4d1   :  { %v6419_v58 = vround.rtne.f32 %v101_v44  ;;  %v9891_v44 = vld [vmem:[#allocation25_spill] sm:$0xff] }
 0x4d2   :  { %v6443_v55 = vld [vmem:[#allocation4 + $0xc] ss:$16 sps:$4 sm:$0xff]   ;;  %v6445_v14 = vld [vmem:[#allocation4 + $0x8] ss:$16 sps:$4 sm:$0xff]  }
 0x4d3   :  { %v5142_v52 = vpop.permute.xlu0 %5141  ;;  %5886 = vmatprep.subr.bf16.mxu1 %v6443_v55  ;;  %v5942_v22 = vadd.f32 -0.5, %v6419_v58  ;;  %v4873_v55 = vsel %vm738_vm4, %v4871_v40, %v9179_v21 }
 0x4d4   :  { %v9533_v35 = vsel %vm732_vm2, %v9445_v60, %v5142_v52  ;;  %5887 = vmatpush1.bf16.msra.mxu1 %v6445_v14  ;;  %v90_v60 = vstv %s9513_s27  ;;  %v4875_v14 = vsel %vm741_vm5, %v4873_v55, %v9416_v18  ;;  %v9557_v53 = vpop.permute.xlu1 %5703  ;;  %v5454_v18 = vsel %vm735_vm3, %v9891_v44, %v9890_v12  ;;  %v9895_v44 = vld [vmem:[#allocation29_spill] sm:$0xff] }
 0x4d5   :  { %v106_v57 = vmul.f32 %v5942_v22, %v105_v4  ;;  %v91_v56 = vmin.f32 %v90_v60, %v89_v7 }
 0x4d7   :  { %v5435_v45 = vpop.permute.xlu0 %5434  ;;  %v110_v25 = vmax.f32 %v109_v24, %v106_v57  ;;  %v94_v8 = vmul.f32 %v93_v61, %v91_v56 }
 0x4d8   :  { %v5471_v21 = vsel %vm738_vm4, %v5469_v41, %v5435_v45  ;;  %v3073_v58 = vpop.permute.xlu1 %3072 }
 0x4d9   :  { %v112_v47 = vmin.f32 %v111_v23, %v110_v25 }
 0x4db   :  { %v4564_v3 = vpop.permute.xlu0 %4563  ;;  %v115_v46 = vmul.f32 %v114_v20, %v112_v47  ;;  %v9892_v20 = vld [vmem:[#allocation33_spill] sm:$0xff] }
 0x4dc   :  { %v4579_v22 = vpop.permute.xlu1 %4578 }
 0x4dd   :  { %v116_v31 = vadd.f32 %v115_v46, %v94_v8  ;;  %v4588_v8 = vsel %vm735_vm3, %v9892_v20, %v9398_v32 }
 0x4df   :  { %v4857_v29 = vpop.permute.xlu0 %4856  ;;  %v117_v26 = vpack.c.bf16 %v116_v31, %v116_v31 }
 0x4e0   :  { %v4890_v10 = vsel %vm741_vm5, %v4888_v49, %v4857_v29  ;;  %v5162_v24 = vpop.permute.xlu1 %5161 }
 0x4e1   :  { %119 = vst.msk [vmem:[#allocation2] sm:$0xf] %vm118_vm7, %v117_v26  ;;  %v4892_v54 = vsel %vm744_vm6, %v4890_v10, %v9506_v2  ;;  %v5456_v2 = vsel %vm738_vm4, %v5454_v18, %v9382_v15  ;;  %v3111_v18 = vsel %vm725_vm0, %v9895_v44, %v9440_v38 }
 0x4e2   :  { %v5458_v48 = vsel %vm741_vm5, %v5456_v2, %v9434_v59  ;;  %v4603_v59 = vsel %vm735_vm3, %v9516_v51, %v4564_v3 }
 0x4e3   :  { %v5147_v34 = vpop.permute.xlu0 %5146  ;;  %v4605_v23 = vsel %vm738_vm4, %v4603_v59, %v9466_v5 }
 0x4e4   :  { %v5709_v15 = vpop.permute.xlu1 %5708  ;;  %v4607_v47 = vsel %vm741_vm5, %v4605_v23, %v4574_v39 }
 0x4e5   :  { %v4609_v31 = vsel %vm744_vm6, %v4607_v47, %v4579_v22 }
 0x4e7   :  { %v5440_v1 = vpop.permute.xlu0 %5439 }
 0x4e8   :  { %v5473_v13 = vsel %vm741_vm5, %v5471_v21, %v5440_v1  ;;  %v3078_v56 = vpop.permute.xlu1 %3077  ;;  %v9894_v21 = vld [vmem:[#allocation40_spill] sm:$0xff] }
 0x4e9   :  { %v5475_v62 = vsel %vm744_vm6, %v5473_v13, %v9528_v0  ;;  %v5186_v0 = vsel %vm735_vm3, %v9533_v35, %v5147_v34  ;;  %v9893_v35 = vld [vmem:[#allocation34_spill] sm:$0xff]  ;;  %v3096_v12 = vsel %vm725_vm0, %v9288_v28, %v9894_v21  ;;  %v3113_v13 = vsel %vm729_vm1, %v3111_v18, %v9540_v11  ;;  %v9896_v28 = vld [vmem:[#allocation31_spill] sm:$0xff] }
 0x4ea   :  { %v5188_v29 = vsel %vm738_vm4, %v5186_v0, %v9518_v33  ;;  %v5171_v34 = vsel %vm735_vm3, %v9893_v35, %v9423_v9  ;;  %v5747_v22 = vsel %vm725_vm0, %v9896_v28, %v9536_v42 }
 0x4eb   :  { %v4534_v63 = vpop.permute.xlu0 %4533  ;;  %v5190_v39 = vsel %vm741_vm5, %v5188_v29, %v5157_v19 }
 0x4ec   :  { %v4590_v51 = vsel %vm738_vm4, %v4588_v8, %v4534_v63  ;;  %v5714_v26 = vpop.permute.xlu1 %5713  ;;  %v5192_v49 = vsel %vm744_vm6, %v5190_v39, %v5162_v24 }
 0x4ef   :  { %v4827_v36 = vpop.permute.xlu0 %4826 }
 0x4f0   :  { %v4877_v43 = vsel %vm744_vm6, %v4875_v14, %v4827_v36  ;;  %v3083_v10 = vpop.permute.xlu1 %3082 }
 0x4f1   :  { %v6190_v17 = vcombine.low %v4877_v43, %v4892_v54 }
 0x4f3   :  { %v4898_v50 = vrot.slane %v6190_v17, 6  ;;  %v5117_v52 = vpop.permute.xlu0 %5116 }
 0x4f4   :  { %v5173_v1 = vsel %vm738_vm4, %v5171_v34, %v5117_v52  ;;  %v5719_v9 = vpop.permute.xlu1 %5718 }
 0x4f5   :  { %4900 = vst [vmem:[#allocation4 + $0x28] sm:$0xcc] %v4898_v50 }
 0x4f7   :  { %v5410_v27 = vpop.permute.xlu0 %5409 }
 0x4f8   :  { %v5460_v30 = vsel %vm744_vm6, %v5458_v48, %v5410_v27  ;;  %v3088_v19 = vpop.permute.xlu1 %3087 }
 0x4f9   :  { %v6224_v45 = vcombine.low %v5460_v30, %v5475_v62  ;;  %v3115_v30 = vsel %vm732_vm2, %v3113_v13, %v3073_v58  ;;  %v5749_v58 = vsel %vm729_vm1, %v5747_v22, %v9557_v53 }
 0x4fa   :  { %v5751_v23 = vsel %vm732_vm2, %v5749_v58, %v5709_v15 }
 0x4fb   :  { %v5481_v4 = vrot.slane %v6224_v45, 6  ;;  %v5664_v16 = vpop.permute.xlu0 %5663  ;;  %v3117_v45 = vsel %vm735_vm3, %v3115_v30, %v3078_v56 }
 0x4fc   :  { %v5724_v50 = vpop.permute.xlu1 %5723  ;;  %v3119_v38 = vsel %vm738_vm4, %v3117_v45, %v3083_v10  ;;  %v5732_v11 = vsel %vm725_vm0, %v9356_v37, %v5664_v16  ;;  %v5753_v16 = vsel %vm735_vm3, %v5751_v23, %v5714_v26  ;;  %v5767_v26 = vld [vmem:[#allocation2] sm:$0xf] }
 0x4fd   :  { %5483 = vst [vmem:[#allocation4 + $0x38] sm:$0xcc] %v5481_v4  ;;  %v3121_v24 = vsel %vm741_vm5, %v3119_v38, %v3088_v19  ;;  %v5755_v20 = vsel %vm738_vm4, %v5753_v16, %v5719_v9 }
 0x4fe   :  { %v5757_v8 = vsel %vm741_vm5, %v5755_v20, %v5724_v50 }
 0x4ff   :  { %v3033_v60 = vpop.permute.xlu0 %3032 }
 0x500   :  { %v3093_v2 = vpop.permute.xlu1 %3092  ;;  %v3098_v48 = vsel %vm729_vm1, %v3096_v12, %v3033_v60 }
 0x501   :  { %v3123_v42 = vsel %vm744_vm6, %v3121_v24, %v3093_v2 }
 0x503   :  { %v4539_v7 = vpop.permute.xlu0 %4538 }
 0x504   :  { %v4592_v3 = vsel %vm741_vm5, %v4590_v51, %v4539_v7  ;;  %v5729_v0 = vpop.permute.xlu1 %5728 }
 0x505   :  { %v5759_v29 = vsel %vm744_vm6, %v5757_v8, %v5729_v0 }
 0x507   :  { %v5122_v57 = vpop.permute.xlu0 %5121 }
 0x508   :  { %v5175_v33 = vsel %vm741_vm5, %v5173_v1, %v5122_v57 }
 0x50b   :  { %v5669_v61 = vpop.permute.xlu0 %5668 }
 0x50c   :  { %v5734_v7 = vsel %vm729_vm1, %v5732_v11, %v5669_v61 }
 0x50f   :  { %v3038_v25 = vpop.permute.xlu0 %3037 }
 0x510   :  { %v3100_v62 = vsel %vm732_vm2, %v3098_v48, %v3038_v25 }
 0x513   :  { %v4544_v46 = vpop.permute.xlu0 %4543 }
 0x514   :  { %v4594_v5 = vsel %vm744_vm6, %v4592_v3, %v4544_v46 }
 0x515   :  { %v6175_v32 = vcombine.low %v4594_v5, %v4609_v31 }
 0x517   :  { %4616 = vst [vmem:[#allocation4 + $0x28] sm:$0x33] %v6175_v32  ;;  %v5127_v6 = vpop.permute.xlu0 %5126 }
 0x518   :  { %v5177_v63 = vsel %vm744_vm6, %v5175_v33, %v5127_v6 }
 0x519   :  { %v6209_v40 = vcombine.low %v5177_v63, %v5192_v49 }
 0x51b   :  { %5199 = vst [vmem:[#allocation4 + $0x38] sm:$0x33] %v6209_v40  ;;  %v5674_v55 = vpop.permute.xlu0 %5673 }
 0x51c   :  { %v5736_v56 = vsel %vm732_vm2, %v5734_v7, %v5674_v55 }
 0x51f   :  { %v3043_v14 = vpop.permute.xlu0 %3042 }
 0x520   :  { %v3102_v4 = vsel %vm735_vm3, %v3100_v62, %v3043_v14 }
 0x522   :  { %v6446_v36 = vld [vmem:[#allocation4 + $0x2c] ss:$16 sps:$4 sm:$0xff]   ;;  %v6448_v43 = vld [vmem:[#allocation4 + $0x28] ss:$16 sps:$4 sm:$0xff]  }
 0x523   :  { %v5679_v54 = vpop.permute.xlu0 %5678  ;;  %5888 = vmatprep.subr.bf16.mxu1 %v6446_v36 }
 0x524   :  { %5889 = vmatpush1.bf16.msra.mxu1 %v6448_v43  ;;  %v5738_v53 = vsel %vm735_vm3, %v5736_v56, %v5679_v54 }
 0x527   :  { %v3048_v17 = vpop.permute.xlu0 %3047 }
 0x528   :  { %v3104_v60 = vsel %vm738_vm4, %v3102_v4, %v3048_v17 }
 0x52b   :  { %v5684_v41 = vpop.permute.xlu0 %5683 }
 0x52c   :  { %v5740_v61 = vsel %vm738_vm4, %v5738_v53, %v5684_v41 }
 0x52f   :  { %v3053_v52 = vpop.permute.xlu0 %3052 }
 0x530   :  { %v3106_v57 = vsel %vm741_vm5, %v3104_v60, %v3053_v52 }
 0x533   :  { %v5689_v27 = vpop.permute.xlu0 %5688 }
 0x534   :  { %v5742_v15 = vsel %vm741_vm5, %v5740_v61, %v5689_v27 }
 0x537   :  { %v3058_v59 = vpop.permute.xlu0 %3057 }
 0x538   :  { %v3108_v37 = vsel %vm744_vm6, %v3106_v57, %v3058_v59 }
 0x539   :  { %v6100_v25 = vcombine.low %v3108_v37, %v3123_v42 }
 0x53b   :  { %3130 = vst [vmem:[#allocation4 + $0x40] sm:$0x33] %v6100_v25  ;;  %v5694_v47 = vpop.permute.xlu0 %5693 }
 0x53c   :  { %v5744_v51 = vsel %vm744_vm6, %v5742_v15, %v5694_v47 }
 0x53d   :  { %v6239_v3 = vcombine.low %v5744_v51, %v5759_v29 }
 0x53f   :  { %5766 = vst [vmem:[#allocation4 + $0x48] sm:$0x33] %v6239_v3 }
 0x542   :  { %v5776_v46 = vld [vmem:[#allocation4 + $0x40] sm:$0x33] }
 0x543   :  { %v6249_v5 = vcombine.high %v5776_v46, %v5776_v46  ;;  %v6248_v31 = vcombine.low %v5776_v46, %v5776_v46 }
 0x545   :  { %6252 = vmatprep.subr.msk.bf16.mxu0 %vm5832_vm8, %v6249_v5  ;;  %v5834_v35 = vsel %vm5832_vm8, %v6248_v31, 0 }
 0x546   :  { %5850 = vmatpush1.bf16.msra.mxu0 %v5834_v35  ;;  %v5777_v34 = vld [vmem:[#allocation4 + $0x48] sm:$0x33] }
 0x547   :  { %v6251_v32 = vcombine.high %v5777_v34, %v5777_v34  ;;  %v6250_v39 = vcombine.low %v5777_v34, %v5777_v34 }
 0x549   :  { %6254 = vmatprep.subr.msk.bf16.mxu1 %vm5832_vm8, %v6251_v32  ;;  %6253 = vmatmul.mubr.msk.bf16.vlgmr.msra.gmra.mrb[0].mxu0 %vm5828_vm9, %v5767_v26  ;;  %v5840_v1 = vsel %vm5832_vm8, %v6250_v39, 0 }
 0x54a   :  { %5891 = vmatpush1.bf16.msra.mxu1 %v5840_v1 }
 0x54d   :  { %6255 = vmatmul.mubr.msk.bf16.vlgmr.msra.gmra.mrb[0].mxu1 %vm5828_vm9, %v5767_v26 }
 0x61c   :  { %v5879_v33 = vpop.f32.mrb[0].mxu0 }
 0x61d   :  { %5927 = vst [vmem:[%s9653_s6] sm:$0xff] %v5879_v33  ;;  %v5881_v6 = vpop.f32.mrb[1].mxu0 }
 0x61e   :  { %5928 = vst [vmem:[%s9653_s6 + $0x8] sm:$0xff] %v5881_v6  ;;  %v5883_v63 = vpop.f32.mrb[2].mxu0 }
 0x61f   :  { %v5884_v49 = vpop.f32.mrb[3].mxu0 }
 0x620   :  { %v5920_v40 = vpop.f32.mrb[0].mxu1 }
 0x621   :  { %6256 = vst [vmem:[%s9653_s6 + $0x10] sm:$0xff] %v5920_v40  ;;  %v5922_v10 = vpop.f32.mrb[1].mxu1 }
 0x622   :  { %6257 = vst [vmem:[%s9653_s6 + $0x18] sm:$0xff] %v5922_v10  ;;  %v5924_v55 = vpop.f32.mrb[2].mxu1 }
 0x623   :  { %v5925_v14 = vpop.f32.mrb[3].mxu1 }
 0x624   :  { %5936 = vsyncpa [#allocation6], 1 }
 0x625   :  { %5937 = vsyncpa [#allocation8], 1 }
 0x626   :  { %5938 = vsyncpa [#allocation11], 1 }

</bundles_post_ra>
